<compile_context>
chip_gen: v7x
topology: tpu7x:2x2x1
jax: 0.10.0
libtpu: 0.0.40
codegen_flags: <defaults>
</compile_context>

<pallas_src>
import functools

import jax
import jax.numpy as jnp
from jax import lax
from jax.experimental import pallas as pl
from jax.experimental.pallas import tpu as pltpu

EPS = 1e-5          # torch.nn.GroupNorm default eps
NUM_GROUPS = 32     # normalization() == GroupNorm32(32, C)

# Channel width at/above which the im2col (deep-K) conv form is used.  Below
# it every per-tap im2col write would be a sub-128-lane masked store and
# K=C already fills half of a 256-wide MXU, so the 9-matmul form wins.
# On v5e (128-wide MXU) set this above the max channel count.
IM2COL_MIN_C = 128


def _round_up(x, m):
    return (x + m - 1) // m * m


def _silu(x):
    return x * jax.nn.sigmoid(x)


def _group_mix(C, groups, dtype=jnp.float32):
    """(C, C) matrix with gm[i, j] = 1 iff channels i and j share a group.

    Summing per-channel statistics through it yields per-channel group sums
    without (G, C/G) reshapes inside the kernel (MXU-friendly).  Precomputed
    on the host so it is not rebuilt every grid step.
    """
    g = jnp.arange(C) // (C // groups)
    return (g[:, None] == g[None, :]).astype(dtype)


def _groupnorm_silu(x2, gm, gamma, beta, hw, cpg):
    """Centred two-pass GroupNorm + SiLU on a (HW, C) f32 block (f32 stats)."""
    cnt = float(hw * cpg)
    mean = jnp.dot(jnp.sum(x2, axis=0, keepdims=True), gm,
                   preferred_element_type=jnp.float32) / cnt
    xc = x2 - mean                                   # centred (avoids E[x^2]-m^2)
    var = jnp.dot(jnp.sum(xc * xc, axis=0, keepdims=True), gm,
                  preferred_element_type=jnp.float32) / cnt
    scale = lax.rsqrt(var + EPS) * gamma             # pre-combined (1, C) scale
    return _silu(xc * scale + beta)


def _fill_halo(pad_ref, y3, H, W):
    """Write y3 (H, W, C) into the interior of the bf16 halo buffer.

    Only the 1-pixel border strips are zeroed (the interior is fully
    overwritten every step, so a full clear is wasted store bandwidth).
    The border is re-zeroed every grid step so this stays megacore-safe.
    """
    Wp, C = pad_ref.shape[1], pad_ref.shape[2]
    dt = pad_ref.dtype
    pad_ref[0:1, :, :] = jnp.zeros((1, Wp, C), dt)            # top halo row
    pad_ref[H + 1:H + 2, :, :] = jnp.zeros((1, Wp, C), dt)    # bottom halo row
    pad_ref[1:H + 1, 0:1, :] = jnp.zeros((H, 1, C), dt)       # left halo column
    pad_ref[1:H + 1, W + 1:W + 2, :] = jnp.zeros((H, 1, C), dt)  # right halo column
    pad_ref[1:H + 1, 1:W + 1, :] = y3.astype(dt)              # single f32->bf16 cast


def _conv3x3_im2col(pad_ref, col_ref, w_ref, b_ref, H, W, C):
    """im2col form: 9 lane-dense bf16 tap writes + one deep-K MXU matmul."""
    for k in range(9):
        dy, dx = divmod(k, 3)
        col_ref[:, k * C:(k + 1) * C] = (
            pad_ref[dy:dy + H, dx:dx + W, :].reshape(H * W, C))
    return jnp.dot(col_ref[...], w_ref[...],
                   preferred_element_type=jnp.float32) + b_ref[...]


def _conv3x3_matmul9(pad_ref, w_ref, b_ref, H, W, C):
    """9 accumulating matmuls read straight from the halo buffer.

    No col scratch and no sub-128-lane masked stores; used for channel
    widths that are not a multiple of 128 (and everywhere on v5e).
    """
    acc = None
    for k in range(9):
        dy, dx = divmod(k, 3)
        lhs = pad_ref[dy:dy + H, dx:dx + W, :].reshape(H * W, C)
        d = jnp.dot(lhs, w_ref[k * C:(k + 1) * C, :],
                    preferred_element_type=jnp.float32)
        acc = d if acc is None else acc + d
    return acc + b_ref[...]


def _conv3x3(pad_ref, col_ref, w_ref, b_ref, H, W, C):
    if col_ref is None:
        return _conv3x3_matmul9(pad_ref, w_ref, b_ref, H, W, C)
    return _conv3x3_im2col(pad_ref, col_ref, w_ref, b_ref, H, W, C)


def _conv_scratch(H, W, C):
    """Scratch buffers for one 3x3 conv: bf16 halo buffer (+ bf16 col matrix
    when the im2col form is used).  W+2 padded to a multiple of 8 so the
    dx-shifted tap slices land on sublane-friendly offsets."""
    Wp = _round_up(W + 2, 8)
    shapes = [pltpu.VMEM((H + 2, Wp, C), jnp.bfloat16)]
    if C >= IM2COL_MIN_C and C % 128 == 0:
        shapes.append(pltpu.VMEM((H * W, 9 * C), jnp.bfloat16))
    return shapes


# --------------------------------------------------------------------------
# Kernel 1: in_layers = GroupNorm32 -> SiLU -> conv3x3   (fused)
# --------------------------------------------------------------------------
def _in_layers_kernel(x_ref, gm_ref, gamma_ref, beta_ref, w_ref, b_ref,
                      o_ref, *scratch, groups):
    _, H, W, Cin = x_ref.shape
    Cout = o_ref.shape[3]
    pad_ref = scratch[0]
    col_ref = scratch[1] if len(scratch) > 1 else None

    x2 = x_ref[...].astype(jnp.float32).reshape(H * W, Cin)
    y = _groupnorm_silu(x2, gm_ref[...], gamma_ref[...], beta_ref[...],
                        H * W, Cin // groups)
    _fill_halo(pad_ref, y.reshape(H, W, Cin), H, W)
    acc = _conv3x3(pad_ref, col_ref, w_ref, b_ref, H, W, Cin)
    o_ref[...] = acc.reshape(1, H, W, Cout).astype(o_ref.dtype)   # bf16 h out


# --------------------------------------------------------------------------
# Kernel 2: emb_layers + (h + emb) + out_layers (GN -> SiLU -> conv3x3)
#           + skip 1x1 conv + residual add          (fused)
# --------------------------------------------------------------------------
def _out_layers_kernel(h_ref, x_ref, emb_ref, gm_ref, gamma_ref, beta_ref,
                       ew_ref, eb_ref, w_ref, b_ref, sw_ref, sb_ref,
                       o_ref, *scratch, groups):
    _, H, W, C = h_ref.shape            # C = out_channels
    Cin = x_ref.shape[3]
    E = emb_ref.shape[2]
    pad_ref = scratch[0]
    col_ref = scratch[1] if len(scratch) > 1 else None

    # emb_layers: SiLU -> Linear (tiny matmul, fused here; no HBM round trip)
    e = _silu(emb_ref[...].astype(jnp.float32).reshape(1, E))
    eo = jnp.dot(e.astype(jnp.bfloat16), ew_ref[...],
                 preferred_element_type=jnp.float32) + eb_ref[...]      # (1, C)

    # h = h + emb_out ; out_layers: GroupNorm32 -> SiLU -> Dropout(identity)
    h2 = h_ref[...].astype(jnp.float32).reshape(H * W, C) + eo
    y = _groupnorm_silu(h2, gm_ref[...], gamma_ref[...], beta_ref[...],
                        H * W, C // groups)
    _fill_halo(pad_ref, y.reshape(H, W, C), H, W)
    conv = _conv3x3(pad_ref, col_ref, w_ref, b_ref, H, W, C)

    # skip_connection(x): 1x1 conv (out_channels != channels) + residual add
    x2 = x_ref[...].astype(jnp.bfloat16).reshape(H * W, Cin)
    skip = jnp.dot(x2, sw_ref[...],
                   preferred_element_type=jnp.float32) + sb_ref[...]
    o_ref[...] = (conv + skip).reshape(1, H, W, C).astype(o_ref.dtype)


# --------------------------------------------------------------------------
# Forward wrappers
# --------------------------------------------------------------------------
def resblock_forward_nhwc(x, emb, p, groups=NUM_GROUPS):
    """NHWC in / NHWC out — recommended entry when chaining ResBlocks."""
    N, H, W, Cin = x.shape
    Cout = p["conv1_w"].shape[-1]
    E = emb.shape[-1]

    x = x.astype(jnp.float32)
    emb3 = emb.astype(jnp.float32).reshape(N, 1, E)
    gm1 = _group_mix(Cin, groups)
    gm2 = _group_mix(Cout, groups)
    w1 = p["conv1_w"].reshape(9 * Cin, Cout)     # (ky, kx, cin) flattened; bf16
    w2 = p["conv2_w"].reshape(9 * Cout, Cout)    # bf16

    k1 = functools.partial(_in_layers_kernel, groups=groups)
    h = pl.pallas_call(
        k1,
        # bf16 inter-kernel activation halves the only HBM round trip.
        out_shape=jax.ShapeDtypeStruct((N, H, W, Cout), jnp.bfloat16),
        grid=(N,),
        in_specs=[
            pl.BlockSpec((1, H, W, Cin), lambda n: (n, 0, 0, 0)),
            pl.BlockSpec((Cin, Cin), lambda n: (0, 0)),
            pl.BlockSpec((1, Cin), lambda n: (0, 0)),
            pl.BlockSpec((1, Cin), lambda n: (0, 0)),
            pl.BlockSpec((9 * Cin, Cout), lambda n: (0, 0)),
            pl.BlockSpec((1, Cout), lambda n: (0, 0)),
        ],
        out_specs=pl.BlockSpec((1, H, W, Cout), lambda n: (n, 0, 0, 0)),
        scratch_shapes=_conv_scratch(H, W, Cin),
        compiler_params=pltpu.CompilerParams(dimension_semantics=("parallel",)),
    )(x, gm1, p["gn1_gamma"], p["gn1_beta"], w1, p["conv1_b"])

    k2 = functools.partial(_out_layers_kernel, groups=groups)
    out = pl.pallas_call(
        k2,
        out_shape=jax.ShapeDtypeStruct((N, H, W, Cout), jnp.float32),
        grid=(N,),
        in_specs=[
            pl.BlockSpec((1, H, W, Cout), lambda n: (n, 0, 0, 0)),  # h (bf16)
            pl.BlockSpec((1, H, W, Cin), lambda n: (n, 0, 0, 0)),   # x (skip)
            pl.BlockSpec((1, 1, E), lambda n: (n, 0, 0)),           # emb
            pl.BlockSpec((Cout, Cout), lambda n: (0, 0)),           # gm2
            pl.BlockSpec((1, Cout), lambda n: (0, 0)),              # gn2 gamma
            pl.BlockSpec((1, Cout), lambda n: (0, 0)),              # gn2 beta
            pl.BlockSpec((E, Cout), lambda n: (0, 0)),              # emb_w
            pl.BlockSpec((1, Cout), lambda n: (0, 0)),              # emb_b
            pl.BlockSpec((9 * Cout, Cout), lambda n: (0, 0)),       # conv2_w
            pl.BlockSpec((1, Cout), lambda n: (0, 0)),              # conv2_b
            pl.BlockSpec((Cin, Cout), lambda n: (0, 0)),            # skip_w
            pl.BlockSpec((1, Cout), lambda n: (0, 0)),              # skip_b
        ],
        out_specs=pl.BlockSpec((1, H, W, Cout), lambda n: (n, 0, 0, 0)),
        scratch_shapes=_conv_scratch(H, W, Cout),
        compiler_params=pltpu.CompilerParams(dimension_semantics=("parallel",)),
    )(h, x, emb3, gm2, p["gn2_gamma"], p["gn2_beta"],
      p["emb_w"], p["emb_b"], w2, p["conv2_b"], p["skip_w"], p["skip_b"])
    return out


def resblock_forward(x_nchw, emb, p):
    """PyTorch-compat boundary: NCHW in / NCHW out (like the nn.Module).

    When chaining ResBlocks, keep activations NHWC and call
    resblock_forward_nhwc directly to avoid these two transposes.
    """
    x = jnp.transpose(x_nchw, (0, 2, 3, 1))
    out = resblock_forward_nhwc(x, emb, p)
    return jnp.transpose(out, (0, 3, 1, 2))


# --------------------------------------------------------------------------
# Pure-JAX reference (precision-matched: bf16 MXU operands, f32 accumulation,
# bf16 inter-kernel activation)
# --------------------------------------------------------------------------
def _ref_groupnorm(x, g, b, groups=NUM_GROUPS):
    N, H, W, C = x.shape
    xg = x.reshape(N, H, W, groups, C // groups)
    mean = xg.mean(axis=(1, 2, 4), keepdims=True)
    var = ((xg - mean) ** 2).mean(axis=(1, 2, 4), keepdims=True)
    xn = ((xg - mean) / jnp.sqrt(var + EPS)).reshape(N, H, W, C)
    return xn * g.reshape(1, 1, 1, C) + b.reshape(1, 1, 1, C)


def _ref_conv3x3(x, w_bf16, b):
    y = lax.conv_general_dilated(x.astype(jnp.bfloat16), w_bf16, (1, 1), "SAME",
                                 dimension_numbers=("NHWC", "HWIO", "NHWC"),
                                 preferred_element_type=jnp.float32)
    return y + b.reshape(1, 1, 1, -1)


def _ref_resblock_nhwc(x, emb, p):
    N, H, W, Cin = x.shape
    h = _silu(_ref_groupnorm(x, p["gn1_gamma"][0], p["gn1_beta"][0]))
    h = _ref_conv3x3(h, p["conv1_w"], p["conv1_b"][0])
    h = h.astype(jnp.bfloat16).astype(jnp.float32)   # match bf16 inter-kernel h
    eo = jnp.dot(_silu(emb).astype(jnp.bfloat16), p["emb_w"],
                 preferred_element_type=jnp.float32) + p["emb_b"]
    h = h + eo[:, None, None, :]
    h = _silu(_ref_groupnorm(h, p["gn2_gamma"][0], p["gn2_beta"][0]))
    h = _ref_conv3x3(h, p["conv2_w"], p["conv2_b"][0])
    skip = jnp.dot(x.reshape(N * H * W, Cin).astype(jnp.bfloat16), p["skip_w"],
                   preferred_element_type=jnp.float32)
    skip = skip.reshape(N, H, W, -1) + p["skip_b"].reshape(1, 1, 1, -1)
    return skip + h


if __name__ == "__main__":
    # Small shapes consistent with the module: GroupNorm(32, C) needs C % 32 == 0;
    # out_channels (128) != channels (64) so the 1x1-conv skip path is exercised,
    # and the 128-channel outputs give lane-dense (>=128) stores.
    N, C_IN, C_OUT, C_EMB, H, W = 2, 64, 128, 96, 16, 16
    bf16 = jnp.bfloat16

    key = jax.random.PRNGKey(0)
    ks = jax.random.split(key, 10)

    params = {
        # GroupNorm affine params (PyTorch default init: gamma=1, beta=0)
        "gn1_gamma": jnp.ones((1, C_IN), jnp.float32),
        "gn1_beta": jnp.zeros((1, C_IN), jnp.float32),
        "gn2_gamma": jnp.ones((1, C_OUT), jnp.float32),
        "gn2_beta": jnp.zeros((1, C_OUT), jnp.float32),
        # in_layers conv3x3 (HWIO), stored bf16 for MXU / halved weight DMA
        "conv1_w": (0.05 * jax.random.normal(ks[0], (3, 3, C_IN, C_OUT))).astype(bf16),
        "conv1_b": 0.05 * jax.random.normal(ks[1], (1, C_OUT), jnp.float32),
        # emb_layers linear, stored as (in, out) bf16
        "emb_w": (0.05 * jax.random.normal(ks[2], (C_EMB, C_OUT))).astype(bf16),
        "emb_b": 0.05 * jax.random.normal(ks[3], (1, C_OUT), jnp.float32),
        # out_layers conv3x3.  NOTE: zero_module() zero-initializes this conv in
        # the original; nonzero values used so the kernel path is exercised.
        "conv2_w": (0.05 * jax.random.normal(ks[4], (3, 3, C_OUT, C_OUT))).astype(bf16),
        "conv2_b": 0.05 * jax.random.normal(ks[5], (1, C_OUT), jnp.float32),
        # skip_connection 1x1 conv (out_channels != channels, use_conv=False)
        "skip_w": (0.05 * jax.random.normal(ks[6], (C_IN, C_OUT))).astype(bf16),
        "skip_b": 0.05 * jax.random.normal(ks[7], (1, C_OUT), jnp.float32),
    }

    x_nchw = jax.random.normal(ks[8], (N, C_IN, H, W), jnp.float32)  # like PyTorch
    emb = jax.random.normal(ks[9], (N, C_EMB), jnp.float32)

    out = jax.block_until_ready(resblock_forward(x_nchw, emb, params))
    assert out.shape == (N, C_OUT, H, W)

    x_nhwc = jnp.transpose(x_nchw, (0, 2, 3, 1))
    ref = jnp.transpose(_ref_resblock_nhwc(x_nhwc, emb, params), (0, 3, 1, 2))
    err = float(jnp.max(jnp.abs(out - ref)))
    assert jnp.allclose(out, ref, atol=3e-3, rtol=3e-3), f"max abs err {err}"

    print("KERNEL_OK")
</pallas_src>

<mosaic_0001>
module attributes {stable_mosaic.version = 11 : i64} {
  func.func @_in_layers_kernel(%arg0: i32, %arg1: memref<1x16x16x64xf32, #tpu.memory_space<vmem>>, %arg2: memref<64x64xf32, #tpu.memory_space<vmem>>, %arg3: memref<1x64xf32, #tpu.memory_space<vmem>>, %arg4: memref<1x64xf32, #tpu.memory_space<vmem>>, %arg5: memref<576x128xbf16, #tpu.memory_space<vmem>>, %arg6: memref<1x128xf32, #tpu.memory_space<vmem>>, %arg7: memref<1x16x16x128xbf16, #tpu.memory_space<vmem>>, %arg8: memref<18x24x64xbf16, #tpu.memory_space<vmem>>) attributes {dimension_semantics = [#tpu.dimension_semantics<parallel>], iteration_bounds = array<i64: 2>, scalar_prefetch = 0 : i64, scratch_operands = 1 : i64, tpu.core_type = #tpu.core_type<tc>, window_params = [{transform_indices = @transform_0, window_bounds = array<i64: 1, 16, 16, 64>}, {pipeline_mode = #tpu.pipeline_mode<synchronous>, transform_indices = @transform_1, window_bounds = array<i64: 64, 64>}, {pipeline_mode = #tpu.pipeline_mode<synchronous>, transform_indices = @transform_2, window_bounds = array<i64: 1, 64>}, {pipeline_mode = #tpu.pipeline_mode<synchronous>, transform_indices = @transform_3, window_bounds = array<i64: 1, 64>}, {pipeline_mode = #tpu.pipeline_mode<synchronous>, transform_indices = @transform_4, window_bounds = array<i64: 576, 128>}, {pipeline_mode = #tpu.pipeline_mode<synchronous>, transform_indices = @transform_5, window_bounds = array<i64: 1, 128>}, {transform_indices = @transform_6, window_bounds = array<i64: 1, 16, 16, 128>}]} {
    %c0 = arith.constant 0 : index
    %c0_0 = arith.constant 0 : index
    %c0_1 = arith.constant 0 : index
    %c0_2 = arith.constant 0 : index
    %0 = vector.load %arg1[%c0, %c0_0, %c0_1, %c0_2] : memref<1x16x16x64xf32, #tpu.memory_space<vmem>>, vector<1x16x16x64xf32>
    %1 = vector.shape_cast %0 : vector<1x16x16x64xf32> to vector<256x64xf32>
    %c0_3 = arith.constant 0 : index
    %c0_4 = arith.constant 0 : index
    %2 = vector.load %arg2[%c0_3, %c0_4] : memref<64x64xf32, #tpu.memory_space<vmem>>, vector<64x64xf32>
    %c0_5 = arith.constant 0 : index
    %c0_6 = arith.constant 0 : index
    %3 = vector.load %arg3[%c0_5, %c0_6] : memref<1x64xf32, #tpu.memory_space<vmem>>, vector<1x64xf32>
    %c0_7 = arith.constant 0 : index
    %c0_8 = arith.constant 0 : index
    %4 = vector.load %arg4[%c0_7, %c0_8] : memref<1x64xf32, #tpu.memory_space<vmem>>, vector<1x64xf32>
    %cst = arith.constant dense<0.000000e+00> : vector<64xf32>
    %5 = vector.multi_reduction <add>, %1, %cst [0] : vector<256x64xf32> to vector<64xf32>
    %6 = vector.shape_cast %5 : vector<64xf32> to vector<1x64xf32>
    %cst_9 = arith.constant dense<0.000000e+00> : vector<1x64xf32>
    %7 = tpu.matmul %6, %2, %cst_9 {dimension_numbers = #tpu.dot_dimension_numbers<[1], [0], [0], [1], [0, 0, 1, 1], [], []>} : vector<1x64xf32>, vector<64x64xf32>, vector<1x64xf32> -> vector<1x64xf32>
    %cst_10 = arith.constant 5.120000e+02 : f32
    %8 = vector.broadcast %cst_10 : f32 to vector<1x64xf32>
    %9 = arith.divf %7, %8 : vector<1x64xf32>
    %10 = vector.broadcast %9 : vector<1x64xf32> to vector<256x64xf32>
    %11 = arith.subf %1, %10 : vector<256x64xf32>
    %12 = arith.mulf %11, %11 : vector<256x64xf32>
    %cst_11 = arith.constant dense<0.000000e+00> : vector<64xf32>
    %13 = vector.multi_reduction <add>, %12, %cst_11 [0] : vector<256x64xf32> to vector<64xf32>
    %14 = vector.shape_cast %13 : vector<64xf32> to vector<1x64xf32>
    %cst_12 = arith.constant dense<0.000000e+00> : vector<1x64xf32>
    %15 = tpu.matmul %14, %2, %cst_12 {dimension_numbers = #tpu.dot_dimension_numbers<[1], [0], [0], [1], [0, 0, 1, 1], [], []>} : vector<1x64xf32>, vector<64x64xf32>, vector<1x64xf32> -> vector<1x64xf32>
    %cst_13 = arith.constant 5.120000e+02 : f32
    %16 = vector.broadcast %cst_13 : f32 to vector<1x64xf32>
    %17 = arith.divf %15, %16 : vector<1x64xf32>
    %cst_14 = arith.constant 9.99999974E-6 : f32
    %18 = vector.broadcast %cst_14 : f32 to vector<1x64xf32>
    %19 = arith.addf %17, %18 : vector<1x64xf32>
    %20 = math.rsqrt %19 : vector<1x64xf32>
    %21 = arith.mulf %20, %3 : vector<1x64xf32>
    %22 = vector.broadcast %21 : vector<1x64xf32> to vector<256x64xf32>
    %23 = arith.mulf %11, %22 : vector<256x64xf32>
    %24 = vector.broadcast %4 : vector<1x64xf32> to vector<256x64xf32>
    %25 = arith.addf %23, %24 : vector<256x64xf32>
    %26 = arith.negf %25 : vector<256x64xf32>
    %27 = math.exp %26 : vector<256x64xf32>
    %cst_15 = arith.constant 1.000000e+00 : f32
    %28 = vector.broadcast %cst_15 : f32 to vector<256x64xf32>
    %29 = arith.addf %28, %27 : vector<256x64xf32>
    %30 = arith.divf %28, %29 : vector<256x64xf32>
    %31 = arith.mulf %25, %30 : vector<256x64xf32>
    %32 = vector.shape_cast %31 : vector<256x64xf32> to vector<16x16x64xf32>
    %cst_16 = arith.constant 0.000000e+00 : bf16
    %33 = vector.broadcast %cst_16 : bf16 to vector<1x24x64xbf16>
    %c0_17 = arith.constant 0 : index
    %c0_18 = arith.constant 0 : index
    %c0_19 = arith.constant 0 : index
    %34 = vector.load %arg8[%c0_17, %c0_18, %c0_19] : memref<18x24x64xbf16, #tpu.memory_space<vmem>>, vector<1x24x64xbf16>
    tpu.vector_store %arg8[%c0_17, %c0_18, %c0_19], %33 {strides = array<i32>} : memref<18x24x64xbf16, #tpu.memory_space<vmem>>, vector<1x24x64xbf16>,
    %cst_20 = arith.constant 0.000000e+00 : bf16
    %35 = vector.broadcast %cst_20 : bf16 to vector<1x24x64xbf16>
    %c17 = arith.constant 17 : index
    %c0_21 = arith.constant 0 : index
    %c0_22 = arith.constant 0 : index
    %36 = vector.load %arg8[%c17, %c0_21, %c0_22] : memref<18x24x64xbf16, #tpu.memory_space<vmem>>, vector<1x24x64xbf16>
    tpu.vector_store %arg8[%c17, %c0_21, %c0_22], %35 {strides = array<i32>} : memref<18x24x64xbf16, #tpu.memory_space<vmem>>, vector<1x24x64xbf16>,
    %cst_23 = arith.constant 0.000000e+00 : bf16
    %37 = vector.broadcast %cst_23 : bf16 to vector<16x1x64xbf16>
    %c1 = arith.constant 1 : index
    %c0_24 = arith.constant 0 : index
    %c0_25 = arith.constant 0 : index
    %38 = vector.load %arg8[%c1, %c0_24, %c0_25] : memref<18x24x64xbf16, #tpu.memory_space<vmem>>, vector<16x1x64xbf16>
    tpu.vector_store %arg8[%c1, %c0_24, %c0_25], %37 {strides = array<i32>} : memref<18x24x64xbf16, #tpu.memory_space<vmem>>, vector<16x1x64xbf16>,
    %cst_26 = arith.constant 0.000000e+00 : bf16
    %39 = vector.broadcast %cst_26 : bf16 to vector<16x1x64xbf16>
    %c1_27 = arith.constant 1 : index
    %c17_28 = arith.constant 17 : index
    %c0_29 = arith.constant 0 : index
    %40 = vector.load %arg8[%c1_27, %c17_28, %c0_29] : memref<18x24x64xbf16, #tpu.memory_space<vmem>>, vector<16x1x64xbf16>
    tpu.vector_store %arg8[%c1_27, %c17_28, %c0_29], %39 {strides = array<i32>} : memref<18x24x64xbf16, #tpu.memory_space<vmem>>, vector<16x1x64xbf16>,
    %41 = arith.truncf %32 : vector<16x16x64xf32> to vector<16x16x64xbf16>
    %c1_30 = arith.constant 1 : index
    %c1_31 = arith.constant 1 : index
    %c0_32 = arith.constant 0 : index
    %42 = vector.load %arg8[%c1_30, %c1_31, %c0_32] : memref<18x24x64xbf16, #tpu.memory_space<vmem>>, vector<16x16x64xbf16>
    tpu.vector_store %arg8[%c1_30, %c1_31, %c0_32], %41 {strides = array<i32>} : memref<18x24x64xbf16, #tpu.memory_space<vmem>>, vector<16x16x64xbf16>,
    %c0_33 = arith.constant 0 : index
    %c0_34 = arith.constant 0 : index
    %c0_35 = arith.constant 0 : index
    %43 = vector.load %arg8[%c0_33, %c0_34, %c0_35] : memref<18x24x64xbf16, #tpu.memory_space<vmem>>, vector<16x16x64xbf16>
    %44 = vector.shape_cast %43 : vector<16x16x64xbf16> to vector<256x64xbf16>
    %c0_36 = arith.constant 0 : index
    %c0_37 = arith.constant 0 : index
    %45 = vector.load %arg5[%c0_36, %c0_37] : memref<576x128xbf16, #tpu.memory_space<vmem>>, vector<64x128xbf16>
    %cst_38 = arith.constant dense<0.000000e+00> : vector<256x128xf32>
    %46 = tpu.matmul %44, %45, %cst_38 {dimension_numbers = #tpu.dot_dimension_numbers<[1], [0], [0], [1], [0, 0, 1, 1], [], []>} : vector<256x64xbf16>, vector<64x128xbf16>, vector<256x128xf32> -> vector<256x128xf32>
    %c0_39 = arith.constant 0 : index
    %c1_40 = arith.constant 1 : index
    %c0_41 = arith.constant 0 : index
    %47 = vector.load %arg8[%c0_39, %c1_40, %c0_41] : memref<18x24x64xbf16, #tpu.memory_space<vmem>>, vector<16x16x64xbf16>
    %48 = vector.shape_cast %47 : vector<16x16x64xbf16> to vector<256x64xbf16>
    %c64 = arith.constant 64 : index
    %c0_42 = arith.constant 0 : index
    %49 = vector.load %arg5[%c64, %c0_42] : memref<576x128xbf16, #tpu.memory_space<vmem>>, vector<64x128xbf16>
    %cst_43 = arith.constant dense<0.000000e+00> : vector<256x128xf32>
    %50 = tpu.matmul %48, %49, %cst_43 {dimension_numbers = #tpu.dot_dimension_numbers<[1], [0], [0], [1], [0, 0, 1, 1], [], []>} : vector<256x64xbf16>, vector<64x128xbf16>, vector<256x128xf32> -> vector<256x128xf32>
    %51 = arith.addf %46, %50 : vector<256x128xf32>
    %c0_44 = arith.constant 0 : index
    %c2 = arith.constant 2 : index
    %c0_45 = arith.constant 0 : index
    %52 = vector.load %arg8[%c0_44, %c2, %c0_45] : memref<18x24x64xbf16, #tpu.memory_space<vmem>>, vector<16x16x64xbf16>
    %53 = vector.shape_cast %52 : vector<16x16x64xbf16> to vector<256x64xbf16>
    %c128 = arith.constant 128 : index
    %c0_46 = arith.constant 0 : index
    %54 = vector.load %arg5[%c128, %c0_46] : memref<576x128xbf16, #tpu.memory_space<vmem>>, vector<64x128xbf16>
    %cst_47 = arith.constant dense<0.000000e+00> : vector<256x128xf32>
    %55 = tpu.matmul %53, %54, %cst_47 {dimension_numbers = #tpu.dot_dimension_numbers<[1], [0], [0], [1], [0, 0, 1, 1], [], []>} : vector<256x64xbf16>, vector<64x128xbf16>, vector<256x128xf32> -> vector<256x128xf32>
    %56 = arith.addf %51, %55 : vector<256x128xf32>
    %c1_48 = arith.constant 1 : index
    %c0_49 = arith.constant 0 : index
    %c0_50 = arith.constant 0 : index
    %57 = vector.load %arg8[%c1_48, %c0_49, %c0_50] : memref<18x24x64xbf16, #tpu.memory_space<vmem>>, vector<16x16x64xbf16>
    %58 = vector.shape_cast %57 : vector<16x16x64xbf16> to vector<256x64xbf16>
    %c192 = arith.constant 192 : index
    %c0_51 = arith.constant 0 : index
    %59 = vector.load %arg5[%c192, %c0_51] : memref<576x128xbf16, #tpu.memory_space<vmem>>, vector<64x128xbf16>
    %cst_52 = arith.constant dense<0.000000e+00> : vector<256x128xf32>
    %60 = tpu.matmul %58, %59, %cst_52 {dimension_numbers = #tpu.dot_dimension_numbers<[1], [0], [0], [1], [0, 0, 1, 1], [], []>} : vector<256x64xbf16>, vector<64x128xbf16>, vector<256x128xf32> -> vector<256x128xf32>
    %61 = arith.addf %56, %60 : vector<256x128xf32>
    %c1_53 = arith.constant 1 : index
    %c1_54 = arith.constant 1 : index
    %c0_55 = arith.constant 0 : index
    %62 = vector.load %arg8[%c1_53, %c1_54, %c0_55] : memref<18x24x64xbf16, #tpu.memory_space<vmem>>, vector<16x16x64xbf16>
    %63 = vector.shape_cast %62 : vector<16x16x64xbf16> to vector<256x64xbf16>
    %c256 = arith.constant 256 : index
    %c0_56 = arith.constant 0 : index
    %64 = vector.load %arg5[%c256, %c0_56] : memref<576x128xbf16, #tpu.memory_space<vmem>>, vector<64x128xbf16>
    %cst_57 = arith.constant dense<0.000000e+00> : vector<256x128xf32>
    %65 = tpu.matmul %63, %64, %cst_57 {dimension_numbers = #tpu.dot_dimension_numbers<[1], [0], [0], [1], [0, 0, 1, 1], [], []>} : vector<256x64xbf16>, vector<64x128xbf16>, vector<256x128xf32> -> vector<256x128xf32>
    %66 = arith.addf %61, %65 : vector<256x128xf32>
    %c1_58 = arith.constant 1 : index
    %c2_59 = arith.constant 2 : index
    %c0_60 = arith.constant 0 : index
    %67 = vector.load %arg8[%c1_58, %c2_59, %c0_60] : memref<18x24x64xbf16, #tpu.memory_space<vmem>>, vector<16x16x64xbf16>
    %68 = vector.shape_cast %67 : vector<16x16x64xbf16> to vector<256x64xbf16>
    %c320 = arith.constant 320 : index
    %c0_61 = arith.constant 0 : index
    %69 = vector.load %arg5[%c320, %c0_61] : memref<576x128xbf16, #tpu.memory_space<vmem>>, vector<64x128xbf16>
    %cst_62 = arith.constant dense<0.000000e+00> : vector<256x128xf32>
    %70 = tpu.matmul %68, %69, %cst_62 {dimension_numbers = #tpu.dot_dimension_numbers<[1], [0], [0], [1], [0, 0, 1, 1], [], []>} : vector<256x64xbf16>, vector<64x128xbf16>, vector<256x128xf32> -> vector<256x128xf32>
    %71 = arith.addf %66, %70 : vector<256x128xf32>
    %c2_63 = arith.constant 2 : index
    %c0_64 = arith.constant 0 : index
    %c0_65 = arith.constant 0 : index
    %72 = vector.load %arg8[%c2_63, %c0_64, %c0_65] : memref<18x24x64xbf16, #tpu.memory_space<vmem>>, vector<16x16x64xbf16>
    %73 = vector.shape_cast %72 : vector<16x16x64xbf16> to vector<256x64xbf16>
    %c384 = arith.constant 384 : index
    %c0_66 = arith.constant 0 : index
    %74 = vector.load %arg5[%c384, %c0_66] : memref<576x128xbf16, #tpu.memory_space<vmem>>, vector<64x128xbf16>
    %cst_67 = arith.constant dense<0.000000e+00> : vector<256x128xf32>
    %75 = tpu.matmul %73, %74, %cst_67 {dimension_numbers = #tpu.dot_dimension_numbers<[1], [0], [0], [1], [0, 0, 1, 1], [], []>} : vector<256x64xbf16>, vector<64x128xbf16>, vector<256x128xf32> -> vector<256x128xf32>
    %76 = arith.addf %71, %75 : vector<256x128xf32>
    %c2_68 = arith.constant 2 : index
    %c1_69 = arith.constant 1 : index
    %c0_70 = arith.constant 0 : index
    %77 = vector.load %arg8[%c2_68, %c1_69, %c0_70] : memref<18x24x64xbf16, #tpu.memory_space<vmem>>, vector<16x16x64xbf16>
    %78 = vector.shape_cast %77 : vector<16x16x64xbf16> to vector<256x64xbf16>
    %c448 = arith.constant 448 : index
    %c0_71 = arith.constant 0 : index
    %79 = vector.load %arg5[%c448, %c0_71] : memref<576x128xbf16, #tpu.memory_space<vmem>>, vector<64x128xbf16>
    %cst_72 = arith.constant dense<0.000000e+00> : vector<256x128xf32>
    %80 = tpu.matmul %78, %79, %cst_72 {dimension_numbers = #tpu.dot_dimension_numbers<[1], [0], [0], [1], [0, 0, 1, 1], [], []>} : vector<256x64xbf16>, vector<64x128xbf16>, vector<256x128xf32> -> vector<256x128xf32>
    %81 = arith.addf %76, %80 : vector<256x128xf32>
    %c2_73 = arith.constant 2 : index
    %c2_74 = arith.constant 2 : index
    %c0_75 = arith.constant 0 : index
    %82 = vector.load %arg8[%c2_73, %c2_74, %c0_75] : memref<18x24x64xbf16, #tpu.memory_space<vmem>>, vector<16x16x64xbf16>
    %83 = vector.shape_cast %82 : vector<16x16x64xbf16> to vector<256x64xbf16>
    %c512 = arith.constant 512 : index
    %c0_76 = arith.constant 0 : index
    %84 = vector.load %arg5[%c512, %c0_76] : memref<576x128xbf16, #tpu.memory_space<vmem>>, vector<64x128xbf16>
    %cst_77 = arith.constant dense<0.000000e+00> : vector<256x128xf32>
    %85 = tpu.matmul %83, %84, %cst_77 {dimension_numbers = #tpu.dot_dimension_numbers<[1], [0], [0], [1], [0, 0, 1, 1], [], []>} : vector<256x64xbf16>, vector<64x128xbf16>, vector<256x128xf32> -> vector<256x128xf32>
    %86 = arith.addf %81, %85 : vector<256x128xf32>
    %c0_78 = arith.constant 0 : index
    %c0_79 = arith.constant 0 : index
    %87 = vector.load %arg6[%c0_78, %c0_79] : memref<1x128xf32, #tpu.memory_space<vmem>>, vector<1x128xf32>
    %88 = vector.broadcast %87 : vector<1x128xf32> to vector<256x128xf32>
    %89 = arith.addf %86, %88 : vector<256x128xf32>
    %90 = vector.shape_cast %89 : vector<256x128xf32> to vector<1x16x16x128xf32>
    %91 = arith.truncf %90 : vector<1x16x16x128xf32> to vector<1x16x16x128xbf16>
    %c0_80 = arith.constant 0 : index
    %c0_81 = arith.constant 0 : index
    %c0_82 = arith.constant 0 : index
    %c0_83 = arith.constant 0 : index
    %92 = vector.load %arg7[%c0_80, %c0_81, %c0_82, %c0_83] : memref<1x16x16x128xbf16, #tpu.memory_space<vmem>>, vector<1x16x16x128xbf16>
    tpu.vector_store %arg7[%c0_80, %c0_81, %c0_82, %c0_83], %91 {strides = array<i32>} : memref<1x16x16x128xbf16, #tpu.memory_space<vmem>>, vector<1x16x16x128xbf16>,
    return
  }
  func.func @transform_0(%arg0: i32) -> (i32, i32, i32, i32) {
    %c0_i32 = arith.constant 0 : i32
    %c0_i32_0 = arith.constant 0 : i32
    %c0_i32_1 = arith.constant 0 : i32
    %c0_i32_2 = arith.constant 0 : i32
    return %arg0, %c0_i32, %c0_i32_0, %c0_i32_1 : i32, i32, i32, i32
  }
  func.func @transform_1(%arg0: i32) -> (i32, i32) {
    %c0_i32 = arith.constant 0 : i32
    %c0_i32_0 = arith.constant 0 : i32
    %c0_i32_1 = arith.constant 0 : i32
    return %c0_i32, %c0_i32_0 : i32, i32
  }
  func.func @transform_2(%arg0: i32) -> (i32, i32) {
    %c0_i32 = arith.constant 0 : i32
    %c0_i32_0 = arith.constant 0 : i32
    %c0_i32_1 = arith.constant 0 : i32
    return %c0_i32, %c0_i32_0 : i32, i32
  }
  func.func @transform_3(%arg0: i32) -> (i32, i32) {
    %c0_i32 = arith.constant 0 : i32
    %c0_i32_0 = arith.constant 0 : i32
    %c0_i32_1 = arith.constant 0 : i32
    return %c0_i32, %c0_i32_0 : i32, i32
  }
  func.func @transform_4(%arg0: i32) -> (i32, i32) {
    %c0_i32 = arith.constant 0 : i32
    %c0_i32_0 = arith.constant 0 : i32
    %c0_i32_1 = arith.constant 0 : i32
    return %c0_i32, %c0_i32_0 : i32, i32
  }
  func.func @transform_5(%arg0: i32) -> (i32, i32) {
    %c0_i32 = arith.constant 0 : i32
    %c0_i32_0 = arith.constant 0 : i32
    %c0_i32_1 = arith.constant 0 : i32
    return %c0_i32, %c0_i32_0 : i32, i32
  }
  func.func @transform_6(%arg0: i32) -> (i32, i32, i32, i32) {
    %c0_i32 = arith.constant 0 : i32
    %c0_i32_0 = arith.constant 0 : i32
    %c0_i32_1 = arith.constant 0 : i32
    %c0_i32_2 = arith.constant 0 : i32
    return %arg0, %c0_i32, %c0_i32_0, %c0_i32_1 : i32, i32, i32, i32
  }
}

</mosaic_0001>

<bundles_post_ra>
// kernel: tpu_custom_call.1
= control target key start
LH: loop header
LB: loop body
LE: loop exit
PB: predicated region body
PF: predicated region fallthrough
CT: control target
= control target key end

     0   :  { %11 = vsyncpa [#allocation4], 0  ;;  %s11625_s0 = inlined_call_operand.hbm [shape: f32[2,16,16,64], index: 0, kind: input, shape index: {}]   ;;  %s11626_s1 = inlined_call_operand.hbm [shape: f32[64,64], index: 1, kind: input, shape index: {}]   ;;  %s11627_s2 = inlined_call_operand.vmem [shape: f32[1,64], index: 2, kind: input, shape index: {}]   ;;  %s11628_s3 = inlined_call_operand.vmem [shape: f32[1,64], index: 3, kind: input, shape index: {}]   ;;  %s11629_s4 = inlined_call_operand.hbm [shape: bf16[576,128], index: 4, kind: input, shape index: {}]   ;;  %s11630_s5 = inlined_call_operand.vmem [shape: f32[1,128], index: 5, kind: input, shape index: {}]   ;;  %s11631_s6 = inlined_call_operand.hbm [shape: bf16[2,16,16,128], index: 6, kind: output, shape index: {}]  }
   0x1   :  { %13 = vsyncpa [#allocation4 + $0x1], 0 }
   0x2   :  { %14 = vsyncpa [#allocation7], 0 }
   0x3   :  { %15 = vsyncpa [#allocation5], 0 }
   0x4   :  { %17 = vsyncpa [#allocation5 + $0x1], 0  ;;  %s8834_s21 = smov 0   ;;  %s8836_s22 = smov 0  }
   0x5   :  { %s8838_s23 = smov 0   ;;  %s8840_s24 = smov 0  }
   0x6 LB: > { %s8855_s25 = sadd.s32 4294967295, %s8783_s24   ;;  %s6746_s26 = sadd.s32 4294967294, %s8783_s24   ;;  %s8783_s24 = sphi %s8840_s24, %s11769_s24   ;;  %s8779_s23 = sphi %s8838_s23, %s11768_s23   ;;  %s8775_s22 = sphi %s8836_s22, %s11767_s22   ;;  %s8771_s21 = sphi %s8834_s21, %s11766_s21  }
   0x7   : > { %p43_p0 = scmp.ne.s32.totalorder %s8775_s22, %s8771_s21  ;;  %p11632_p1 = scmp.eq.s32.totalorder %s8855_s25, 0 }
   0x8   : > { %p178_p3 = scmp.eq.s32.totalorder %s6746_s26, 1  ;;  %p6747_p5 = scmp.ge.s32.totalorder %s8783_s24, 1 }
   0x9   : > { %p8864_p4 = por %p11632_p1, %p43_p0  ;;  %p185_p7 = scmp.lt.s32.totalorder %s8783_s24, 3 }
   0xa   : > { %p8869_p6 = por %p178_p3, %p43_p0  ;;  %s8785_s30 = smov [#allocation6]  }
   0xb   : > { %s11661_s27 = scalar_select %p8864_p4, 1, 0 }
   0xc   : > { %s11662_s28 = scalar_select %p8869_p6, 1, 0 }
   0xd   : > { %p8874_p8 = pnand %p6747_p5, %p185_p7  ;;  %s197_s7 = sshll.u32 %s8785_s30, 4  ;;  %s8878_s7 = int_to_ptr.vmem [resolvable:$true] %s197_s7 }
   0xe   : > { %s8786_s9 = smov [#allocation8]   ;;  %s8627_s13 = scalar_lea.hbm %s11626_s1, 1024 }
   0xf   : > { %p8293_p9 = pneg %p8874_p8  ;;  %s216_s10 = sshll.u32 %s8786_s9, 4  ;;  %s8889_s10 = int_to_ptr.vmem [resolvable:$true] %s216_s10 }
  0x10   : > { %p8628_p12 = scmp.ne.s32.totalorder %s11626_s1, %s8627_s13  ;;  %p8634_p5 = scmp.lt.u32.totalorder %s8627_s13, %s11626_s1 }
  0x11   : > { %p8885_p11 = pnand %p8293_p9, %p11632_p1 }
  0x13   : > { %p8629_p13 = pneg %p8885_p11 }
  0x15   : > { %p8630_p0 = pnand %p8629_p13, %p8628_p12 }
  0x17   : > { %p8631_p3 = pneg %p8630_p0 }
  0x19   : > { %p8636_p7 = pnand %p8634_p5, %p8631_p3 }
  0x1b   : > { %8639 = shalt.err (!%p8636_p7)
}
  0x1c   : > { %s8640_s18 = scalar_lea.vmem %s8878_s7, 1024  ;;  %p8648_p2 = scmp.lt.s32.totalorder %s8878_s7, %s8878_s7 }
  0x1d   : > { %p8641_p9 = scmp.ne.s32.totalorder %s8878_s7, %s8640_s18  ;;  %p8649_p12 = scmp.lt.s32.totalorder %s8640_s18, %s8640_s18 }
  0x1f   : > { %p8643_p10 = pnand %p8641_p9, %p8629_p13  ;;  %p8650_p0 = por %p8649_p12, %p8648_p2 }
  0x21   : > { %p8644_p1 = pneg %p8643_p10 }
  0x23   : > { %p8651_p6 = pnand %p8650_p0, %p8644_p1 }
  0x25   : > { %8654 = shalt.err (!%p8651_p6)
}
  0x26   : > { %s8787_s19 = smov 128   ;;  %s8788_s20 = smov 8  }
  0x27   : > { %8296 = dma.hbm_to_vmem [thread:$0]  (!%p8885_p11), %s11626_s1, 1024, %s8878_s7, [#allocation7], %s8787_s19, %s8787_s19, %s8788_s20  }
  0x28   : > { %s8655_s12 = scalar_lea.hbm %s11629_s4, 4608 }
  0x29   : > { %p8656_p1 = scmp.ne.s32.totalorder %s11629_s4, %s8655_s12  ;;  %p8662_p10 = scmp.lt.u32.totalorder %s8655_s12, %s11629_s4 }
  0x2b   : > { %p8658_p2 = pnand %p8656_p1, %p8629_p13 }
  0x2d   : > { %p8659_p6 = pneg %p8658_p2 }
  0x2f   : > { %p8664_p3 = pnand %p8662_p10, %p8659_p6 }
  0x31   : > { %8667 = shalt.err (!%p8664_p3)
}
  0x32   : > { %s8668_s7 = scalar_lea.vmem %s8889_s10, 4608  ;;  %p8676_p12 = scmp.lt.s32.totalorder %s8889_s10, %s8889_s10 }
  0x33   : > { %p8669_p5 = scmp.ne.s32.totalorder %s8889_s10, %s8668_s7  ;;  %p8677_p0 = scmp.lt.s32.totalorder %s8668_s7, %s8668_s7 }
  0x35   : > { %p8671_p7 = pnand %p8669_p5, %p8629_p13  ;;  %p8678_p1 = por %p8677_p0, %p8676_p12 }
  0x37   : > { %p8672_p9 = pneg %p8671_p7 }
  0x39   : > { %p8679_p2 = pnand %p8678_p1, %p8672_p9 }
  0x3b   : > { %8682 = shalt.err (!%p8679_p2)
}
  0x3c   : > { %s8789_s17 = smov 64   ;;  %s8790_s18 = smov 4  }
  0x3d   : > { %8299 = dma.hbm_to_vmem [thread:$0]  (!%p8885_p11), %s11629_s4, 4608, %s8889_s10, [#allocation7], %s8789_s17, %s8789_s17, %s8790_s18  }
  0x3e   : > { %s8947_s9 = sadd.s32 1, %s8783_s24   ;;  %s30_s12 = sadd.s32 1, %s8779_s23 }
  0x3f   : > { %s27_s11 = ssub.s32 %s8783_s24, %s8947_s9  ;;  %p37_p6 = scmp.ne.s32.totalorder %s8779_s23, %s8775_s22 }
  0x40   : > { %p28_p13 = scmp.eq.s32.totalorder %s27_s11, 0  ;;  %p38_p10 = scmp.eq.s32.totalorder %s8783_s24, 0 }
  0x41   : > { %p11665_p5 = scmp.eq.s32.totalorder %s8855_s25, 1  ;;  %p8310_p9 = scmp.lt.s32.totalorder %s8783_s24, 2 }
  0x42   : > { %s8956_s13 = scalar_select %p28_p13, %s8779_s23, %s30_s12  }
  0x43   : > { %p39_p3 = por %p38_p10, %p37_p6  ;;  %p8960_p7 = por %p11665_p5, %p37_p6 }
  0x44   : > { %s233_s8 = sand.u32 1, %s8779_s23   ;;  %s7236_s10 = sshll.u32 %s8783_s24, 12 }
  0x45   : > { %s11666_s14 = scalar_select %p8960_p7, 1, 0 }
  0x46   : > { %s6751_s15 = sshll.u32 %s233_s8, 8  ;;  %s8970_s17 = scalar_lea.hbm %s11625_s0, %s7236_s10 }
  0x47   : > { %s237_s18 = scalar_lea.vmem [#allocation3], %s6751_s15  ;;  %p8974_p11 = pnand %p8310_p9, %p39_p3 }
  0x48   : > { %s244_s26 = sshll.u32 %s237_s18, 4  ;;  %s8978_s11 = scalar_lea.sflag [#allocation4], %s233_s8  ;;  %s8972_s26 = int_to_ptr.vmem [resolvable:$true] %s244_s26 }
  0x49   : > { %s8683_s12 = scalar_lea.hbm %s8970_s17, 4096  ;;  %p8685_p0 = pneg %p8974_p11 }
  0x4a   : > { %p8684_p12 = scmp.ne.s32.totalorder %s8970_s17, %s8683_s12  ;;  %s8688_s16 = scalar_lea.hbm %s11625_s0, 8192 }
  0x4b   : > { %p8689_p13 = scmp.lt.u32.totalorder %s8970_s17, %s11625_s0  ;;  %p8690_p6 = scmp.lt.u32.totalorder %s8688_s16, %s8683_s12 }
  0x4c   : > { %p8686_p1 = pnand %p8685_p0, %p8684_p12  ;;  %p8692_p3 = scmp.lt.u32.totalorder %s8683_s12, %s8970_s17 }
  0x4d   : > { %p8691_p10 = por %p8690_p6, %p8689_p13 }
  0x4e   : > { %p8687_p2 = pneg %p8686_p1 }
  0x4f   : > { %p8693_p5 = por %p8692_p3, %p8691_p10 }
  0x51   : > { %p8694_p9 = pnand %p8693_p5, %p8687_p2 }
  0x53   : > { %8697 = shalt.err (!%p8694_p9)
}
  0x54   : > { %s8698_s8 = scalar_lea.vmem %s8972_s26, 4096  ;;  %s8791_s15 = smov [#allocation3]  }
  0x55   : > { %p8699_p12 = scmp.ne.s32.totalorder %s8972_s26, %s8698_s8  ;;  %s8703_s10 = sshll.u32 %s8791_s15, 4  ;;  %s8704_s10 = int_to_ptr.vmem [resolvable:$false] %s8703_s10 }
  0x56   : > { %s8705_s7 = scalar_lea.vmem %s8704_s10, 8192  ;;  %p8706_p4 = scmp.lt.s32.totalorder %s8972_s26, %s8704_s10 }
  0x57   : > { %p8701_p1 = pnand %p8699_p12, %p8685_p0  ;;  %p8707_p13 = scmp.lt.s32.totalorder %s8705_s7, %s8698_s8 }
  0x59   : > { %p8702_p7 = pneg %p8701_p1  ;;  %p8708_p6 = por %p8707_p13, %p8706_p4 }
  0x5b   : > { %p8709_p10 = pnand %p8708_p6, %p8702_p7 }
  0x5d   : > { %8712 = shalt.err (!%p8709_p10)
}
  0x5e   : > { %8303 = dma.hbm_to_vmem [thread:$0]  (!%p8974_p11), %s8970_s17, 4096, %s8972_s26, %s8978_s11, %s8787_s19, %s8787_s19, %s8788_s20  }
  0x5f   : > { %256 = sbr.rel (%p8874_p8) target bundleno = 1415 (0x587), region = 44 }
  0x66   : > { %s9012_s12 = sand.u32 1, %s8775_s22   ;;  %p11668_p4 = scmp.ne.s32.totalorder %s11661_s27, 0 }
  0x67   : > { %s6755_s16 = sshll.u32 %s9012_s12, 8  ;;  %s259_s18 = scalar_lea.sflag [#allocation4], %s9012_s12 }
  0x68   : > { %s9016_s8 = scalar_lea.vmem [#allocation3], %s6755_s16 }
  0x69   : > { %8758 = dma.done.wait (%p11668_p4), %s259_s18, 4096  }
  0x6a   : > { %8760 = vsyncadd (%p11668_p4), %s259_s18, 4294963200  ;;  %p11669_p7 = scmp.eq.s32.totalorder %s8855_s25, 0 }
  0x6c   : > { %8762 = dma.done.wait (%p11669_p7), [#allocation7], 5632   ;;  %p11670_p8 = pmov %p11669_p7 }
  0x6d   : > { %v8792_v0 = vmov 0.0|0.0   ;;  %vm8793_vm0 = vmmov 0   ;;  %v8794_v1 = vmov 0.0   ;;  %v332_v2 = vld [vmem:[#allocation6] sm:$0xff]  ;;  %v333_v3 = vld [vmem:[#allocation6 + $0x8] sm:$0xff]  ;;  %v334_v4 = vld [vmem:[#allocation6 + $0x10] sm:$0xff] }
  0x6e   : > { %8764 = vsyncadd (%p11670_p8), [#allocation7], 4294961664  ;;  %7993 = vmatprep.subr.bf16.mxu0 %v8792_v0  ;;  %7611 = vmatprep.mubr.msk.f32.mxu0 %vm8793_vm0, %v8794_v1  ;;  %vm342_vm1 = vcmask 523264   ;;  %v7994_v5 = vpack.c.bf16 %v333_v3, %v332_v2  ;;  %v335_v6 = vld [vmem:[#allocation6 + $0x18] sm:$0xff]  ;;  %v9027_v7 = vld [vmem:[%s9016_s8] sm:$0xff]  ;;  %vm1008_vm2 = vcmask 516096  }
  0x6f   : > { %8005 = vmatprep.subr.bf16.mxu1 %v8792_v0  ;;  %7630 = vmatprep.mubr.msk.f32.mxu1 %vm8793_vm0, %v8794_v1  ;;  %v7997_v8 = vpack.c.bf16 %v335_v6, %v334_v4  ;;  %v9030_v9 = vld [vmem:[%s9016_s8 + $0x8] sm:$0xff]  ;;  %v9033_v10 = vld [vmem:[%s9016_s8 + $0x10] sm:$0xff]  ;;  %v9036_v11 = vld [vmem:[%s9016_s8 + $0x18] sm:$0xff]  ;;  %v343_v12 = vsel %vm342_vm1, %v9027_v7, 0.0  ;;  %vm1009_vm3 = vsmask.f32 256 }
  0x70   : > { %7995 = vmatpush3.bf16.msra.mxu0 %v7994_v5  ;;  %8007 = vmatpush3.bf16.msra.mxu1 %v7994_v5  ;;  %v336_v13 = vld [vmem:[#allocation6 + $0x20] sm:$0xff]  ;;  %v337_v14 = vld [vmem:[#allocation6 + $0x28] sm:$0xff]  ;;  %v344_v15 = vsel %vm342_vm1, %v9030_v9, 0.0  ;;  %v346_v16 = vsel %vm342_vm1, %v9033_v10, 0.0  ;;  %v348_v19 = vsel %vm342_vm1, %v9036_v11, 0.0  ;;  %v338_v23 = vld [vmem:[#allocation6 + $0x30] sm:$0xff] }
  0x71   : > { %7996 = vmatprep.subr.bf16.mxu0 %v8792_v0  ;;  %8008 = vmatprep.subr.bf16.mxu1 %v8792_v0  ;;  %v9045_v17 = vld [vmem:[%s9016_s8 + $0x20] sm:$0xff]  ;;  %v345_v18 = vadd.f32 %v344_v15, %v343_v12  ;;  %v8000_v20 = vpack.c.bf16 %v337_v14, %v336_v13  ;;  %v9050_v21 = vld [vmem:[%s9016_s8 + $0x28] sm:$0xff]  ;;  %v339_v24 = vld [vmem:[#allocation6 + $0x38] sm:$0xff]  ;;  %vm1059_vm5 = vsmask.f32 7938  ;;  %v11673_v51 = vmov 0 }
  0x72   : > { %v350_v25 = vsel %vm342_vm1, %v9045_v17, 0.0  ;;  %v9055_v26 = vld [vmem:[%s9016_s8 + $0x30] sm:$0xff]  ;;  %v9058_v28 = vld [vmem:[%s9016_s8 + $0x38] sm:$0xff]  ;;  %v9061_v29 = vld [vmem:[%s9016_s8 + $0x40] sm:$0xff]  ;;  %v352_v31 = vsel %vm342_vm1, %v9050_v21, 0.0  ;;  %v8003_v32 = vpack.c.bf16 %v339_v24, %v338_v23  ;;  %vm999_vm7 = vcmask 519168  }
  0x73   : > { %v347_v22 = vadd.f32 %v346_v16, %v345_v18  ;;  %v9064_v30 = vld [vmem:[%s9016_s8 + $0x48] sm:$0xff]  ;;  %v9069_v33 = vld [vmem:[%s9016_s8 + $0x50] sm:$0xff]  ;;  %v9072_v34 = vld [vmem:[%s9016_s8 + $0x58] sm:$0xff]  ;;  %v354_v36 = vsel %vm342_vm1, %v9055_v26, 0.0  ;;  %v356_v39 = vsel %vm342_vm1, %v9058_v28, 0.0  ;;  %v358_v40 = vsel %vm342_vm1, %v9061_v29, 0.0 }
  0x74   : > { %7998 = vmatpush3.bf16.msra.mxu0 %v7997_v8  ;;  %8010 = vmatpush3.bf16.msra.mxu1 %v7997_v8  ;;  %vm9078_vm4 = vmand %vm1008_vm2, %vm1009_vm3  ;;  %v360_v41 = vsel %vm342_vm1, %v9064_v30, 0.0  ;;  %v362_v42 = vsel %vm342_vm1, %v9069_v33, 0.0  ;;  %v364_v43 = vsel %vm342_vm1, %v9072_v34, 0.0  ;;  %v1041_v44 = vld [vmem:[#allocation2 + $0x84] sm:$0x1]  ;;  %v9115_v1 = vld [vmem:[%s9016_s8 + $0x60] sm:$0xff] }
  0x75   : > { %7999 = vmatprep.subr.bf16.mxu0 %v8792_v0  ;;  %8011 = vmatprep.subr.bf16.mxu1 %v8792_v0  ;;  %v349_v27 = vadd.f32 %v348_v19, %v347_v22  ;;  %v1044_v45 = vld [vmem:[#allocation2 + $0x90] sm:$0x1]  ;;  %v1042_v47 = vsel %vm9078_vm4, 0, %v1041_v44  ;;  %v1047_v49 = vld [vmem:[#allocation2 + $0x9c] sm:$0x1]  ;;  %vm9098_vm6 = vmand %vm1008_vm2, %vm1059_vm5  ;;  %vm2734_vm14 = vcmask 1042432  }
  0x76   : > { %v1045_v48 = vsel %vm9078_vm4, 0, %v1044_v45  ;;  %v1050_v50 = vld [vmem:[#allocation2 + $0xa8] sm:$0x1]  ;;  %v11674_v51 = vsel %vm9098_vm6, 4294967295, %v11673_v51  ;;  %1043 = vst [vmem:[#allocation2 + $0x84] sm:$0x1] %v1042_v47  ;;  %vm9836_vm13 = vmand %vm999_vm7, %vm1059_vm5 }
  0x77   : > { %v351_v35 = vadd.f32 %v350_v25, %v349_v27  ;;  %11675 = vst [vmem:[#allocation13_spill] sm:$0xff] %v11674_v51  ;;  %1046 = vst [vmem:[#allocation2 + $0x90] sm:$0x1] %v1045_v48  ;;  %v1048_v52 = vsel %vm9078_vm4, 0, %v1047_v49  ;;  %v1051_v53 = vsel %vm9078_vm4, 0, %v1050_v50  ;;  %v9126_v13 = vld [vmem:[%s9016_s8 + $0x68] sm:$0xff] }
  0x78   : > { %8001 = vmatpush3.bf16.msra.mxu0 %v8000_v20  ;;  %8013 = vmatpush3.bf16.msra.mxu1 %v8000_v20  ;;  %v1053_v54 = vld [vmem:[#allocation2 + $0xb4] sm:$0x1]  ;;  %v1056_v55 = vld [vmem:[#allocation2 + $0xc0] sm:$0x1]  ;;  %1049 = vst [vmem:[#allocation2 + $0x9c] sm:$0x1] %v1048_v52 }
  0x79   : > { %8002 = vmatprep.subr.bf16.mxu0 %v8792_v0  ;;  %8014 = vmatprep.subr.bf16.mxu1 %v8792_v0  ;;  %v353_v38 = vadd.f32 %v352_v31, %v351_v35  ;;  %1052 = vst [vmem:[#allocation2 + $0xa8] sm:$0x1] %v1051_v53  ;;  %v1054_v57 = vsel %vm9078_vm4, 0, %v1053_v54  ;;  %v1057_v58 = vsel %vm9078_vm4, 0, %v1056_v55  ;;  %v1091_v59 = vld [vmem:[#allocation2 + $0x8c] sm:$0x1] }
  0x7a   : > { %v1094_v60 = vld [vmem:[#allocation2 + $0x98] sm:$0x1]  ;;  %1055 = vst [vmem:[#allocation2 + $0xb4] sm:$0x1] %v1054_v57  ;;  %1058 = vst [vmem:[#allocation2 + $0xc0] sm:$0x1] %v1057_v58 }
  0x7b   : > { %v355_v46 = vadd.f32 %v354_v36, %v353_v38  ;;  %v1092_v61 = vsel %vm9098_vm6, 0, %v1091_v59  ;;  %v1095_v62 = vsel %vm9098_vm6, 0, %v1094_v60  ;;  %v1097_v63 = vld [vmem:[#allocation2 + $0xa4] sm:$0x1]  ;;  %v1100_v0 = vld [vmem:[#allocation2 + $0xb0] sm:$0x1] }
  0x7c   : > { %8004 = vmatpush3.bf16.msra.mxu0 %v8003_v32  ;;  %8016 = vmatpush3.bf16.msra.mxu1 %v8003_v32  ;;  %1093 = vst [vmem:[#allocation2 + $0x8c] sm:$0x1] %v1092_v61  ;;  %1096 = vst [vmem:[#allocation2 + $0x98] sm:$0x1] %v1095_v62  ;;  %v1098_v3 = vsel %vm9098_vm6, 0, %v1097_v63  ;;  %v1101_v4 = vsel %vm9098_vm6, 0, %v1100_v0 }
  0x7d   : > { %v357_v56 = vadd.f32 %v356_v39, %v355_v46  ;;  %v1103_v5 = vld [vmem:[#allocation2 + $0xbc] sm:$0x1]  ;;  %v1106_v6 = vld [vmem:[#allocation2 + $0xc8] sm:$0x1]  ;;  %1099 = vst [vmem:[#allocation2 + $0xa4] sm:$0x1] %v1098_v3 }
  0x7e   : > { %1102 = vst [vmem:[#allocation2 + $0xb0] sm:$0x1] %v1101_v4  ;;  %v1104_v8 = vsel %vm9098_vm6, 0, %v1103_v5  ;;  %v1107_v12 = vsel %vm9098_vm6, 0, %v1106_v6  ;;  %v9129_v14 = vld [vmem:[%s9016_s8 + $0x70] sm:$0xff]  ;;  %v9132_v15 = vld [vmem:[%s9016_s8 + $0x78] sm:$0xff] }
  0x7f   : > { %v359_v2 = vadd.f32 %v358_v40, %v357_v56  ;;  %v9135_v16 = vld [vmem:[%s9016_s8 + $0x80] sm:$0xff]  ;;  %1105 = vst [vmem:[#allocation2 + $0xbc] sm:$0x1] %v1104_v8  ;;  %1108 = vst [vmem:[#allocation2 + $0xc8] sm:$0x1] %v1107_v12  ;;  %v9138_v19 = vld [vmem:[%s9016_s8 + $0x88] sm:$0xff] }
  0x80   : > { %v9141_v20 = vld [vmem:[%s9016_s8 + $0x90] sm:$0xff]  ;;  %v9144_v22 = vld [vmem:[%s9016_s8 + $0x98] sm:$0xff]  ;;  %v9147_v24 = vld [vmem:[%s9016_s8 + $0xa0] sm:$0xff]  ;;  %v366_v27 = vsel %vm342_vm1, %v9115_v1, 0.0  ;;  %v368_v36 = vsel %vm342_vm1, %v9126_v13, 0.0  ;;  %v370_v38 = vsel %vm342_vm1, %v9129_v14, 0.0 }
  0x81   : > { %v361_v18 = vadd.f32 %v360_v41, %v359_v2  ;;  %v9150_v25 = vld [vmem:[%s9016_s8 + $0xa8] sm:$0xff]  ;;  %v9155_v31 = vld [vmem:[%s9016_s8 + $0xb0] sm:$0xff]  ;;  %v9158_v32 = vld [vmem:[%s9016_s8 + $0xb8] sm:$0xff]  ;;  %v372_v39 = vsel %vm342_vm1, %v9132_v15, 0.0  ;;  %v374_v40 = vsel %vm342_vm1, %v9135_v16, 0.0  ;;  %v380_v44 = vsel %vm342_vm1, %v9144_v22, 0.0 }
  0x82   : > { %v382_v45 = vsel %vm342_vm1, %v9147_v24, 0.0  ;;  %v384_v46 = vsel %vm342_vm1, %v9150_v25, 0.0  ;;  %v386_v47 = vsel %vm342_vm1, %v9155_v31, 0.0  ;;  %v388_v48 = vsel %vm342_vm1, %v9158_v32, 0.0  ;;  %v9183_v57 = vld [vmem:[%s9016_s8 + $0xc0] sm:$0xff]  ;;  %v9186_v59 = vld [vmem:[%s9016_s8 + $0xc8] sm:$0xff] }
  0x83   : > { %v363_v23 = vadd.f32 %v362_v42, %v361_v18  ;;  %v376_v42 = vsel %vm342_vm1, %v9138_v19, 0.0  ;;  %v390_v62 = vsel %vm342_vm1, %v9183_v57, 0.0  ;;  %v9191_v63 = vld [vmem:[%s9016_s8 + $0xd0] sm:$0xff]  ;;  %v392_v2 = vsel %vm342_vm1, %v9186_v59, 0.0  ;;  %v9196_v3 = vld [vmem:[%s9016_s8 + $0xd8] sm:$0xff]  ;;  %v9201_v6 = vld [vmem:[%s9016_s8 + $0xe0] sm:$0xff] }
  0x84   : > { %v394_v5 = vsel %vm342_vm1, %v9191_v63, 0.0  ;;  %v396_v12 = vsel %vm342_vm1, %v9196_v3, 0.0  ;;  %v9206_v18 = vld [vmem:[%s9016_s8 + $0xe8] sm:$0xff]  ;;  %vm1697_vm8 = vsmask.f32 3328  ;;  %vm2735_vm15 = vcmask 1046532  }
  0x85   : > { %v365_v35 = vadd.f32 %v364_v43, %v363_v23  ;;  %v378_v43 = vsel %vm342_vm1, %v9141_v20, 0.0  ;;  %vm1698_vm9 = vsmask.f32 7440  ;;  %vm1205_vm11 = vsmask.f32 4368  ;;  %vm10302_vm0 = vmor %vm2734_vm14, %vm2735_vm15  ;;  %s6758_s30 = sshll.u32 %s9012_s12, 7 }
  0x86   : > { %vm9463_vm10 = vmor %vm1697_vm8, %vm1698_vm9  ;;  %s11528_s11 = scalar_lea.vmem [#allocation9], %s6758_s30  ;;  %s7301_s15 = sshll.u32 %s8855_s25, 11 }
  0x87   : > { %v367_v41 = vadd.f32 %v366_v27, %v365_v35  ;;  %v398_v27 = vsel %vm342_vm1, %v9201_v6, 0.0  ;;  %v9211_v35 = vld [vmem:[%s9016_s8 + $0xf0] sm:$0xff]  ;;  %vm9813_vm12 = vmor %vm1009_vm3, %vm1205_vm11  ;;  %s6654_s10 = sshll.u32 %s11528_s11, 4  ;;  %s11577_s18 = scalar_lea.hbm %s11631_s6, %s7301_s15  ;;  %s11579_s10 = int_to_ptr.vmem [resolvable:$true] %s6654_s10 }
  0x88   : > { %s6641_s25 = scalar_lea.sflag [#allocation5], %s9012_s12  ;;  %p11763_p0 = scmp.ne.s32.totalorder %s11666_s14, 0 }
  0x89   : > { %v369_v49 = vadd.f32 %v368_v36, %v367_v41  ;;  %v402_v41 = vsel %vm342_vm1, %v9211_v35, 0.0  ;;  %s8796_s27 = smov [#allocation9]  }
  0x8a   : > { %s8717_s29 = sshll.u32 %s8796_s27, 4  ;;  %s8718_s29 = int_to_ptr.vmem [resolvable:$false] %s8717_s29 }
  0x8b   : > { %v371_v50 = vadd.f32 %v370_v38, %v369_v49  ;;  %v400_v38 = vsel %vm342_vm1, %v9206_v18, 0.0  ;;  %s8719_s19 = scalar_lea.vmem %s8718_s29, 4096  ;;  %p8720_p5 = scmp.lt.s32.totalorder %s11579_s10, %s8718_s29 }
  0x8d   : > { %v373_v52 = vadd.f32 %v372_v39, %v371_v50  ;;  %v9216_v39 = vld [vmem:[%s9016_s8 + $0xf8] sm:$0xff]  ;;  %s8713_s8 = scalar_lea.vmem %s11579_s10, 2048 }
  0x8e   : > { %p8714_p11 = scmp.ne.s32.totalorder %s11579_s10, %s8713_s8  ;;  %p8721_p9 = scmp.lt.s32.totalorder %s8719_s19, %s8713_s8 }
  0x8f   : > { %v375_v53 = vadd.f32 %v374_v40, %v373_v52 }
  0x90   : > { %p8715_p2 = pnand %p8714_p11, %p11763_p0  ;;  %p8722_p12 = por %p8721_p9, %p8720_p5 }
  0x91   : > { %v377_v54 = vadd.f32 %v376_v42, %v375_v53  ;;  %v487_v53 = vlaneseq }
  0x92   : > { %p8716_p3 = pneg %p8715_p2 }
  0x93   : > { %v379_v55 = vadd.f32 %v378_v43, %v377_v54  ;;  %v404_v43 = vsel %vm342_vm1, %v9216_v39, 0.0 }
  0x94   : > { %p8723_p1 = pnand %p8722_p12, %p8716_p3 }
  0x95   : > { %v381_v56 = vadd.f32 %v380_v44, %v379_v55  ;;  %v9223_v55 = vshrl.u32 %v487_v53, 7 }
  0x97   : > { %v383_v58 = vadd.f32 %v382_v45, %v381_v56 }
  0x99   : > { %v385_v60 = vadd.f32 %v384_v46, %v383_v58 }
  0x9b   : > { %v387_v61 = vadd.f32 %v386_v47, %v385_v60  ;;  %v489_v60 = vsub.s32 0, %v9223_v55  ;;  %v9500_v55 = vld [vmem:[%s11628_s3] ss:$0 sm:$0xff] }
  0x9d   : > { %v389_v0 = vadd.f32 %v388_v48, %v387_v61 }
  0x9f   : > { %v391_v4 = vadd.f32 %v390_v62, %v389_v0 }
  0xa1   : > { %v393_v8 = vadd.f32 %v392_v2, %v391_v4 }
  0xa3   : > { %v395_v23 = vadd.f32 %v394_v5, %v393_v8 }
  0xa5   : > { %v397_v36 = vadd.f32 %v396_v12, %v395_v23 }
  0xa7   : > { %v399_v40 = vadd.f32 %v398_v27, %v397_v36 }
  0xa9   : > { %v401_v42 = vadd.f32 %v400_v38, %v399_v40 }
  0xab   : > { %v403_v44 = vadd.f32 %v402_v41, %v401_v42 }
  0xad   : > { %v405_v45 = vadd.f32 %v404_v43, %v403_v44 }
  0xaf   : > { %v406_v46 = vrot.slane %v405_v45, 4 }
  0xb1   : > { %v407_v47 = vadd.f32 %v406_v46, %v405_v45 }
  0xb3   : > { %v408_v48 = vrot.slane %v407_v47, 2 }
  0xb5   : > { %v409_v49 = vadd.f32 %v408_v48, %v407_v47 }
  0xb7   : > { %v410_v50 = vrot.slane %v409_v49, 1 }
  0xb9   : > { %v411_v52 = vadd.f32 %v410_v50, %v409_v49 }
  0xbb   : > { %7612 = vmatmul.mubr.msk.f32.vlgmr.msra.gmra.mrb[0].mxu0 %vm342_vm1, %v411_v52 }
 0x18e   : > { %v481_v54 = vpop.f32.mrb[0].mxu0 }
 0x18f   : > { %v7613_v56 = vpop.f32.mrb[1].mxu0  ;;  %v486_v58 = vmul.f32 0.001953125, %v481_v54 }
 0x191   : > { %v9228_v61 = vrot.slane %v486_v58, %v489_v60 }
 0x193   : > { %v9232_v62 = vsub.f32 %v9027_v7, %v9228_v61  ;;  %v9236_v0 = vsub.f32 %v9030_v9, %v9228_v61  ;;  %v9240_v2 = vsub.f32 %v9033_v10, %v9228_v61  ;;  %v9244_v4 = vsub.f32 %v9036_v11, %v9228_v61 }
 0x194   : > { %v9252_v7 = vsub.f32 %v9045_v17, %v9228_v61  ;;  %v9258_v10 = vsub.f32 %v9050_v21, %v9228_v61  ;;  %v9266_v36 = vsub.f32 %v9055_v26, %v9228_v61  ;;  %v9273_v21 = vsub.f32 %v9058_v28, %v9228_v61 }
 0x195   : > { %v523_v5 = vmul.f32 %v9232_v62, %v9232_v62  ;;  %v524_v8 = vmul.f32 %v9236_v0, %v9236_v0  ;;  %v525_v9 = vmul.f32 %v9240_v2, %v9240_v2  ;;  %v526_v11 = vmul.f32 %v9244_v4, %v9244_v4 }
 0x196   : > { %v527_v17 = vmul.f32 %v9252_v7, %v9252_v7  ;;  %v528_v41 = vmul.f32 %v9258_v10, %v9258_v10  ;;  %v9280_v26 = vsub.f32 %v9061_v29, %v9228_v61  ;;  %v529_v44 = vmul.f32 %v9266_v36, %v9266_v36 }
 0x197   : > { %v555_v12 = vsel %vm342_vm1, %v523_v5, 0.0  ;;  %v556_v23 = vsel %vm342_vm1, %v524_v8, 0.0  ;;  %v558_v38 = vsel %vm342_vm1, %v525_v9, 0.0  ;;  %v560_v42 = vsel %vm342_vm1, %v526_v11, 0.0 }
 0x198   : > { %v557_v27 = vadd.f32 %v556_v23, %v555_v12  ;;  %v562_v45 = vsel %vm342_vm1, %v527_v17, 0.0  ;;  %v9287_v28 = vsub.f32 %v9064_v30, %v9228_v61  ;;  %v530_v47 = vmul.f32 %v9273_v21, %v9273_v21 }
 0x199   : > { %v564_v48 = vsel %vm342_vm1, %v528_v41, 0.0  ;;  %v9294_v29 = vsub.f32 %v9069_v33, %v9228_v61  ;;  %v531_v50 = vmul.f32 %v9280_v26, %v9280_v26  ;;  %v566_v52 = vsel %vm342_vm1, %v529_v44, 0.0 }
 0x19a   : > { %v559_v40 = vadd.f32 %v558_v38, %v557_v27  ;;  %v9301_v30 = vsub.f32 %v9072_v34, %v9228_v61  ;;  %v532_v54 = vmul.f32 %v9287_v28, %v9287_v28  ;;  %v568_v56 = vsel %vm342_vm1, %v530_v47, 0.0 }
 0x19b   : > { %v9308_v33 = vsub.f32 %v9115_v1, %v9228_v61  ;;  %v533_v5 = vmul.f32 %v9294_v29, %v9294_v29  ;;  %v570_v8 = vsel %vm342_vm1, %v531_v50, 0.0  ;;  %v9315_v34 = vsub.f32 %v9126_v13, %v9228_v61 }
 0x19c   : > { %v561_v43 = vadd.f32 %v560_v42, %v559_v40  ;;  %v534_v11 = vmul.f32 %v9301_v30, %v9301_v30  ;;  %v572_v12 = vsel %vm342_vm1, %v532_v54, 0.0  ;;  %v9322_v1 = vsub.f32 %v9129_v14, %v9228_v61 }
 0x19d   : > { %v535_v27 = vmul.f32 %v9308_v33, %v9308_v33  ;;  %v574_v17 = vsel %vm342_vm1, %v533_v5, 0.0  ;;  %v9329_v13 = vsub.f32 %v9132_v15, %v9228_v61  ;;  %v536_v40 = vmul.f32 %v9315_v34, %v9315_v34 }
 0x19e   : > { %v563_v46 = vadd.f32 %v562_v45, %v561_v43  ;;  %v576_v41 = vsel %vm342_vm1, %v534_v11, 0.0  ;;  %v9336_v14 = vsub.f32 %v9135_v16, %v9228_v61  ;;  %v537_v43 = vmul.f32 %v9322_v1, %v9322_v1 }
 0x19f   : > { %v578_v44 = vsel %vm342_vm1, %v535_v27, 0.0  ;;  %v9343_v15 = vsub.f32 %v9138_v19, %v9228_v61  ;;  %v580_v47 = vsel %vm342_vm1, %v536_v40, 0.0  ;;  %v9350_v16 = vsub.f32 %v9141_v20, %v9228_v61 }
 0x1a0   : > { %v565_v49 = vadd.f32 %v564_v48, %v563_v46  ;;  %v538_v46 = vmul.f32 %v9329_v13, %v9329_v13  ;;  %v582_v50 = vsel %vm342_vm1, %v537_v43, 0.0  ;;  %v9357_v19 = vsub.f32 %v9144_v22, %v9228_v61 }
 0x1a1   : > { %v9364_v20 = vsub.f32 %v9147_v24, %v9228_v61  ;;  %v9371_v22 = vsub.f32 %v9150_v25, %v9228_v61  ;;  %v9378_v24 = vsub.f32 %v9155_v31, %v9228_v61  ;;  %v9385_v25 = vsub.f32 %v9158_v32, %v9228_v61 }
 0x1a2   : > { %v567_v53 = vadd.f32 %v566_v52, %v565_v49  ;;  %v539_v49 = vmul.f32 %v9336_v14, %v9336_v14  ;;  %v584_v54 = vsel %vm342_vm1, %v538_v46, 0.0  ;;  %v9392_v31 = vsub.f32 %v9183_v57, %v9228_v61 }
 0x1a3   : > { %v9399_v32 = vsub.f32 %v9186_v59, %v9228_v61  ;;  %v9406_v57 = vsub.f32 %v9191_v63, %v9228_v61  ;;  %v9413_v59 = vsub.f32 %v9196_v3, %v9228_v61  ;;  %v9420_v63 = vsub.f32 %v9201_v6, %v9228_v61 }
 0x1a4   : > { %v569_v58 = vadd.f32 %v568_v56, %v567_v53  ;;  %v540_v53 = vmul.f32 %v9343_v15, %v9343_v15  ;;  %v586_v5 = vsel %vm342_vm1, %v539_v49, 0.0  ;;  %v9427_v3 = vsub.f32 %v9206_v18, %v9228_v61 }
 0x1a5   : > { %v9434_v6 = vsub.f32 %v9211_v35, %v9228_v61  ;;  %v9441_v18 = vsub.f32 %v9216_v39, %v9228_v61 }
 0x1a6   : > { %v571_v9 = vadd.f32 %v570_v8, %v569_v58  ;;  %v541_v58 = vmul.f32 %v9350_v16, %v9350_v16  ;;  %v588_v11 = vsel %vm342_vm1, %v540_v53, 0.0 }
 0x1a7   : > { %v553_v35 = vmul.f32 %v9434_v6, %v9434_v6 }
 0x1a8   : > { %v573_v23 = vadd.f32 %v572_v12, %v571_v9  ;;  %v542_v9 = vmul.f32 %v9357_v19, %v9357_v19  ;;  %v590_v27 = vsel %vm342_vm1, %v541_v58, 0.0 }
 0x1a9   : > { %v614_v39 = vsel %vm342_vm1, %v553_v35, 0.0 }
 0x1aa   : > { %v575_v38 = vadd.f32 %v574_v17, %v573_v23  ;;  %v543_v23 = vmul.f32 %v9364_v20, %v9364_v20  ;;  %v592_v40 = vsel %vm342_vm1, %v542_v9, 0.0 }
 0x1ac   : > { %v577_v42 = vadd.f32 %v576_v41, %v575_v38  ;;  %v544_v38 = vmul.f32 %v9371_v22, %v9371_v22  ;;  %v594_v43 = vsel %vm342_vm1, %v543_v23, 0.0 }
 0x1ae   : > { %v579_v45 = vadd.f32 %v578_v44, %v577_v42  ;;  %v545_v42 = vmul.f32 %v9378_v24, %v9378_v24  ;;  %v596_v46 = vsel %vm342_vm1, %v544_v38, 0.0 }
 0x1b0   : > { %v581_v48 = vadd.f32 %v580_v47, %v579_v45  ;;  %v546_v45 = vmul.f32 %v9385_v25, %v9385_v25  ;;  %v598_v49 = vsel %vm342_vm1, %v545_v42, 0.0 }
 0x1b2   : > { %v583_v52 = vadd.f32 %v582_v50, %v581_v48  ;;  %v547_v48 = vmul.f32 %v9392_v31, %v9392_v31  ;;  %v600_v53 = vsel %vm342_vm1, %v546_v45, 0.0 }
 0x1b4   : > { %v585_v56 = vadd.f32 %v584_v54, %v583_v52  ;;  %v548_v52 = vmul.f32 %v9399_v32, %v9399_v32  ;;  %v602_v58 = vsel %vm342_vm1, %v547_v48, 0.0 }
 0x1b6   : > { %v587_v8 = vadd.f32 %v586_v5, %v585_v56  ;;  %v549_v56 = vmul.f32 %v9406_v57, %v9406_v57  ;;  %v604_v9 = vsel %vm342_vm1, %v548_v52, 0.0 }
 0x1b8   : > { %v589_v12 = vadd.f32 %v588_v11, %v587_v8  ;;  %v550_v8 = vmul.f32 %v9413_v59, %v9413_v59  ;;  %v606_v23 = vsel %vm342_vm1, %v549_v56, 0.0  ;;  %v8795_v56 = vmov 0  }
 0x1b9   : > { %1000 = vst.msk [vmem:[#allocation2] sm:$0xf] %vm999_vm7, %v8795_v56  ;;  %1001 = vst.msk [vmem:[#allocation2 + $0x4] sm:$0xf] %vm999_vm7, %v8795_v56 }
 0x1ba   : > { %v591_v17 = vadd.f32 %v590_v27, %v589_v12  ;;  %v551_v12 = vmul.f32 %v9420_v63, %v9420_v63  ;;  %v608_v38 = vsel %vm342_vm1, %v550_v8, 0.0  ;;  %1002 = vst.msk [vmem:[#allocation2 + $0x8] sm:$0xf] %vm999_vm7, %v8795_v56  ;;  %1004 = vst.msk [vmem:[#allocation2 + $0xcc] sm:$0xf] %vm999_vm7, %v8795_v56  ;;  %v8360_v8 = vld [vmem:[#allocation8 + $0x28] sm:$0xff]  }
 0x1bb   : > { %1005 = vst.msk [vmem:[#allocation2 + $0xd0] sm:$0xf] %vm999_vm7, %v8795_v56  ;;  %1006 = vst.msk [vmem:[#allocation2 + $0xd4] sm:$0xf] %vm999_vm7, %v8795_v56 }
 0x1bc   : > { %v593_v41 = vadd.f32 %v592_v40, %v591_v17  ;;  %v552_v17 = vmul.f32 %v9427_v3, %v9427_v3 }
 0x1be   : > { %v595_v44 = vadd.f32 %v594_v43, %v593_v41  ;;  %v610_v41 = vsel %vm342_vm1, %v551_v12, 0.0  ;;  %v554_v43 = vmul.f32 %v9441_v18, %v9441_v18  ;;  %v8363_v12 = vld [vmem:[#allocation8 + $0x90] sm:$0xff]  }
 0x1c0   : > { %v597_v47 = vadd.f32 %v596_v46, %v595_v44  ;;  %v612_v44 = vsel %vm342_vm1, %v552_v17, 0.0  ;;  %v616_v46 = vsel %vm342_vm1, %v554_v43, 0.0  ;;  %v8365_v43 = vld [vmem:[#allocation8 + $0x98] sm:$0xff]  }
 0x1c1   : > { %v1681_v17 = vld [vmem:[#allocation2 + $0x8] sm:$0x1] }
 0x1c2   : > { %v599_v50 = vadd.f32 %v598_v49, %v597_v47 }
 0x1c4   : > { %v601_v54 = vadd.f32 %v600_v53, %v599_v50 }
 0x1c6   : > { %v603_v5 = vadd.f32 %v602_v58, %v601_v54  ;;  %v8358_v58 = vld [vmem:[#allocation8 + $0x20] sm:$0xff]  }
 0x1c7   : > { %7633 = vmatprep.subr.bf16.mxu1 %v8358_v58 }
 0x1c8   : > { %v605_v11 = vadd.f32 %v604_v9, %v603_v5  ;;  %v8359_v5 = vld [vmem:[#allocation8 + $0x80] sm:$0xff]   ;;  %v8361_v9 = vld [vmem:[#allocation8 + $0x88] sm:$0xff]  }
 0x1c9   : > { %7793 = vmatprep.subr.bf16.mxu0 %v8359_v5 }
 0x1ca   : > { %v607_v27 = vadd.f32 %v606_v23, %v605_v11  ;;  %7794 = vmatpush3.bf16.msra.mxu0 %v8359_v5  ;;  %v8362_v11 = vld [vmem:[#allocation8 + $0x30] sm:$0xff]   ;;  %v1641_v23 = vld [vmem:[#allocation2] sm:$0xf] }
 0x1cb   : > { %7795 = vmatprep.subr.bf16.mxu0 %v8361_v9 }
 0x1cc   : > { %v609_v40 = vadd.f32 %v608_v38, %v607_v27  ;;  %v1642_v27 = vld [vmem:[#allocation2 + $0x4] sm:$0xf]  ;;  %v1701_v38 = vshrl.u32 %v1641_v23, 16 }
 0x1cd   : > { %v1710_v35 = vshll.u32 %v1642_v27, 16 }
 0x1ce   : > { %v611_v42 = vadd.f32 %v610_v41, %v609_v40  ;;  %7796 = vmatpush3.bf16.msra.mxu0 %v8361_v9  ;;  %v1704_v40 = vshll.u32 %v1641_v23, 16  ;;  %v1714_v41 = vshrl.u32 %v1642_v27, 16  ;;  %v1061_v23 = vld [vmem:[#allocation2 + $0x14] sm:$0x1] }
 0x1cf   : > { %7797 = vmatprep.subr.bf16.mxu0 %v8363_v12 }
 0x1d0   : > { %v613_v45 = vadd.f32 %v612_v44, %v611_v42  ;;  %v8364_v42 = vld [vmem:[#allocation8 + $0x38] sm:$0xff]   ;;  %v1720_v44 = vshll.u32 %v1681_v17, 16  ;;  %v1062_v17 = vsel %vm9098_vm6, 0, %v1061_v23 }
 0x1d1   : > { %1063 = vst [vmem:[#allocation2 + $0x14] sm:$0x1] %v1062_v17 }
 0x1d2   : > { %v615_v61 = vadd.f32 %v614_v39, %v613_v45  ;;  %v1703_v45 = vrot.slane %v1701_v38, 4  ;;  %v1706_v39 = vrot.slane %v1704_v40, 5  ;;  %7798 = vmatpush3.bf16.msra.mxu0 %v8363_v12  ;;  %v1011_v12 = vld [vmem:[#allocation2 + $0xc] sm:$0x1]  ;;  %v1014_v38 = vld [vmem:[#allocation2 + $0x18] sm:$0x1] }
 0x1d3   : > { %7799 = vmatprep.subr.bf16.mxu0 %v8365_v43  ;;  %v1012_v27 = vsel %vm9078_vm4, 0, %v1011_v12  ;;  %v1064_v40 = vld [vmem:[#allocation2 + $0x20] sm:$0x1] }
 0x1d4   : > { %v617_v47 = vadd.f32 %v616_v46, %v615_v61  ;;  %v1712_v61 = vrot.slane %v1710_v35, 5  ;;  %v1716_v46 = vrot.slane %v1714_v41, 4  ;;  %1013 = vst [vmem:[#allocation2 + $0xc] sm:$0x1] %v1012_v27  ;;  %v1015_v35 = vsel %vm9078_vm4, 0, %v1014_v38 }
 0x1d5   : > { %v1065_v41 = vsel %vm9098_vm6, 0, %v1064_v40  ;;  %1016 = vst [vmem:[#allocation2 + $0x18] sm:$0x1] %v1015_v35 }
 0x1d6   : > { %v618_v48 = vrot.slane %v617_v47, 4  ;;  %7800 = vmatpush3.bf16.msra.mxu0 %v8365_v43  ;;  %1066 = vst [vmem:[#allocation2 + $0x20] sm:$0x1] %v1065_v41 }
 0x1d8   : > { %v619_v49 = vadd.f32 %v618_v48, %v617_v47  ;;  %v1707_v47 = vor.u32 %v1706_v39, %v1703_v45  ;;  %v1717_v48 = vor.u32 %v1716_v46, %v1712_v61  ;;  %v1017_v45 = vld [vmem:[#allocation2 + $0x24] sm:$0x1]  ;;  %v1067_v39 = vld [vmem:[#allocation2 + $0x2c] sm:$0x1] }
 0x1d9   : > { %v1018_v46 = vsel %vm9078_vm4, 0, %v1017_v45 }
 0x1da   : > { %v620_v50 = vrot.slane %v619_v49, 2  ;;  %1019 = vst [vmem:[#allocation2 + $0x24] sm:$0x1] %v1018_v46 }
 0x1dc   : > { %v621_v52 = vadd.f32 %v620_v50, %v619_v49  ;;  %v1722_v49 = vrot.slane %v1720_v44, 5  ;;  %v11676_v50 = vmov 0 }
 0x1dd   : > { %v11677_v50 = vsel %vm9463_vm10, 4294967295, %v11676_v50 }
 0x1de   : > { %v622_v53 = vrot.slane %v621_v52, 1  ;;  %11678 = vst [vmem:[#allocation14_spill] sm:$0xff] %v11677_v50 }
 0x1e0   : > { %v623_v54 = vadd.f32 %v622_v53, %v621_v52  ;;  %v1708_v52 = vrot.slane %v1707_v47, 4  ;;  %v1718_v53 = vrot.slane %v1717_v48, 4  ;;  %v1068_v47 = vsel %vm9098_vm6, 0, %v1067_v39 }
 0x1e1   : > { %1069 = vst [vmem:[#allocation2 + $0x2c] sm:$0x1] %v1068_v47  ;;  %v8366_v47 = vld [vmem:[#allocation8] sm:$0xff]  }
 0x1e2   : > { %7631 = vmatmul.mubr.msk.f32.vlgmr.msra.gmra.mrb[0].mxu1 %vm342_vm1, %v623_v54  ;;  %v1713_v54 = vsel %vm9463_vm10, %v1708_v52, %v1712_v61  ;;  %v1723_v56 = vsel %vm9463_vm10, %v1718_v53, %v1722_v49 }
 0x1e3   : > { %7634 = vmatpush3.bf16.msra.mxu1 %v8358_v58  ;;  %v6826_v58 = vcombine.low %v1713_v54, %v1723_v56 }
 0x1e4   : > { %7635 = vmatprep.subr.bf16.mxu1 %v8360_v8 }
 0x1e5   : > { %7641 = vmatprep.mubr.msk.bf16.mxu1 %vm342_vm1, %v6826_v58 }
 0x1e7   : > { %7636 = vmatpush3.bf16.msra.mxu1 %v8360_v8 }
 0x1e8   : > { %7637 = vmatprep.subr.bf16.mxu1 %v8362_v11 }
 0x1eb   : > { %7638 = vmatpush3.bf16.msra.mxu1 %v8362_v11 }
 0x1ec   : > { %7639 = vmatprep.subr.bf16.mxu1 %v8364_v42 }
 0x1ef   : > { %7640 = vmatpush3.bf16.msra.mxu1 %v8364_v42  ;;  %v340_v42 = vld [vmem:[%s11627_s2] sm:$0x1] }
 0x1f0   : > { %7673 = vmatprep.subr.bf16.mxu1 %v8366_v47 }
 0x2b5   : > { %v693_v5 = vpop.f32.mrb[0].mxu1 }
 0x2b6   : > { %v697_v8 = vmul.f32 0.001953125, %v693_v5  ;;  %v7632_v9 = vpop.f32.mrb[1].mxu1 }
 0x2b8   : > { %v698_v11 = vadd.f32 1e-05, %v697_v8 }
 0x2ba   : > { %8432 = vrsqrt.f32 %v698_v11 }
 0x2c4   : > { %v8433_v43 = vpop.eup %8432 }
 0x2c5   : > { %v700_v44 = vmul.f32 %v8433_v43, %v340_v42 }
 0x2c7   : > { %v9485_v61 = vrot.slane %v700_v44, %v489_v60 }
 0x2c9   : > { %v715_v48 = vmul.f32 %v9485_v61, %v9294_v29  ;;  %v716_v49 = vmul.f32 %v9485_v61, %v9301_v30  ;;  %v717_v52 = vmul.f32 %v9485_v61, %v9308_v33  ;;  %v718_v60 = vmul.f32 %v9485_v61, %v9315_v34 }
 0x2ca   : > { %v719_v53 = vmul.f32 %v9485_v61, %v9322_v1  ;;  %v720_v29 = vmul.f32 %v9485_v61, %v9329_v13  ;;  %v721_v30 = vmul.f32 %v9485_v61, %v9336_v14  ;;  %v722_v34 = vmul.f32 %v9485_v61, %v9343_v15 }
 0x2cb   : > { %v9511_v54 = vadd.f32 %v9500_v55, %v715_v48  ;;  %v9514_v33 = vadd.f32 %v9500_v55, %v716_v49  ;;  %v9517_v56 = vadd.f32 %v9500_v55, %v717_v52  ;;  %v9522_v1 = vadd.f32 %v9500_v55, %v718_v60  ;;  %v8367_v48 = vld [vmem:[#allocation8 + $0xa0] sm:$0xff]  }
 0x2cc   : > { %v9526_v13 = vmul.f32 %v9485_v61, %v9287_v28  ;;  %v723_v14 = vmul.f32 %v9485_v61, %v9350_v16  ;;  %v9531_v58 = vadd.f32 %v9500_v55, %v719_v53  ;;  %v724_v5 = vmul.f32 %v9485_v61, %v9357_v19  ;;  %7833 = vmatprep.subr.bf16.mxu0 %v8367_v48 }
 0x2cd   : > { %v725_v8 = vmul.f32 %v9485_v61, %v9364_v20  ;;  %v726_v15 = vmul.f32 %v9485_v61, %v9371_v22  ;;  %v9540_v9 = vadd.f32 %v9500_v55, %v720_v29  ;;  %v9543_v28 = vadd.f32 %v9500_v55, %v721_v30 }
 0x2ce   : > { %v6772_v16 = vmul.f32 -1.442695, %v9511_v54  ;;  %v6773_v11 = vmul.f32 -1.442695, %v9514_v33  ;;  %v6774_v12 = vmul.f32 -1.442695, %v9517_v56  ;;  %v727_v19 = vmul.f32 %v9485_v61, %v9378_v24 }
 0x2cf   : > { %v728_v20 = vmul.f32 %v9485_v61, %v9385_v25  ;;  %v9553_v22 = vadd.f32 %v9500_v55, %v722_v34  ;;  %v6775_v23 = vmul.f32 -1.442695, %v9522_v1  ;;  %v729_v27 = vmul.f32 %v9485_v61, %v9392_v31 }
 0x2d0   : > { %v9559_v17 = vadd.f32 %v9500_v55, %v723_v14  ;;  %8434 = vpow2.f32 %v6772_v16  ;;  %v6776_v38 = vmul.f32 -1.442695, %v9531_v58  ;;  %v730_v24 = vmul.f32 %v9485_v61, %v9399_v32 }
 0x2d1   : > { %v9565_v40 = vadd.f32 %v9500_v55, %v724_v5  ;;  %8436 = vpow2.f32 %v6773_v11  ;;  %v6777_v25 = vmul.f32 -1.442695, %v9540_v9  ;;  %v731_v35 = vmul.f32 %v9485_v61, %v9406_v57  ;;  %v1020_v5 = vld [vmem:[#allocation2 + $0x30] sm:$0x1] }
 0x2d2   : > { %v9571_v31 = vadd.f32 %v9500_v55, %v725_v8  ;;  %8438 = vpow2.f32 %v6774_v12  ;;  %v6778_v41 = vmul.f32 -1.442695, %v9543_v28  ;;  %v732_v42 = vmul.f32 %v9485_v61, %v9413_v59  ;;  %v1070_v12 = vld [vmem:[#allocation2 + $0x38] sm:$0x1] }
 0x2d3   : > { %v9577_v32 = vadd.f32 %v9500_v55, %v726_v15  ;;  %8440 = vpow2.f32 %v6775_v23  ;;  %v6779_v43 = vmul.f32 -1.442695, %v9553_v22  ;;  %v733_v44 = vmul.f32 %v9485_v61, %v9420_v63 }
 0x2d4   : > { %v9583_v57 = vadd.f32 %v9500_v55, %v727_v19  ;;  %8442 = vpow2.f32 %v6776_v38  ;;  %v6780_v45 = vmul.f32 -1.442695, %v9559_v17  ;;  %v734_v39 = vmul.f32 %v9485_v61, %v9427_v3 }
 0x2d5   : > { %v9589_v59 = vadd.f32 %v9500_v55, %v728_v20  ;;  %8444 = vpow2.f32 %v6777_v25  ;;  %v6781_v46 = vmul.f32 -1.442695, %v9565_v40  ;;  %v735_v63 = vmul.f32 %v9485_v61, %v9434_v6 }
 0x2d6   : > { %v9595_v49 = vadd.f32 %v9500_v55, %v729_v27  ;;  %8446 = vpow2.f32 %v6778_v41  ;;  %v6782_v52 = vmul.f32 -1.442695, %v9571_v31  ;;  %v736_v3 = vmul.f32 %v9485_v61, %v9441_v18 }
 0x2d7   : > { %v9601_v60 = vadd.f32 %v9500_v55, %v730_v24  ;;  %8448 = vpow2.f32 %v6779_v43  ;;  %v6783_v53 = vmul.f32 -1.442695, %v9577_v32  ;;  %v9605_v29 = vadd.f32 %v9500_v55, %v731_v35  ;;  %v1023_v43 = vld [vmem:[#allocation2 + $0x3c] sm:$0x1] }
 0x2d8   : > { %v9608_v6 = vadd.f32 %v9500_v55, %v732_v42  ;;  %8450 = vpow2.f32 %v6780_v45  ;;  %v6784_v30 = vmul.f32 -1.442695, %v9583_v57  ;;  %v9612_v34 = vadd.f32 %v9500_v55, %v733_v44 }
 0x2d9   : > { %8452 = vpow2.f32 %v6781_v46  ;;  %v6785_v18 = vmul.f32 -1.442695, %v9589_v59  ;;  %v711_v14 = vmul.f32 %v9485_v61, %v9266_v36  ;;  %v9618_v15 = vadd.f32 %v9500_v55, %v734_v39  ;;  %v1073_v46 = vld [vmem:[#allocation2 + $0x44] sm:$0x1] }
 0x2da   : > { %v8435_v8 = vpop.eup %8434  ;;  %v9621_v16 = vadd.f32 %v9500_v55, %v735_v63  ;;  %8454 = vpow2.f32 %v6782_v52  ;;  %v6786_v11 = vmul.f32 -1.442695, %v9595_v49  ;;  %v9625_v20 = vadd.f32 %v9500_v55, %v736_v3 }
 0x2db   : > { %v8437_v19 = vpop.eup %8436  ;;  %8456 = vpow2.f32 %v6783_v53  ;;  %v6787_v23 = vmul.f32 -1.442695, %v9601_v60  ;;  %v712_v36 = vmul.f32 %v9485_v61, %v9273_v21  ;;  %v6788_v38 = vmul.f32 -1.442695, %v9605_v29 }
 0x2dc   : > { %v8439_v27 = vpop.eup %8438  ;;  %8458 = vpow2.f32 %v6784_v30  ;;  %v9632_v24 = vadd.f32 %v9500_v55, %v711_v14  ;;  %v1021_v25 = vsel %vm9078_vm4, 0, %v1020_v5  ;;  %v6789_v41 = vmul.f32 -1.442695, %v9608_v6 }
 0x2dd   : > { %v8441_v35 = vpop.eup %8440  ;;  %8460 = vpow2.f32 %v6785_v18  ;;  %v9638_v42 = vadd.f32 %v9500_v55, %v712_v36  ;;  %1022 = vst [vmem:[#allocation2 + $0x30] sm:$0x1] %v1021_v25  ;;  %v1071_v21 = vsel %vm9098_vm6, 0, %v1070_v12  ;;  %v6790_v45 = vmul.f32 -1.442695, %v9612_v34 }
 0x2de   : > { %11679 = vst [vmem:[#allocation15_spill] sm:$0xff] %v9632_v24  ;;  %v8443_v44 = vpop.eup %8442  ;;  %8462 = vpow2.f32 %v6786_v11  ;;  %1072 = vst [vmem:[#allocation2 + $0x38] sm:$0x1] %v1071_v21  ;;  %v713_v39 = vmul.f32 %v9485_v61, %v9280_v26  ;;  %v6791_v48 = vmul.f32 -1.442695, %v9618_v15  ;;  %v705_v63 = vmul.f32 %v9485_v61, %v9232_v62 }
 0x2df   : > { %11680 = vst [vmem:[#allocation16_spill] sm:$0xff] %v9638_v42  ;;  %v8445_v47 = vpop.eup %8444  ;;  %8464 = vpow2.f32 %v6787_v23  ;;  %v9650_v52 = vadd.f32 %v9500_v55, %v9526_v13  ;;  %v6792_v53 = vmul.f32 -1.442695, %v9621_v16  ;;  %v1024_v26 = vsel %vm9078_vm4, 0, %v1023_v43 }
 0x2e0   : > { %v8447_v3 = vpop.eup %8446  ;;  %8466 = vpow2.f32 %v6788_v38  ;;  %v9654_v30 = vadd.f32 %v9500_v55, %v713_v39  ;;  %v6793_v14 = vmul.f32 -1.442695, %v9625_v20  ;;  %1025 = vst [vmem:[#allocation2 + $0x3c] sm:$0x1] %v1024_v26  ;;  %v1074_v62 = vsel %vm9098_vm6, 0, %v1073_v46 }
 0x2e1   : > { %11681 = vst [vmem:[#allocation17_spill] sm:$0xff] %v9650_v52  ;;  %v8449_v18 = vpop.eup %8448  ;;  %8468 = vpow2.f32 %v6789_v41  ;;  %v881_v5 = vadd.f32 1.0, %v8435_v8  ;;  %1075 = vst [vmem:[#allocation2 + $0x44] sm:$0x1] %v1074_v62  ;;  %v882_v12 = vadd.f32 1.0, %v8437_v19  ;;  %v883_v36 = vadd.f32 1.0, %v8439_v27 }
 0x2e2   : > { %11682 = vst [vmem:[#allocation18_spill] sm:$0xff] %v9654_v30  ;;  %v8451_v13 = vpop.eup %8450  ;;  %8470 = vpow2.f32 %v6790_v45  ;;  %v706_v38 = vmul.f32 %v9485_v61, %v9236_v0  ;;  %v9664_v25 = vadd.f32 %v9500_v55, %v705_v63  ;;  %v884_v21 = vadd.f32 1.0, %v8441_v35  ;;  %v1026_v45 = vld [vmem:[#allocation2 + $0x48] sm:$0x1]  ;;  %v1076_v46 = vld [vmem:[#allocation2 + $0x50] sm:$0x1] }
 0x2e3   : > { %v8453_v11 = vpop.eup %8452  ;;  %8472 = vpow2.f32 %v6791_v48  ;;  %v707_v43 = vmul.f32 %v9485_v61, %v9240_v2  ;;  %v708_v8 = vmul.f32 %v9485_v61, %v9244_v4  ;;  %v885_v39 = vadd.f32 1.0, %v8443_v44  ;;  %v1029_v35 = vld [vmem:[#allocation2 + $0x54] sm:$0x1]  ;;  %v1079_v44 = vld [vmem:[#allocation2 + $0x5c] sm:$0x1] }
 0x2e4   : > { %v8455_v23 = vpop.eup %8454  ;;  %8474 = vpow2.f32 %v6792_v53  ;;  %v709_v27 = vmul.f32 %v9485_v61, %v9252_v7  ;;  %v1027_v0 = vsel %vm9078_vm4, 0, %v1026_v45  ;;  %v886_v63 = vadd.f32 1.0, %v8445_v47 }
 0x2e5   : > { %v8457_v41 = vpop.eup %8456  ;;  %8476 = vpow2.f32 %v6793_v14  ;;  %v710_v2 = vmul.f32 %v9485_v61, %v9258_v10  ;;  %1028 = vst [vmem:[#allocation2 + $0x48] sm:$0x1] %v1027_v0  ;;  %v1077_v4 = vsel %vm9098_vm6, 0, %v1076_v46  ;;  %v887_v26 = vadd.f32 1.0, %v8447_v3  ;;  %v1032_v3 = vld [vmem:[#allocation2 + $0x60] sm:$0x1] }
 0x2e6   : > { %v8459_v19 = vpop.eup %8458  ;;  %8478 = vrcp.f32 %v881_v5  ;;  %1078 = vst [vmem:[#allocation2 + $0x50] sm:$0x1] %v1077_v4  ;;  %v1030_v7 = vsel %vm9078_vm4, 0, %v1029_v35  ;;  %v1080_v47 = vsel %vm9098_vm6, 0, %v1079_v44  ;;  %v888_v62 = vadd.f32 1.0, %v8449_v18 }
 0x2e7   : > { %v8461_v48 = vpop.eup %8460  ;;  %8480 = vrcp.f32 %v882_v12  ;;  %v9683_v10 = vadd.f32 %v9500_v55, %v706_v38  ;;  %v9686_v61 = vadd.f32 %v9500_v55, %v707_v43  ;;  %1031 = vst [vmem:[#allocation2 + $0x54] sm:$0x1] %v1030_v7  ;;  %1081 = vst [vmem:[#allocation2 + $0x5c] sm:$0x1] %v1080_v47  ;;  %v889_v12 = vadd.f32 1.0, %v8451_v13 }
 0x2e8   : > { %v8463_v53 = vpop.eup %8462  ;;  %8482 = vrcp.f32 %v883_v36  ;;  %v9689_v36 = vadd.f32 %v9500_v55, %v708_v8  ;;  %v1033_v45 = vsel %vm9078_vm4, 0, %v1032_v3  ;;  %v1082_v18 = vld [vmem:[#allocation2 + $0x68] sm:$0x1]  ;;  %v890_v0 = vadd.f32 1.0, %v8453_v11 }
 0x2e9   : > { %v8465_v14 = vpop.eup %8464  ;;  %8484 = vrcp.f32 %v884_v21  ;;  %11683 = vst [vmem:[#allocation19_spill] sm:$0xff] %v9683_v10  ;;  %11684 = vst [vmem:[#allocation20_spill] sm:$0xff] %v9686_v61  ;;  %v9694_v38 = vadd.f32 %v9500_v55, %v709_v27  ;;  %v1083_v43 = vsel %vm9098_vm6, 0, %v1082_v18  ;;  %v891_v13 = vadd.f32 1.0, %v8455_v23 }
 0x2ea   : > { %v8467_v5 = vpop.eup %8466  ;;  %8486 = vrcp.f32 %v885_v39  ;;  %11685 = vst [vmem:[#allocation21_spill] sm:$0xff] %v9689_v36  ;;  %1034 = vst [vmem:[#allocation2 + $0x60] sm:$0x1] %v1033_v45  ;;  %v9699_v8 = vadd.f32 %v9500_v55, %v710_v2  ;;  %v892_v4 = vadd.f32 1.0, %v8457_v41  ;;  %v9702_v11 = vmul.f32 -1.442695, %v9664_v25 }
 0x2eb   : > { %v8469_v21 = vpop.eup %8468  ;;  %8488 = vrcp.f32 %v886_v63  ;;  %11686 = vst [vmem:[#allocation22_spill] sm:$0xff] %v9694_v38  ;;  %1084 = vst [vmem:[#allocation2 + $0x68] sm:$0x1] %v1083_v43  ;;  %v893_v27 = vadd.f32 1.0, %v8459_v19  ;;  %v9705_v35 = vmul.f32 -1.442695, %v9683_v10 }
 0x2ec   : > { %v8471_v46 = vpop.eup %8470  ;;  %8490 = vrcp.f32 %v887_v26  ;;  %11687 = vst [vmem:[#allocation23_spill] sm:$0xff] %v9699_v8  ;;  %v9708_v44 = vmul.f32 -1.442695, %v9686_v61  ;;  %v894_v26 = vadd.f32 1.0, %v8461_v48  ;;  %v9711_v55 = vmul.f32 -1.442695, %v9689_v36 }
 0x2ed   : > { %v8473_v39 = vpop.eup %8472  ;;  %8492 = vrcp.f32 %v888_v62  ;;  %v9714_v41 = vmul.f32 -1.442695, %v9694_v38  ;;  %v895_v7 = vadd.f32 1.0, %v8463_v53  ;;  %v9717_v19 = vmul.f32 -1.442695, %v9699_v8 }
 0x2ee   : > { %v8475_v63 = vpop.eup %8474  ;;  %8494 = vrcp.f32 %v889_v12  ;;  %v9720_v47 = vmul.f32 -1.442695, %v9632_v24  ;;  %v896_v3 = vadd.f32 1.0, %v8465_v14  ;;  %v9723_v48 = vmul.f32 -1.442695, %v9638_v42 }
 0x2ef   : > { %v8477_v23 = vpop.eup %8476  ;;  %8496 = vrcp.f32 %v890_v0  ;;  %v897_v18 = vadd.f32 1.0, %v8467_v5  ;;  %v1035_v0 = vld [vmem:[#allocation2 + $0x6c] sm:$0x1]  ;;  %v1085_v43 = vld [vmem:[#allocation2 + $0x74] sm:$0x1]  ;;  %v898_v8 = vadd.f32 1.0, %v8469_v21 }
 0x2f0   : > { %v8479_v2 = vpop.eup %8478  ;;  %8498 = vrcp.f32 %v891_v13  ;;  %v1036_v14 = vsel %vm9078_vm4, 0, %v1035_v0  ;;  %v899_v42 = vadd.f32 1.0, %v8471_v46  ;;  %v900_v5 = vadd.f32 1.0, %v8473_v39 }
 0x2f1   : > { %v8481_v62 = vpop.eup %8480  ;;  %8500 = vrcp.f32 %v892_v4  ;;  %v977_v12 = vmul.f32 %v8479_v2, %v9511_v54  ;;  %1037 = vst [vmem:[#allocation2 + $0x6c] sm:$0x1] %v1036_v14  ;;  %v1086_v54 = vsel %vm9098_vm6, 0, %v1085_v43  ;;  %v901_v2 = vadd.f32 1.0, %v8475_v63 }
 0x2f2   : > { %v8483_v45 = vpop.eup %8482  ;;  %8502 = vrcp.f32 %v893_v27  ;;  %v978_v53 = vmul.f32 %v8481_v62, %v9514_v33  ;;  %v9737_v27 = vmul.f32 -1.442695, %v9650_v52  ;;  %1087 = vst [vmem:[#allocation2 + $0x74] sm:$0x1] %v1086_v54 }
 0x2f3   : > { %v8485_v13 = vpop.eup %8484  ;;  %8504 = vrcp.f32 %v894_v26  ;;  %v9727_v24 = vpack.c.bf16 %v977_v12, %v977_v12  ;;  %v902_v12 = vadd.f32 1.0, %v8477_v23 }
 0x2f4   : > { %v8487_v4 = vpop.eup %8486  ;;  %8506 = vrcp.f32 %v895_v7  ;;  %v9731_v38 = vpack.c.bf16 %v978_v53, %v978_v53  ;;  %v9741_v7 = vmul.f32 -1.442695, %v9654_v30 }
 0x2f5   : > { %v8489_v33 = vpop.eup %8488  ;;  %8508 = vrcp.f32 %v896_v3  ;;  %v981_v21 = vmul.f32 %v8487_v4, %v9531_v58  ;;  %v1293_v3 = vshrl.u32 %v9727_v24, 16 }
 0x2f6   : > { %v8491_v26 = vpop.eup %8490  ;;  %8510 = vrcp.f32 %v897_v18  ;;  %v982_v46 = vmul.f32 %v8489_v33, %v9540_v9  ;;  %v1301_v63 = vshrl.u32 %v9731_v38, 16 }
 0x2f7   : > { %v8493_v62 = vpop.eup %8492  ;;  %8512 = vrcp.f32 %v898_v8  ;;  %v983_v39 = vmul.f32 %v8491_v26, %v9543_v28  ;;  %v9750_v43 = vpack.c.bf16 %v981_v21, %v981_v21  ;;  %v9753_v28 = vmul.f32 %v8485_v13, %v9522_v1 }
 0x2f8   : > { %v8495_v58 = vpop.eup %8494  ;;  %8514 = vrcp.f32 %v899_v42  ;;  %v984_v53 = vmul.f32 %v8493_v62, %v9553_v22  ;;  %v9746_v0 = vpack.c.bf16 %v982_v46, %v982_v46  ;;  %v9756_v42 = vmul.f32 %v8483_v45, %v9517_v56 }
 0x2f9   : > { %v8497_v18 = vpop.eup %8496  ;;  %8516 = vrcp.f32 %v900_v5  ;;  %v985_v9 = vmul.f32 %v8495_v58, %v9559_v17  ;;  %v7253_v23 = vpack.c.bf16 %v983_v39, %v983_v39  ;;  %v9764_v45 = vrot.slane %v1293_v3, 7 }
 0x2fa   : > { %v8499_v8 = vpop.eup %8498  ;;  %8518 = vrcp.f32 %v901_v2  ;;  %v7254_v14 = vpack.c.bf16 %v984_v53, %v984_v53  ;;  %v986_v5 = vmul.f32 %v8497_v18, %v9565_v40  ;;  %v1335_v21 = vshrl.u32 %v9746_v0, 16 }
 0x2fb   : > { %v8501_v22 = vpop.eup %8500  ;;  %8520 = vrcp.f32 %v902_v12  ;;  %v987_v4 = vmul.f32 %v8499_v8, %v9571_v31  ;;  %v7255_v54 = vpack.c.bf16 %v985_v9, %v985_v9  ;;  %v1344_v26 = vshrl.u32 %v7253_v23, 16 }
 0x2fc   : > { %v8503_v17 = vpop.eup %8502  ;;  %v1352_v56 = vshrl.u32 %v7254_v14, 16  ;;  %v9766_v46 = vrot.slane %v1301_v63, 7  ;;  %v988_v62 = vmul.f32 %v8501_v22, %v9577_v32  ;;  %v1355_v9 = vshll.u32 %v7254_v14, 16 }
 0x2fd   : > { %v8505_v13 = vpop.eup %8504  ;;  %v989_v12 = vmul.f32 %v8503_v17, %v9583_v57  ;;  %v7257_v40 = vpack.c.bf16 %v987_v4, %v987_v4  ;;  %v1361_v8 = vshrl.u32 %v7255_v54, 16  ;;  %v9775_v2 = vpack.c.bf16 %v986_v5, %v986_v5 }
 0x2fe   : > { %v8507_v31 = vpop.eup %8506  ;;  %v990_v53 = vmul.f32 %v8505_v13, %v9589_v59  ;;  %v9772_v18 = vrot.slane %v1352_v56, 7  ;;  %v9777_v1 = vrot.slane %v1335_v21, 7  ;;  %v9779_v32 = vrot.slane %v1344_v26, 7 }
 0x2ff   : > { %v8509_v58 = vpop.eup %8508  ;;  %v991_v63 = vmul.f32 %v8507_v31, %v9595_v49  ;;  %v1347_v17 = vshll.u32 %v7253_v23, 16  ;;  %v7258_v56 = vpack.c.bf16 %v988_v62, %v988_v62  ;;  %v9787_v49 = vrot.slane %v1361_v8, 7 }
 0x300   : > { %v8511_v3 = vpop.eup %8510  ;;  %11688 = vst [vmem:[#allocation24_spill] sm:$0xff] %v9779_v32  ;;  %v992_v22 = vmul.f32 %v8509_v58, %v9601_v60  ;;  %v9784_v59 = vor.u32 %v1355_v9, %v9772_v18  ;;  %v1364_v5 = vshll.u32 %v7255_v54, 16  ;;  %v7259_v31 = vpack.c.bf16 %v989_v12, %v989_v12 }
 0x301   : > { %v8513_v57 = vpop.eup %8512  ;;  %v993_v4 = vmul.f32 %v8511_v3, %v9605_v29  ;;  %v7260_v39 = vpack.c.bf16 %v990_v53, %v990_v53  ;;  %v1378_v33 = vshrl.u32 %v7257_v40, 16  ;;  %v7261_v23 = vpack.c.bf16 %v991_v63, %v991_v63 }
 0x302   : > { %11689 = vst [vmem:[#allocation25_spill] sm:$0xff] %v9784_v59  ;;  %v8515_v14 = vpop.eup %8514  ;;  %v994_v13 = vmul.f32 %v8513_v57, %v9608_v6  ;;  %v9792_v58 = vor.u32 %v1347_v17, %v9779_v32  ;;  %v9795_v9 = vor.u32 %v1364_v5, %v9787_v49  ;;  %v7262_v54 = vpack.c.bf16 %v992_v22, %v992_v22 }
 0x303   : > { %v8517_v21 = vpop.eup %8516  ;;  %v995_v26 = vmul.f32 %v8515_v14, %v9612_v34  ;;  %v7263_v8 = vpack.c.bf16 %v993_v4, %v993_v4  ;;  %v1380_v3 = vrot.slane %v1378_v33, 7  ;;  %v1381_v53 = vshll.u32 %v7257_v40, 16 }
 0x304   : > { %v8519_v60 = vpop.eup %8518  ;;  %v996_v29 = vmul.f32 %v8517_v21, %v9618_v15  ;;  %11690 = vst [vmem:[#allocation26_spill] sm:$0xff] %v9795_v9  ;;  %v9799_v12 = vpack.c.bf16 %v994_v13, %v994_v13  ;;  %v1386_v57 = vshrl.u32 %v7258_v56, 16  ;;  %v1389_v22 = vshll.u32 %v7258_v56, 16 }
 0x305   : > { %v8521_v6 = vpop.eup %8520  ;;  %v997_v62 = vmul.f32 %v8519_v60, %v9621_v16  ;;  %v7265_v15 = vpack.c.bf16 %v995_v26, %v995_v26  ;;  %v1384_v14 = vrot.slane %v1380_v3, 4  ;;  %v9807_v21 = vor.u32 %v1381_v53, %v1380_v3 }
 0x306   : > { %v998_v34 = vmul.f32 %v8521_v6, %v9625_v20  ;;  %v9801_v63 = vpack.c.bf16 %v996_v29, %v996_v29  ;;  %v9809_v16 = vrot.slane %v1386_v57, 7  ;;  %v1395_v33 = vshrl.u32 %v7259_v31, 16 }
 0x307   : > { %v9803_v17 = vpack.c.bf16 %v997_v62, %v997_v62  ;;  %v1398_v40 = vshll.u32 %v7259_v31, 16  ;;  %v1403_v4 = vshrl.u32 %v7260_v39, 16  ;;  %v1406_v13 = vshll.u32 %v7260_v39, 16 }
 0x308   : > { %v9805_v5 = vpack.c.bf16 %v998_v34, %v998_v34  ;;  %v1391_v26 = vor.u32 %v1389_v22, %v9809_v16  ;;  %v1393_v60 = vrot.slane %v9809_v16, 4  ;;  %v1412_v29 = vshrl.u32 %v7261_v23, 16 }
 0x309   : > { %v1415_v6 = vshll.u32 %v7261_v23, 16  ;;  %v1397_v62 = vrot.slane %v1395_v33, 7  ;;  %v9819_v3 = vrot.slane %v1403_v4, 7  ;;  %v1420_v56 = vshrl.u32 %v7262_v54, 16 }
 0x30a   : > { %v1423_v34 = vshll.u32 %v7262_v54, 16  ;;  %v1392_v53 = vsel %vm9813_vm12, %v1384_v14, %v1391_v26  ;;  %v1414_v57 = vrot.slane %v1412_v29, 7  ;;  %v1429_v9 = vshrl.u32 %v7263_v8, 16  ;;  %v1599_v26 = vld [vmem:[#allocation2 + $0x84] sm:$0xf] }
 0x30b   : > { %v1432_v51 = vshll.u32 %v7263_v8, 16  ;;  %v1400_v31 = vor.u32 %v1398_v40, %v1397_v62  ;;  %v1401_v59 = vrot.slane %v1397_v62, 4  ;;  %v1408_v39 = vor.u32 %v1406_v13, %v9819_v3  ;;  %1602 = vst.msk [vmem:[#allocation2 + $0x88] sm:$0xf] %vm999_vm7, %v1392_v53 }
 0x30c   : > { %v1410_v22 = vrot.slane %v9819_v3, 4  ;;  %v9826_v23 = vor.u32 %v1415_v6, %v1414_v57  ;;  %v1418_v16 = vrot.slane %v1414_v57, 4  ;;  %v1422_v33 = vrot.slane %v1420_v56, 7  ;;  %v1606_v6 = vld [vmem:[#allocation2 + $0x90] sm:$0xf] }
 0x30d   : > { %v1431_v4 = vrot.slane %v1429_v9, 7  ;;  %v1409_v54 = vsel %vm9813_vm12, %v1401_v59, %v1408_v39  ;;  %v1437_v14 = vshrl.u32 %v9799_v12, 16  ;;  %v1440_v8 = vshll.u32 %v9799_v12, 16  ;;  %v1603_v12 = vld [vmem:[#allocation2 + $0x8c] sm:$0x1] }
 0x30e   : > { %v1446_v40 = vshrl.u32 %v7265_v15, 16  ;;  %v1425_v29 = vor.u32 %v1423_v34, %v1422_v33  ;;  %v1427_v13 = vrot.slane %v1422_v33, 4  ;;  %1609 = vst.msk [vmem:[#allocation2 + $0x94] sm:$0xf] %vm999_vm7, %v1409_v54  ;;  %v1449_v56 = vshll.u32 %v7265_v15, 16 }
 0x30f   : > { %v1434_v62 = vor.u32 %v1432_v51, %v1431_v4  ;;  %v1435_v3 = vrot.slane %v1431_v4, 4  ;;  %v1439_v53 = vrot.slane %v1437_v14, 7  ;;  %v1454_v9 = vshrl.u32 %v9801_v63, 16  ;;  %v1613_v39 = vld [vmem:[#allocation2 + $0x9c] sm:$0xf] }
 0x310   : > { %v1448_v57 = vrot.slane %v1446_v40, 7  ;;  %v1426_v51 = vsel %vm9813_vm12, %v1418_v16, %v1425_v29  ;;  %v1457_v34 = vshll.u32 %v9801_v63, 16  ;;  %v1463_v33 = vshrl.u32 %v9803_v17, 16  ;;  %v1610_v15 = vld [vmem:[#allocation2 + $0x98] sm:$0x1] }
 0x311   : > { %v1466_v4 = vshll.u32 %v9803_v17, 16  ;;  %v1617_v54 = vld [vmem:[#allocation2 + $0xa4] sm:$0x1]  ;;  %v1620_v14 = vld [vmem:[#allocation2 + $0xa8] sm:$0xf]  ;;  %v1442_v40 = vor.u32 %v1440_v8, %v1439_v53  ;;  %v1444_v32 = vrot.slane %v1439_v53, 4  ;;  %v1600_v8 = vsel %vm9836_vm13, %v9807_v21, %v1599_v26 }
 0x312   : > { %v1451_v52 = vor.u32 %v1449_v56, %v1448_v57  ;;  %v1452_v30 = vrot.slane %v1448_v57, 4  ;;  %1616 = vst.msk [vmem:[#allocation2 + $0xa0] sm:$0xf] %vm999_vm7, %v1426_v51  ;;  %v1456_v36 = vrot.slane %v1454_v9, 7  ;;  %v1465_v61 = vrot.slane %v1463_v33, 7 }
 0x313   : > { %v1471_v10 = vshrl.u32 %v9805_v5, 16  ;;  %v1474_v16 = vshll.u32 %v9805_v5, 16  ;;  %v1624_v63 = vld [vmem:[#allocation2 + $0xb0] sm:$0x1]  ;;  %v1627_v29 = vld [vmem:[#allocation2 + $0xb4] sm:$0xf]  ;;  %v1443_v17 = vsel %vm9813_vm12, %v1435_v3, %v1442_v40  ;;  %v1604_v53 = vsel %vm9078_vm4, %v1393_v60, %v1603_v12 }
 0x314   : > { %v1607_v57 = vsel %vm9836_vm13, %v1400_v31, %v1606_v6  ;;  %v1631_v56 = vld [vmem:[#allocation2 + $0xbc] sm:$0x1]  ;;  %v1634_v9 = vld [vmem:[#allocation2 + $0xc0] sm:$0xf]  ;;  %v1459_v51 = vor.u32 %v1457_v34, %v1456_v36  ;;  %v1461_v33 = vrot.slane %v1456_v36, 4  ;;  %v1468_v5 = vor.u32 %v1466_v4, %v1465_v61 }
 0x315   : > { %v1469_v50 = vrot.slane %v1465_v61, 4  ;;  %1623 = vst.msk [vmem:[#allocation2 + $0xac] sm:$0xf] %vm999_vm7, %v1443_v17  ;;  %1601 = vst [vmem:[#allocation2 + $0x84] sm:$0xf] %v1600_v8  ;;  %v1473_v3 = vrot.slane %v1471_v10, 7  ;;  %v1611_v21 = vsel %vm9078_vm4, %v1410_v22, %v1610_v15  ;;  %v1614_v60 = vsel %vm9836_vm13, %v9826_v23, %v1613_v39 }
 0x316   : > { %1605 = vst [vmem:[#allocation2 + $0x8c] sm:$0x1] %v1604_v53  ;;  %1608 = vst [vmem:[#allocation2 + $0x90] sm:$0xf] %v1607_v57  ;;  %v1618_v31 = vsel %vm9078_vm4, %v1427_v13, %v1617_v54  ;;  %v1638_v26 = vld [vmem:[#allocation2 + $0xc8] sm:$0x1]  ;;  %v1460_v61 = vsel %vm9813_vm12, %v1452_v30, %v1459_v51  ;;  %v1621_v36 = vsel %vm9836_vm13, %v1434_v62, %v1620_v14  ;;  %8522 = vpow2.f32 %v9702_v11 }
 0x317   : > { %v1625_v10 = vsel %vm9078_vm4, %v1444_v32, %v1624_v63  ;;  %v1628_v22 = vsel %vm9836_vm13, %v1451_v52, %v1627_v29  ;;  %1612 = vst [vmem:[#allocation2 + $0x98] sm:$0x1] %v1611_v21  ;;  %1615 = vst [vmem:[#allocation2 + $0x9c] sm:$0xf] %v1614_v60  ;;  %v1476_v23 = vor.u32 %v1474_v16, %v1473_v3  ;;  %v1478_v6 = vrot.slane %v1473_v3, 4 }
 0x318   : > { %1619 = vst [vmem:[#allocation2 + $0xa4] sm:$0x1] %v1618_v31  ;;  %1622 = vst [vmem:[#allocation2 + $0xa8] sm:$0xf] %v1621_v36  ;;  %v1632_v30 = vsel %vm9078_vm4, %v1461_v33, %v1631_v56  ;;  %v1635_v13 = vsel %vm9836_vm13, %v1468_v5, %v1634_v9  ;;  %v1564_v32 = vld [vmem:[#allocation2 + $0x48] sm:$0xf]  ;;  %8524 = vpow2.f32 %v9705_v35 }
 0x319   : > { %1626 = vst [vmem:[#allocation2 + $0xb0] sm:$0x1] %v1625_v10  ;;  %1629 = vst [vmem:[#allocation2 + $0xb4] sm:$0xf] %v1628_v22  ;;  %v1568_v62 = vld [vmem:[#allocation2 + $0x50] sm:$0x1]  ;;  %v1477_v15 = vsel %vm9813_vm12, %v1469_v50, %v1476_v23  ;;  %v1639_v54 = vsel %vm9078_vm4, %v1478_v6, %v1638_v26  ;;  %8526 = vpow2.f32 %v9708_v44  ;;  %v7249_v50 = vpack.c.bf16 %v9756_v42, %v9756_v42 }
 0x31a   : > { %1630 = vst.msk [vmem:[#allocation2 + $0xb8] sm:$0xf] %vm999_vm7, %v1460_v61  ;;  %1633 = vst [vmem:[#allocation2 + $0xbc] sm:$0x1] %v1632_v30  ;;  %v11695_v52 = vshll.u32 %v9727_v24, 16  ;;  %v1299_v39 = vrot.slane %v9764_v45, 4  ;;  %8528 = vpow2.f32 %v9711_v55  ;;  %v9906_v44 = vpack.c.bf16 %v9753_v28, %v9753_v28 }
 0x31b   : > { %1636 = vst [vmem:[#allocation2 + $0xc0] sm:$0xf] %v1635_v13  ;;  %v11696_v34 = vshll.u32 %v9731_v38, 16  ;;  %v1308_v11 = vrot.slane %v9766_v46, 4  ;;  %1637 = vst.msk [vmem:[#allocation2 + $0xc4] sm:$0xf] %vm999_vm7, %v1477_v15  ;;  %8530 = vpow2.f32 %v9714_v41 }
 0x31c   : > { %v1298_v12 = vor.u32 %v11695_v52, %v9764_v45  ;;  %1640 = vst [vmem:[#allocation2 + $0xc8] sm:$0x1] %v1639_v54  ;;  %v1327_v45 = vshrl.u32 %v9750_v43, 16  ;;  %v1369_v14 = vshrl.u32 %v9775_v2, 16  ;;  %v1310_v55 = vshrl.u32 %v7249_v50, 16 }
 0x31d   : > { %v1306_v4 = vor.u32 %v11696_v34, %v9766_v46  ;;  %v1569_v35 = vsel %vm9078_vm4, %v1308_v11, %v1568_v62  ;;  %v1359_v46 = vrot.slane %v9772_v18, 4  ;;  %8532 = vpow2.f32 %v9717_v19  ;;  %v1571_v40 = vld [vmem:[#allocation2 + $0x54] sm:$0xf]  ;;  %v1582_v29 = vld [vmem:[#allocation2 + $0x68] sm:$0x1] }
 0x31e   : > { %v1565_v38 = vsel %vm9836_vm13, %v1298_v12, %v1564_v32  ;;  %1570 = vst [vmem:[#allocation2 + $0x50] sm:$0x1] %v1569_v35  ;;  %v1318_v42 = vshrl.u32 %v9906_v44, 16  ;;  %v1329_v16 = vrot.slane %v1327_v45, 7  ;;  %v11697_v28 = vshll.u32 %v9746_v0, 16 }
 0x31f   : > { %v1307_v24 = vsel %vm9813_vm12, %v1299_v39, %v1306_v4  ;;  %1566 = vst [vmem:[#allocation2 + $0x48] sm:$0xf] %v1565_v38  ;;  %8534 = vpow2.f32 %v9720_v47  ;;  %v9918_v18 = vrot.slane %v1310_v55, 7  ;;  %v1313_v17 = vshll.u32 %v7249_v50, 16  ;;  %v1578_v8 = vld [vmem:[#allocation2 + $0x60] sm:$0xf] }
 0x320   : > { %1567 = vst.msk [vmem:[#allocation2 + $0x4c] sm:$0xf] %vm999_vm7, %v1307_v24  ;;  %v1340_v63 = vor.u32 %v11697_v28, %v9777_v1  ;;  %v1342_v41 = vrot.slane %v9777_v1, 4  ;;  %8536 = vpow2.f32 %v9723_v48  ;;  %v11698_v19 = vshll.u32 %v9750_v43, 16  ;;  %v1585_v56 = vld [vmem:[#allocation2 + $0x6c] sm:$0xf]  ;;  %v8523_v1 = vpop.eup %8522 }
 0x321   : > { %v1333_v57 = vrot.slane %v1329_v16, 4  ;;  %v1589_v9 = vld [vmem:[#allocation2 + $0x74] sm:$0x1]  ;;  %v1372_v0 = vshll.u32 %v9775_v2, 16  ;;  %8538 = vpow2.f32 %v9741_v7  ;;  %v1315_v47 = vor.u32 %v1313_v17, %v9918_v18 }
 0x322   : > { %v1332_v53 = vor.u32 %v11698_v19, %v1329_v16  ;;  %v1583_v51 = vsel %vm9078_vm4, %v1342_v41, %v1582_v29  ;;  %v9929_v33 = vrot.slane %v1369_v14, 7  ;;  %8540 = vpow2.f32 %v9737_v27  ;;  %v8525_v26 = vpop.eup %8524 }
 0x323   : > { %v9932_v48 = vrot.slane %v1318_v42, 7  ;;  %v1341_v43 = vsel %vm9813_vm12, %v1333_v57, %v1340_v63  ;;  %1584 = vst [vmem:[#allocation2 + $0x68] sm:$0x1] %v1583_v51  ;;  %v1572_v7 = vsel %vm9836_vm13, %v1315_v47, %v1571_v40  ;;  %v1586_v27 = vsel %vm9836_vm13, %v9792_v58, %v1585_v56  ;;  %v8527_v23 = vpop.eup %8526  ;;  %v1575_v57 = vld [vmem:[#allocation2 + $0x5c] sm:$0x1] }
 0x324   : > { %v1579_v60 = vsel %vm9836_vm13, %v1332_v53, %v1578_v8  ;;  %1581 = vst.msk [vmem:[#allocation2 + $0x64] sm:$0xf] %vm999_vm7, %v1341_v43  ;;  %v1590_v31 = vsel %vm9078_vm4, %v1359_v46, %v1589_v9  ;;  %v871_v61 = vadd.f32 1.0, %v8523_v1  ;;  %1573 = vst [vmem:[#allocation2 + $0x54] sm:$0xf] %v1572_v7  ;;  %v872_v6 = vadd.f32 1.0, %v8525_v26  ;;  %v8529_v62 = vpop.eup %8528 }
 0x325   : > { %1580 = vst [vmem:[#allocation2 + $0x60] sm:$0xf] %v1579_v60  ;;  %1587 = vst [vmem:[#allocation2 + $0x6c] sm:$0xf] %v1586_v27  ;;  %v1321_v32 = vshll.u32 %v9906_v44, 16  ;;  %v873_v58 = vadd.f32 1.0, %v8527_v23  ;;  %v8531_v39 = vpop.eup %8530  ;;  %v9957_v56 = vor.u32 %v1372_v0, %v9929_v33 }
 0x326   : > { %v1653_v5 = vld [vmem:[#allocation2 + $0x48] sm:$0xf]  ;;  %1591 = vst [vmem:[#allocation2 + $0x74] sm:$0x1] %v1590_v31  ;;  %8542 = vrcp.f32 %v871_v61  ;;  %v874_v34 = vadd.f32 1.0, %v8529_v62  ;;  %v875_v24 = vadd.f32 1.0, %v8531_v39 }
 0x327   : > { %v1654_v3 = vld [vmem:[#allocation2 + $0x4c] sm:$0xf]  ;;  %v3570_v21 = vld [vmem:[#allocation2 + $0x48] sm:$0xf]  ;;  %v1845_v36 = vshrl.u32 %v1653_v5, 16  ;;  %v1848_v10 = vshll.u32 %v1653_v5, 16  ;;  %8544 = vrcp.f32 %v872_v6  ;;  %v8533_v11 = vpop.eup %8532  ;;  %v1323_v50 = vor.u32 %v1321_v32, %v9932_v48 }
 0x328   : > { %v1854_v22 = vshll.u32 %v1654_v3, 16  ;;  %v1858_v30 = vshrl.u32 %v1654_v3, 16  ;;  %v3724_v13 = vshrl.u32 %v3570_v21, 16  ;;  %v1687_v4 = vld [vmem:[#allocation2 + $0x50] sm:$0x1]  ;;  %8546 = vrcp.f32 %v873_v58 }
 0x329   : > { %v1847_v52 = vrot.slane %v1845_v36, 4  ;;  %v1850_v12 = vrot.slane %v1848_v10, 5  ;;  %v1316_v38 = vrot.slane %v9918_v18, 4  ;;  %v8535_v35 = vpop.eup %8534  ;;  %8548 = vrcp.f32 %v874_v34  ;;  %v3571_v14 = vld [vmem:[#allocation2 + $0x4c] sm:$0xf] }
 0x32a   : > { %v9947_v15 = vrot.slane %v1854_v22, 5  ;;  %v1860_v54 = vrot.slane %v1858_v30, 4  ;;  %v876_v44 = vadd.f32 1.0, %v8533_v11  ;;  %v8537_v55 = vpop.eup %8536  ;;  %8550 = vrcp.f32 %v875_v24  ;;  %v11700_v30 = vld [vmem:[#allocation19_spill] sm:$0xff]  ;;  %v11702_v24 = vld [vmem:[#allocation21_spill] sm:$0xff] }
 0x32b   : > { %v1851_v45 = vor.u32 %v1850_v12, %v1847_v52  ;;  %v877_v42 = vadd.f32 1.0, %v8535_v35  ;;  %v3726_v40 = vrot.slane %v3724_v13, 4  ;;  %v3727_v16 = vshll.u32 %v3570_v21, 16  ;;  %v8539_v28 = vpop.eup %8538  ;;  %v9963_v43 = vld [vmem:[#allocation2 + $0x54] sm:$0xf] }
 0x32c   : > { %v1861_v46 = vor.u32 %v1860_v54, %v9947_v15  ;;  %8552 = vrcp.f32 %v876_v44  ;;  %v878_v63 = vadd.f32 1.0, %v8537_v55  ;;  %v1864_v29 = vshll.u32 %v1687_v4, 16  ;;  %v8541_v17 = vpop.eup %8540  ;;  %v9968_v21 = vld [vmem:[#allocation2 + $0x50] sm:$0x1]  ;;  %v9980_v26 = vld [vmem:[#allocation2 + $0x54] sm:$0xf] }
 0x32d   : > { %v1325_v18 = vrot.slane %v9932_v48, 4  ;;  %v1367_v41 = vrot.slane %v9787_v49, 4  ;;  %v879_v8 = vadd.f32 1.0, %v8539_v28  ;;  %v3729_v19 = vrot.slane %v3727_v16, 5  ;;  %v11701_v12 = vld [vmem:[#allocation20_spill] sm:$0xff]  ;;  %v11703_v55 = vld [vmem:[#allocation22_spill] sm:$0xff] }
 0x32e   : > { %v3733_v53 = vshll.u32 %v3571_v14, 16  ;;  %v880_v9 = vadd.f32 1.0, %v8541_v17  ;;  %v9959_v47 = vrot.slane %v1851_v45, 4  ;;  %v9961_v51 = vrot.slane %v1861_v46, 4 }
 0x32f   : > { %8554 = vrcp.f32 %v877_v42  ;;  %v3730_v1 = vor.u32 %v3729_v19, %v3726_v40  ;;  %v3737_v5 = vshrl.u32 %v3571_v14, 16  ;;  %v9966_v3 = vrot.slane %v1864_v29, 5 }
 0x330   : > { %8556 = vrcp.f32 %v878_v63  ;;  %v1324_v2 = vsel %vm9813_vm12, %v1316_v38, %v1323_v50  ;;  %v1576_v0 = vsel %vm9078_vm4, %v1325_v18, %v1575_v57  ;;  %v8543_v7 = vpop.eup %8542  ;;  %v9974_v60 = vrot.slane %v3733_v53, 5  ;;  %v11704_v63 = vld [vmem:[#allocation23_spill] sm:$0xff] }
 0x331   : > { %8558 = vrcp.f32 %v879_v8  ;;  %v9976_v27 = vrot.slane %v3737_v5, 4  ;;  %1574 = vst.msk [vmem:[#allocation2 + $0x58] sm:$0xf] %vm999_vm7, %v1324_v2  ;;  %1577 = vst [vmem:[#allocation2 + $0x5c] sm:$0x1] %v1576_v0  ;;  %v3748_v31 = vshrl.u32 %v9963_v43, 16  ;;  %v8545_v61 = vpop.eup %8544  ;;  %v967_v36 = vmul.f32 %v8543_v7, %v9664_v25 }
 0x332   : > { %8560 = vrcp.f32 %v880_v9  ;;  %v1857_v22 = vsel %vm9463_vm10, %v9959_v47, %v9947_v15  ;;  %v1867_v23 = vsel %vm9463_vm10, %v9961_v51, %v9966_v3  ;;  %v8547_v6 = vpop.eup %8546  ;;  %v968_v13 = vmul.f32 %v8545_v61, %v11700_v30  ;;  %v1529_v9 = vld [vmem:[#allocation2 + $0xc] sm:$0xf] }
 0x333   : > { %v9992_v32 = vrot.slane %v3730_v1, 4  ;;  %v3743_v62 = vshll.u32 %v9968_v21, 16  ;;  %v3751_v25 = vshll.u32 %v9963_v43, 16  ;;  %v8549_v58 = vpop.eup %8548  ;;  %v7237_v52 = vpack.c.bf16 %v967_v36, %v967_v36 }
 0x334   : > { %v969_v39 = vmul.f32 %v8547_v6, %v11701_v12  ;;  %v1869_v34 = vshrl.u32 %v9980_v26, 16  ;;  %v1872_v4 = vshll.u32 %v9980_v26, 16  ;;  %v8551_v54 = vpop.eup %8550  ;;  %v7238_v11 = vpack.c.bf16 %v968_v13, %v968_v13 }
 0x335   : > { %v970_v38 = vmul.f32 %v8549_v58, %v11702_v24  ;;  %v3740_v50 = vor.u32 %v9976_v27, %v9974_v60  ;;  %v10002_v35 = vrot.slane %v3748_v31, 4  ;;  %v1208_v45 = vshrl.u32 %v7237_v52, 16  ;;  %v1533_v31 = vld [vmem:[#allocation2 + $0x14] sm:$0x1] }
 0x336   : > { %v8553_v44 = vpop.eup %8552  ;;  %v1211_v46 = vshll.u32 %v7237_v52, 16  ;;  %v7239_v14 = vpack.c.bf16 %v969_v39, %v969_v39  ;;  %v971_v42 = vmul.f32 %v8551_v54, %v11703_v55  ;;  %v1216_v40 = vshrl.u32 %v7238_v11, 16  ;;  %v1536_v52 = vld [vmem:[#allocation2 + $0x18] sm:$0xf] }
 0x337   : > { %v1219_v16 = vshll.u32 %v7238_v11, 16  ;;  %v7240_v28 = vpack.c.bf16 %v970_v38, %v970_v38  ;;  %v972_v29 = vmul.f32 %v8553_v44, %v11704_v63  ;;  %v1210_v18 = vrot.slane %v1208_v45, 7  ;;  %v1540_v38 = vld [vmem:[#allocation2 + $0x20] sm:$0x1] }
 0x338   : > { %v1225_v17 = vshrl.u32 %v7239_v14, 16  ;;  %v1228_v8 = vshll.u32 %v7239_v14, 16  ;;  %v7241_v19 = vpack.c.bf16 %v971_v42, %v971_v42  ;;  %v1218_v57 = vrot.slane %v1216_v40, 7  ;;  %v1543_v42 = vld [vmem:[#allocation2 + $0x24] sm:$0xf] }
 0x339   : > { %v8555_v53 = vpop.eup %8554  ;;  %v1233_v43 = vshrl.u32 %v7240_v28, 16  ;;  %v1236_v1 = vshll.u32 %v7240_v28, 16  ;;  %v7242_v5 = vpack.c.bf16 %v972_v29, %v972_v29  ;;  %v1213_v0 = vor.u32 %v1211_v46, %v1210_v18 }
 0x33a   : > { %v8557_v2 = vpop.eup %8556  ;;  %v1214_v7 = vrot.slane %v1210_v18, 4  ;;  %v1227_v61 = vrot.slane %v1225_v17, 7  ;;  %v1242_v36 = vshrl.u32 %v7241_v19, 16  ;;  %v1221_v30 = vor.u32 %v1219_v16, %v1218_v57 }
 0x33b   : > { %v8559_v6 = vpop.eup %8558  ;;  %v1223_v13 = vrot.slane %v1218_v57, 4  ;;  %v1235_v58 = vrot.slane %v1233_v43, 7  ;;  %v1245_v12 = vshll.u32 %v7241_v19, 16  ;;  %v1530_v54 = vsel %vm9836_vm13, %v1213_v0, %v1529_v9  ;;  %v1547_v0 = vld [vmem:[#allocation2 + $0x2c] sm:$0x1] }
 0x33c   : > { %v8561_v39 = vpop.eup %8560  ;;  %v1230_v11 = vor.u32 %v1228_v8, %v1227_v61  ;;  %v1231_v24 = vrot.slane %v1227_v61, 4  ;;  %v1244_v44 = vrot.slane %v1242_v36, 7  ;;  %v1222_v45 = vsel %vm9813_vm12, %v1214_v7, %v1221_v30  ;;  %1531 = vst [vmem:[#allocation2 + $0xc] sm:$0xf] %v1530_v54  ;;  %v11705_v8 = vld [vmem:[#allocation15_spill] sm:$0xff] }
 0x33d   : > { %v1534_v46 = vsel %vm9078_vm4, %v1223_v13, %v1533_v31  ;;  %v1238_v14 = vor.u32 %v1236_v1, %v1235_v58  ;;  %v1240_v55 = vrot.slane %v1235_v58, 4  ;;  %1532 = vst.msk [vmem:[#allocation2 + $0x10] sm:$0xf] %vm999_vm7, %v1222_v45  ;;  %v1250_v28 = vshrl.u32 %v7242_v5, 16  ;;  %v11707_v31 = vld [vmem:[#allocation18_spill] sm:$0xff] }
 0x33e   : > { %1535 = vst [vmem:[#allocation2 + $0x14] sm:$0x1] %v1534_v46  ;;  %v1537_v40 = vsel %vm9836_vm13, %v1230_v11, %v1536_v52  ;;  %v1247_v16 = vor.u32 %v1245_v12, %v1244_v44  ;;  %v10015_v63 = vrot.slane %v3751_v25, 5  ;;  %v1248_v17 = vrot.slane %v1244_v44, 4  ;;  %v11706_v25 = vld [vmem:[#allocation16_spill] sm:$0xff] }
 0x33f   : > { %v1239_v29 = vsel %vm9813_vm12, %v1231_v24, %v1238_v14  ;;  %1538 = vst [vmem:[#allocation2 + $0x18] sm:$0xf] %v1537_v40  ;;  %v1541_v18 = vsel %vm9078_vm4, %v1240_v55, %v1540_v38  ;;  %v973_v19 = vmul.f32 %v8555_v53, %v11705_v8  ;;  %v1252_v57 = vrot.slane %v1250_v28, 7 }
 0x340   : > { %1539 = vst.msk [vmem:[#allocation2 + $0x1c] sm:$0xf] %vm999_vm7, %v1239_v29  ;;  %1542 = vst [vmem:[#allocation2 + $0x20] sm:$0x1] %v1541_v18  ;;  %v1253_v9 = vshll.u32 %v7242_v5, 16  ;;  %v1544_v43 = vsel %vm9836_vm13, %v1247_v16, %v1543_v42  ;;  %v974_v1 = vmul.f32 %v8557_v2, %v11706_v25  ;;  %v975_v61 = vmul.f32 %v8559_v6, %v11707_v31  ;;  %v11708_v2 = vld [vmem:[#allocation17_spill] sm:$0xff] }
 0x341   : > { %1545 = vst [vmem:[#allocation2 + $0x24] sm:$0xf] %v1544_v43  ;;  %v10026_v7 = vpack.c.bf16 %v973_v19, %v973_v19  ;;  %v3736_v53 = vsel %vm9463_vm10, %v9992_v32, %v9974_v60  ;;  %v10035_v36 = vrot.slane %v3743_v62, 5  ;;  %v1257_v30 = vrot.slane %v1252_v57, 4 }
 0x342   : > { %v1255_v5 = vor.u32 %v1253_v9, %v1252_v57  ;;  %v10037_v13 = vpack.c.bf16 %v974_v1, %v974_v1  ;;  %v976_v58 = vmul.f32 %v8561_v39, %v11708_v2  ;;  %v10043_v52 = vrot.slane %v3740_v50, 4 }
 0x343   : > { %v3754_v6 = vor.u32 %v10015_v63, %v10002_v35  ;;  %v10049_v12 = vrot.slane %v1869_v34, 4  ;;  %v10053_v21 = vrot.slane %v1872_v4, 5  ;;  %v1643_v62 = vld [vmem:[#allocation2 + $0xc] sm:$0xf]  ;;  %v1548_v27 = vsel %vm9078_vm4, %v1257_v30, %v1547_v0 }
 0x344   : > { %v3555_v54 = vld [vmem:[#allocation2 + $0xc] sm:$0xf]  ;;  %v1256_v39 = vsel %vm9813_vm12, %v1248_v17, %v1255_v5  ;;  %v1259_v50 = vshrl.u32 %v10026_v7, 16  ;;  %v1262_v11 = vshll.u32 %v10026_v7, 16  ;;  %v1644_v24 = vld [vmem:[#allocation2 + $0x10] sm:$0xf]  ;;  %v10062_v26 = vpack.c.bf16 %v975_v61, %v975_v61 }
 0x345   : > { %v1682_v38 = vld [vmem:[#allocation2 + $0x14] sm:$0x1]  ;;  %v1725_v34 = vshrl.u32 %v1643_v62, 16  ;;  %v1728_v44 = vshll.u32 %v1643_v62, 16  ;;  %1546 = vst.msk [vmem:[#allocation2 + $0x28] sm:$0xf] %vm999_vm7, %v1256_v39  ;;  %v1375_v4 = vsel %vm9813_vm12, %v1367_v41, %v9957_v56  ;;  %v10072_v42 = vpack.c.bf16 %v976_v58, %v976_v58 }
 0x346   : > { %1549 = vst [vmem:[#allocation2 + $0x2c] sm:$0x1] %v1548_v27  ;;  %v1734_v45 = vshll.u32 %v1644_v24, 16  ;;  %v1738_v46 = vshrl.u32 %v1644_v24, 16  ;;  %v10069_v14 = vld [vmem:[#allocation2 + $0x10] sm:$0xf] }
 0x347   : > { %v1267_v55 = vshrl.u32 %v10037_v13, 16  ;;  %1595 = vst.msk [vmem:[#allocation2 + $0x7c] sm:$0xf] %vm999_vm7, %v1375_v4  ;;  %v1727_v40 = vrot.slane %v1725_v34, 4  ;;  %v1730_v16 = vrot.slane %v1728_v44, 5  ;;  %v3604_v29 = vshrl.u32 %v3555_v54, 16 }
 0x348   : > { %v10075_v28 = vld [vmem:[#allocation2 + $0x14] sm:$0x1]  ;;  %v3607_v18 = vshll.u32 %v3555_v54, 16  ;;  %v1736_v49 = vrot.slane %v1734_v45, 5  ;;  %v1740_v17 = vrot.slane %v1738_v46, 4  ;;  %v1744_v8 = vshll.u32 %v1682_v38, 16 }
 0x349   : > { %v3613_v41 = vshll.u32 %v10069_v14, 16  ;;  %v1645_v56 = vld [vmem:[#allocation2 + $0x18] sm:$0xf]  ;;  %v1731_v19 = vor.u32 %v1730_v16, %v1727_v40  ;;  %v3606_v57 = vrot.slane %v3604_v29, 4  ;;  %v3617_v43 = vshrl.u32 %v10069_v14, 16 }
 0x34a   : > { %v3609_v9 = vrot.slane %v3607_v18, 5  ;;  %v1646_v25 = vld [vmem:[#allocation2 + $0x1c] sm:$0xf]  ;;  %v1741_v1 = vor.u32 %v1740_v17, %v1736_v49  ;;  %v3623_v31 = vshll.u32 %v10075_v28, 16  ;;  %v1749_v61 = vshrl.u32 %v1645_v56, 16 }
 0x34b   : > { %v3615_v0 = vrot.slane %v3613_v41, 5  ;;  %v1732_v5 = vrot.slane %v1731_v19, 4  ;;  %v3619_v2 = vrot.slane %v3617_v43, 4  ;;  %v1752_v58 = vshll.u32 %v1645_v56, 16  ;;  %v1683_v44 = vld [vmem:[#allocation2 + $0x20] sm:$0x1] }
 0x34c   : > { %v3610_v30 = vor.u32 %v3609_v9, %v3606_v57  ;;  %v1742_v62 = vrot.slane %v1741_v1, 4  ;;  %v1746_v54 = vrot.slane %v1744_v8, 5  ;;  %v1751_v39 = vrot.slane %v1749_v61, 4  ;;  %v3558_v45 = vld [vmem:[#allocation2 + $0x18] sm:$0xf] }
 0x34d   : > { %v1758_v27 = vshll.u32 %v1646_v25, 16  ;;  %v1737_v24 = vsel %vm9463_vm10, %v1732_v5, %v1736_v49  ;;  %v3620_v34 = vor.u32 %v3619_v2, %v3615_v0  ;;  %v1754_v4 = vrot.slane %v1752_v58, 5  ;;  %v10084_v18 = vld [vmem:[#allocation2 + $0x1c] sm:$0xf]  ;;  %v8369_v49 = vld [vmem:[#allocation8 + $0x8] sm:$0xff]  }
 0x34e   : > { %v3611_v38 = vrot.slane %v3610_v30, 4  ;;  %v1747_v46 = vsel %vm9463_vm10, %v1742_v62, %v1746_v54  ;;  %v3625_v40 = vrot.slane %v3623_v31, 5  ;;  %v1762_v29 = vshrl.u32 %v1646_v25, 16  ;;  %v10088_v9 = vld [vmem:[#allocation2 + $0x20] sm:$0x1]  ;;  %v8562_v2 = vld [vmem:[#allocation8] sm:$0xff]  }
 0x34f   : > { %v1760_v16 = vrot.slane %v1758_v27, 5  ;;  %v6827_v17 = vcombine.low %v1737_v24, %v1747_v46  ;;  %v3621_v41 = vrot.slane %v3620_v34, 4  ;;  %v1755_v56 = vor.u32 %v1754_v4, %v1751_v39  ;;  %v3561_v54 = vld [vmem:[#allocation2 + $0x24] sm:$0xf]  ;;  %v8372_v39 = vld [vmem:[#allocation8 + $0x10] sm:$0xff]  }
 0x350   : > { %v3616_v8 = vsel %vm9463_vm10, %v3611_v38, %v3615_v0  ;;  %v1764_v19 = vrot.slane %v1762_v29, 4  ;;  %v1768_v57 = vshll.u32 %v1683_v44, 16  ;;  %v3628_v43 = vshrl.u32 %v3558_v45, 16  ;;  %v10096_v34 = vld [vmem:[#allocation2 + $0x28] sm:$0xf] }
 0x351   : > { %v3631_v1 = vshll.u32 %v3558_v45, 16  ;;  %7642 = vmatmul.mubr.msk.bf16.vlgmr.msra.gmra.mrb[4].mxu1 %vm342_vm1, %v6827_v17  ;;  %v3626_v25 = vsel %vm9463_vm10, %v3621_v41, %v3625_v40  ;;  %v1756_v31 = vrot.slane %v1755_v56, 4  ;;  %v3637_v61 = vshll.u32 %v10084_v18, 16  ;;  %v10102_v29 = vld [vmem:[#allocation2 + $0x2c] sm:$0x1] }
 0x352   : > { %v3641_v5 = vshrl.u32 %v10084_v18, 16  ;;  %v6986_v0 = vcombine.low %v3616_v8, %v3626_v25  ;;  %v1765_v30 = vor.u32 %v1764_v19, %v1760_v16  ;;  %7674 = vmatpush3.bf16.msra.mxu1 %v8562_v2  ;;  %v3630_v58 = vrot.slane %v3628_v43, 4  ;;  %v1647_v17 = vld [vmem:[#allocation2 + $0x24] sm:$0xf]  ;;  %v1648_v43 = vld [vmem:[#allocation2 + $0x28] sm:$0xf] }
 0x353   : > { %v3633_v62 = vrot.slane %v3631_v1, 5  ;;  %v3639_v27 = vrot.slane %v3637_v61, 5  ;;  %v3647_v38 = vshll.u32 %v10088_v9, 16  ;;  %v1270_v44 = vshll.u32 %v10037_v13, 16  ;;  %7675 = vmatprep.subr.bf16.mxu1 %v8369_v49  ;;  %v8374_v2 = vld [vmem:[#allocation8 + $0x18] sm:$0xff]  }
 0x354   : > { %v3643_v24 = vrot.slane %v3641_v5, 4  ;;  %7801 = vmatprep.mubr.msk.bf16.mxu0 %vm342_vm1, %v6986_v0  ;;  %v1761_v4 = vsel %vm9463_vm10, %v1756_v31, %v1760_v16  ;;  %v1766_v45 = vrot.slane %v1765_v30, 4  ;;  %v1770_v46 = vrot.slane %v1768_v57, 5  ;;  %v1684_v30 = vld [vmem:[#allocation2 + $0x2c] sm:$0x1] }
 0x355   : > { %v3634_v40 = vor.u32 %v3633_v62, %v3630_v58  ;;  %v3649_v41 = vrot.slane %v3647_v38, 5  ;;  %v3652_v56 = vshrl.u32 %v3561_v54, 16  ;;  %v3655_v19 = vshll.u32 %v3561_v54, 16 }
 0x356   : > { %v3644_v8 = vor.u32 %v3643_v24, %v3639_v27  ;;  %v1771_v1 = vsel %vm9463_vm10, %v1766_v45, %v1770_v46  ;;  %v3661_v61 = vshll.u32 %v10096_v34, 16  ;;  %v3665_v5 = vshrl.u32 %v10096_v34, 16  ;;  %7676 = vmatpush3.bf16.msra.mxu1 %v8369_v49 }
 0x357   : > { %v3635_v25 = vrot.slane %v3634_v40, 4  ;;  %v6828_v16 = vcombine.low %v1761_v4, %v1771_v1  ;;  %v3654_v31 = vrot.slane %v3652_v56, 4  ;;  %v3657_v0 = vrot.slane %v3655_v19, 5  ;;  %7677 = vmatprep.subr.bf16.mxu1 %v8372_v39  ;;  %v8368_v19 = vld [vmem:[#allocation8 + $0xa8] sm:$0xff]  }
 0x358   : > { %v3645_v57 = vrot.slane %v3644_v8, 4  ;;  %v3663_v62 = vrot.slane %v3661_v61, 5  ;;  %v3667_v54 = vrot.slane %v3665_v5, 4  ;;  %v3671_v24 = vshll.u32 %v10102_v29, 16  ;;  %v8376_v5 = vld [vmem:[#allocation8 + $0x40] sm:$0xff]  }
 0x359   : > { %v3640_v58 = vsel %vm9463_vm10, %v3635_v25, %v3639_v27  ;;  %7645 = vmatprep.mubr.msk.bf16.mxu1 %vm342_vm1, %v6828_v16  ;;  %v3658_v49 = vor.u32 %v3657_v0, %v3654_v31  ;;  %v1773_v4 = vshrl.u32 %v1647_v17, 16  ;;  %v1776_v45 = vshll.u32 %v1647_v17, 16  ;;  %v8563_v31 = vld [vmem:[#allocation8 + $0xa0] sm:$0xff]  }
 0x35a   : > { %v3650_v38 = vsel %vm9463_vm10, %v3645_v57, %v3649_v41  ;;  %v3668_v40 = vor.u32 %v3667_v54, %v3663_v62  ;;  %v3673_v8 = vrot.slane %v3671_v24, 5  ;;  %v1782_v56 = vshll.u32 %v1648_v43, 16  ;;  %7678 = vmatpush3.bf16.msra.mxu1 %v8372_v39  ;;  %v1550_v57 = vld [vmem:[#allocation2 + $0x30] sm:$0xf]  ;;  %v1554_v54 = vld [vmem:[#allocation2 + $0x38] sm:$0x1] }
 0x35b   : > { %v6987_v46 = vcombine.low %v3640_v58, %v3650_v38  ;;  %v3659_v1 = vrot.slane %v3658_v49, 4  ;;  %v1775_v27 = vrot.slane %v1773_v4, 4  ;;  %v1778_v25 = vrot.slane %v1776_v45, 5  ;;  %7679 = vmatprep.subr.bf16.mxu1 %v8374_v2  ;;  %v8370_v38 = vld [vmem:[#allocation8 + $0xb0] sm:$0xff]   ;;  %v10125_v49 = vld [vmem:[#allocation2 + $0x58] sm:$0xf] }
 0x35c   : > { %v1786_v61 = vshrl.u32 %v1648_v43, 16  ;;  %v3669_v16 = vrot.slane %v3668_v40, 4  ;;  %v1784_v48 = vrot.slane %v1782_v56, 5  ;;  %v1792_v41 = vshll.u32 %v1684_v30, 16 }
 0x35d   : > { %7802 = vmatmul.mubr.msk.bf16.vlgmr.msra.gmra.mrb[4].mxu0 %vm342_vm1, %v6987_v46  ;;  %v1261_v17 = vrot.slane %v1259_v50, 7  ;;  %v3664_v39 = vsel %vm9463_vm10, %v3659_v1, %v3663_v62  ;;  %v1779_v0 = vor.u32 %v1778_v25, %v1775_v27  ;;  %v1269_v43 = vrot.slane %v1267_v55, 7  ;;  %v8371_v25 = vld [vmem:[#allocation8 + $0xb8] sm:$0xff]  }
 0x35e   : > { %7834 = vmatpush3.bf16.msra.mxu0 %v8563_v31  ;;  %v1788_v58 = vrot.slane %v1786_v61, 4  ;;  %v3674_v24 = vsel %vm9463_vm10, %v3669_v16, %v3673_v8  ;;  %v1875_v62 = vor.u32 %v10053_v21, %v10049_v12  ;;  %7680 = vmatpush3.bf16.msra.mxu1 %v8374_v2  ;;  %v1794_v40 = vrot.slane %v1792_v41, 5 }
 0x35f   : > { %7835 = vmatprep.subr.bf16.mxu0 %v8368_v19  ;;  %v1264_v30 = vor.u32 %v1262_v11, %v1261_v17  ;;  %v1265_v50 = vrot.slane %v1261_v17, 4  ;;  %v6988_v4 = vcombine.low %v3664_v39, %v3674_v24  ;;  %v1780_v45 = vrot.slane %v1779_v0, 4  ;;  %7713 = vmatprep.subr.bf16.mxu1 %v8376_v5  ;;  %v1557_v5 = vld [vmem:[#allocation2 + $0x3c] sm:$0xf]  ;;  %v1561_v39 = vld [vmem:[#allocation2 + $0x44] sm:$0x1] }
 0x360   : > { %v1789_v46 = vor.u32 %v1788_v58, %v1784_v48  ;;  %v1272_v55 = vor.u32 %v1270_v44, %v1269_v43  ;;  %v1274_v8 = vrot.slane %v1269_v43, 4  ;;  %v1276_v11 = vshrl.u32 %v10062_v26, 16  ;;  %v10140_v44 = vld [vmem:[#allocation2 + $0x5c] sm:$0x1] }
 0x361   : > { %v1551_v7 = vsel %vm9836_vm13, %v1264_v30, %v1550_v57  ;;  %7805 = vmatprep.mubr.msk.bf16.mxu0 %vm342_vm1, %v6988_v4  ;;  %v1785_v12 = vsel %vm9463_vm10, %v1780_v45, %v1784_v48  ;;  %v1284_v13 = vshrl.u32 %v10072_v42, 16  ;;  %v1279_v27 = vshll.u32 %v10062_v26, 16  ;;  %v10171_v45 = vld [vmem:[#allocation8 + $0xc0] sm:$0xff]  }
 0x362   : > { %v1790_v21 = vrot.slane %v1789_v46, 4  ;;  %v1273_v2 = vsel %vm9813_vm12, %v1265_v50, %v1272_v55  ;;  %1552 = vst [vmem:[#allocation2 + $0x30] sm:$0xf] %v1551_v7  ;;  %7836 = vmatpush3.bf16.msra.mxu0 %v8368_v19  ;;  %v1555_v56 = vsel %vm9078_vm4, %v1274_v8, %v1554_v54  ;;  %v1278_v1 = vrot.slane %v1276_v11, 7  ;;  %v10157_v54 = vld [vmem:[#allocation2 + $0x58] sm:$0xf] }
 0x363   : > { %1553 = vst.msk [vmem:[#allocation2 + $0x34] sm:$0xf] %vm999_vm7, %v1273_v2  ;;  %v1287_v48 = vshll.u32 %v10072_v42, 16  ;;  %7837 = vmatprep.subr.bf16.mxu0 %v8370_v38  ;;  %1556 = vst [vmem:[#allocation2 + $0x38] sm:$0x1] %v1555_v56  ;;  %v1286_v19 = vrot.slane %v1284_v13, 7  ;;  %v3746_v43 = vsel %vm9463_vm10, %v10043_v52, %v10035_v36 }
 0x364   : > { %v1795_v61 = vsel %vm9463_vm10, %v1790_v21, %v1794_v40  ;;  %v3757_v16 = vshll.u32 %v10125_v49, 16  ;;  %v3761_v41 = vshrl.u32 %v10125_v49, 16  ;;  %v1281_v57 = vor.u32 %v1279_v27, %v1278_v1 }
 0x365   : > { %v6829_v17 = vcombine.low %v1785_v12, %v1795_v61  ;;  %v1282_v31 = vrot.slane %v1278_v1, 4  ;;  %v3767_v26 = vshll.u32 %v10140_v44, 16  ;;  %v4381_v42 = vrot.slane %v10084_v18, 5 }
 0x366   : > { %v1289_v0 = vor.u32 %v1287_v48, %v1286_v19  ;;  %v1291_v58 = vrot.slane %v1286_v19, 4  ;;  %7838 = vmatpush3.bf16.msra.mxu0 %v8370_v38  ;;  %v1558_v24 = vsel %vm9836_vm13, %v1281_v57, %v1557_v5  ;;  %v10165_v30 = vrot.slane %v3754_v6, 4 }
 0x367   : > { %7646 = vmatmul.mubr.msk.bf16.gmra.mrb[8].mxu1 %vm342_vm1, %v6829_v17  ;;  %v10167_v50 = vrot.slane %v3757_v16, 5  ;;  %v10169_v4 = vrot.slane %v3761_v41, 4  ;;  %7839 = vmatprep.subr.bf16.mxu0 %v8371_v25  ;;  %v4384_v36 = vrot.slane %v10088_v9, 5  ;;  %1559 = vst [vmem:[#allocation2 + $0x3c] sm:$0xf] %v1558_v24  ;;  %v10178_v46 = vrot.slane %v3767_v26, 5 }
 0x368   : > { %v1290_v52 = vsel %vm9813_vm12, %v1282_v31, %v1289_v0  ;;  %v1562_v38 = vsel %vm9078_vm4, %v1291_v58, %v1561_v39  ;;  %v10181_v6 = vrot.slane %v1875_v62, 4  ;;  %v1878_v55 = vshll.u32 %v10157_v54, 16 }
 0x369   : > { %v1649_v35 = vld [vmem:[#allocation2 + $0x30] sm:$0xf]  ;;  %1560 = vst.msk [vmem:[#allocation2 + $0x40] sm:$0xf] %vm999_vm7, %v1290_v52  ;;  %1563 = vst [vmem:[#allocation2 + $0x44] sm:$0x1] %v1562_v38  ;;  %v10196_v12 = vcombine.low %v1857_v22, %v1867_v23  ;;  %v10203_v62 = vcombine.low %v3736_v53, %v3746_v43  ;;  %v3760_v51 = vsel %vm9463_vm10, %v10165_v30, %v10167_v50 }
 0x36a   : > { %v3564_v63 = vld [vmem:[#allocation2 + $0x30] sm:$0xf]  ;;  %v1650_v40 = vld [vmem:[#allocation2 + $0x34] sm:$0xf]  ;;  %v1797_v8 = vshrl.u32 %v1649_v35, 16  ;;  %v1800_v7 = vshll.u32 %v1649_v35, 16  ;;  %7840 = vmatpush3.bf16.msra.mxu0 %v8371_v25  ;;  %v3764_v15 = vor.u32 %v10169_v4, %v10167_v50 }
 0x36b   : > { %v10184_v11 = vld [vmem:[#allocation2 + $0x34] sm:$0xf]  ;;  %v1685_v21 = vld [vmem:[#allocation2 + $0x38] sm:$0x1]  ;;  %v1806_v2 = vshll.u32 %v1650_v40, 16  ;;  %v1810_v13 = vshrl.u32 %v1650_v40, 16  ;;  %7873 = vmatprep.subr.bf16.mxu0 %v10171_v45 }
 0x36c   : > { %v1799_v47 = vrot.slane %v1797_v8, 4  ;;  %v1802_v3 = vrot.slane %v1800_v7, 5  ;;  %v1816_v22 = vshll.u32 %v1685_v21, 16  ;;  %v10212_v60 = vld [vmem:[#allocation2 + $0x38] sm:$0x1]  ;;  %v3676_v23 = vshrl.u32 %v3564_v63, 16 }
 0x36d   : > { %v1808_v32 = vrot.slane %v1806_v2, 5  ;;  %v1812_v53 = vrot.slane %v1810_v13, 4  ;;  %v3679_v56 = vshll.u32 %v3564_v63, 16  ;;  %v3685_v1 = vshll.u32 %v10184_v11, 16 }
 0x36e   : > { %v1803_v27 = vor.u32 %v1802_v3, %v1799_v47  ;;  %v3678_v48 = vrot.slane %v3676_v23, 4  ;;  %v3689_v25 = vshrl.u32 %v10184_v11, 16  ;;  %v10216_v61 = vrot.slane %v1878_v55, 5  ;;  %v3567_v17 = vld [vmem:[#allocation2 + $0x3c] sm:$0xf] }
 0x36f   : > { %v1813_v19 = vor.u32 %v1812_v53, %v1808_v32  ;;  %v3681_v5 = vrot.slane %v3679_v56, 5  ;;  %v3687_v16 = vrot.slane %v3685_v1, 5  ;;  %v3695_v41 = vshll.u32 %v10212_v60, 16  ;;  %v10227_v8 = vld [vmem:[#allocation2 + $0x3c] sm:$0xf] }
 0x370   : > { %v1804_v57 = vrot.slane %v1803_v27, 4  ;;  %v1818_v31 = vrot.slane %v1816_v22, 5  ;;  %v3691_v39 = vrot.slane %v3689_v25, 4  ;;  %v10219_v26 = vld [vmem:[#allocation2 + $0x40] sm:$0xf]  ;;  %v1882_v0 = vshrl.u32 %v10157_v54, 16 }
 0x371   : > { %v1814_v58 = vrot.slane %v1813_v19, 4  ;;  %v3682_v43 = vor.u32 %v3681_v5, %v3678_v48  ;;  %v3697_v24 = vrot.slane %v3695_v41, 5  ;;  %v3700_v52 = vshrl.u32 %v3567_v17, 16  ;;  %v10224_v63 = vld [vmem:[#allocation2 + $0x44] sm:$0x1] }
 0x372   : > { %v1809_v38 = vsel %vm9463_vm10, %v1804_v57, %v1808_v32  ;;  %v3692_v35 = vor.u32 %v3691_v39, %v3687_v16  ;;  %v3703_v55 = vshll.u32 %v3567_v17, 16  ;;  %v3709_v40 = vshll.u32 %v10219_v26, 16  ;;  %v10232_v13 = vld [vmem:[#allocation2 + $0x40] sm:$0xf]  ;;  %v1686_v25 = vld [vmem:[#allocation2 + $0x44] sm:$0x1] }
 0x373   : > { %v1819_v7 = vsel %vm9463_vm10, %v1814_v58, %v1818_v31  ;;  %v3683_v21 = vrot.slane %v3682_v43, 4  ;;  %v3702_v54 = vrot.slane %v3700_v52, 4  ;;  %v3713_v2 = vshrl.u32 %v10219_v26, 16  ;;  %v1688_v31 = vld [vmem:[#allocation2 + $0x5c] sm:$0x1] }
 0x374   : > { %v6830_v47 = vcombine.low %v1809_v38, %v1819_v7  ;;  %v3693_v3 = vrot.slane %v3692_v35, 4  ;;  %v3705_v22 = vrot.slane %v3703_v55, 5  ;;  %v3711_v23 = vrot.slane %v3709_v40, 5 }
 0x375   : > { %v3688_v32 = vsel %vm9463_vm10, %v3683_v21, %v3687_v16  ;;  %v3715_v53 = vrot.slane %v3713_v2, 4  ;;  %v3719_v56 = vshll.u32 %v10224_v63, 16  ;;  %v1821_v1 = vshrl.u32 %v10227_v8, 16  ;;  %v10250_v2 = vld [vmem:[#allocation2 + $0x60] sm:$0xf] }
 0x376   : > { %7649 = vmatprep.mubr.msk.bf16.mxu1 %vm342_vm1, %v6830_v47  ;;  %v3698_v27 = vsel %vm9463_vm10, %v3693_v3, %v3697_v24  ;;  %v3706_v48 = vor.u32 %v3705_v22, %v3702_v54  ;;  %v1824_v19 = vshll.u32 %v10227_v8, 16  ;;  %v1830_v5 = vshll.u32 %v10232_v13, 16 }
 0x377   : > { %v6989_v41 = vcombine.low %v3688_v32, %v3698_v27  ;;  %v3716_v17 = vor.u32 %v3715_v53, %v3711_v23  ;;  %v3721_v57 = vrot.slane %v3719_v56, 5  ;;  %v1823_v16 = vrot.slane %v1821_v1, 4  ;;  %v1689_v56 = vld [vmem:[#allocation2 + $0x68] sm:$0x1] }
 0x378   : > { %v3707_v39 = vrot.slane %v3706_v48, 4  ;;  %v1826_v58 = vrot.slane %v1824_v19, 5  ;;  %v1832_v43 = vrot.slane %v1830_v5, 5  ;;  %v1834_v52 = vshrl.u32 %v10232_v13, 16 }
 0x379   : > { %7806 = vmatmul.mubr.msk.bf16.gmra.mrb[8].mxu0 %vm342_vm1, %v6989_v41  ;;  %v3717_v38 = vrot.slane %v3716_v17, 4  ;;  %v1840_v24 = vshll.u32 %v1686_v25, 16  ;;  %v3765_v35 = vrot.slane %v3764_v15, 4  ;;  %v1884_v55 = vrot.slane %v1882_v0, 4  ;;  %v10259_v15 = vld [vmem:[#allocation2 + $0x64] sm:$0xf] }
 0x37a   : > { %v3712_v40 = vsel %vm9463_vm10, %v3707_v39, %v3711_v23  ;;  %v1827_v7 = vor.u32 %v1826_v58, %v1823_v16  ;;  %v1836_v21 = vrot.slane %v1834_v52, 4  ;;  %v1888_v54 = vshll.u32 %v1688_v31, 16  ;;  %v3576_v41 = vld [vmem:[#allocation2 + $0x60] sm:$0xf]  ;;  %v10276_v31 = vld [vmem:[#allocation2 + $0x64] sm:$0xf] }
 0x37b   : > { %v3722_v47 = vsel %vm9463_vm10, %v3717_v38, %v3721_v57  ;;  %v1842_v3 = vrot.slane %v1840_v24, 5  ;;  %v1881_v22 = vsel %vm9463_vm10, %v10181_v6, %v10216_v61  ;;  %v1885_v4 = vor.u32 %v1884_v55, %v10216_v61  ;;  %v10282_v38 = vld [vmem:[#allocation2 + $0x68] sm:$0x1] }
 0x37c   : > { %v6990_v0 = vcombine.low %v3712_v40, %v3722_v47  ;;  %v1828_v23 = vrot.slane %v1827_v7, 4  ;;  %v1837_v32 = vor.u32 %v1836_v21, %v1832_v43  ;;  %v3770_v53 = vsel %vm9463_vm10, %v3765_v35, %v10178_v46 }
 0x37d   : > { %v1886_v1 = vrot.slane %v1885_v4, 4  ;;  %v1890_v27 = vrot.slane %v1888_v54, 5  ;;  %v1893_v48 = vshrl.u32 %v10250_v2, 16  ;;  %v1896_v25 = vshll.u32 %v10250_v2, 16 }
 0x37e   : > { %7809 = vmatprep.mubr.msk.bf16.mxu0 %vm342_vm1, %v6990_v0  ;;  %v1833_v6 = vsel %vm9463_vm10, %v1828_v23, %v1832_v43  ;;  %v1838_v61 = vrot.slane %v1837_v32, 4  ;;  %v1902_v19 = vshll.u32 %v10259_v15, 16  ;;  %v1906_v5 = vshrl.u32 %v10259_v15, 16 }
 0x37f   : > { %v6992_v46 = vcombine.low %v3760_v51, %v3770_v53  ;;  %v1895_v17 = vrot.slane %v1893_v48, 4  ;;  %v1898_v57 = vrot.slane %v1896_v25, 5  ;;  %v1912_v16 = vshll.u32 %v1689_v56, 16  ;;  %v1038_v48 = vld [vmem:[#allocation2 + $0x78] sm:$0x1] }
 0x380   : > { %v1843_v39 = vsel %vm9463_vm10, %v1838_v61, %v1842_v3  ;;  %v1891_v58 = vsel %vm9463_vm10, %v1886_v1, %v1890_v27  ;;  %v1904_v43 = vrot.slane %v1902_v19, 5  ;;  %v1908_v52 = vrot.slane %v1906_v5, 4  ;;  %v4308_v3 = vld [vmem:[#allocation2 + $0xc] sm:$0xe]  ;;  %v1690_v19 = vld [vmem:[#allocation2 + $0x74] sm:$0x1] }
 0x381   : > { %v6831_v24 = vcombine.low %v1833_v6, %v1843_v39  ;;  %7810 = vmatmul.mubr.msk.bf16.gmra.mrb[12].mxu0 %vm342_vm1, %v10203_v62  ;;  %v1899_v30 = vor.u32 %v1898_v57, %v1895_v17  ;;  %v1914_v50 = vrot.slane %v1912_v16, 5  ;;  %v3772_v51 = vshrl.u32 %v3576_v41, 16  ;;  %v10296_v27 = vld [vmem:[#allocation2 + $0x6c] sm:$0xf]  ;;  %v1088_v5 = vld [vmem:[#allocation2 + $0x80] sm:$0x1] }
 0x382   : > { %7813 = vmatprep.mubr.msk.bf16.mxu0 %vm342_vm1, %v6992_v46  ;;  %v1909_v35 = vor.u32 %v1908_v52, %v1904_v43  ;;  %v3775_v55 = vshll.u32 %v3576_v41, 16  ;;  %v3781_v40 = vshll.u32 %v10276_v31, 16  ;;  %v3785_v7 = vshrl.u32 %v10276_v31, 16  ;;  %v11711_v17 = vld [vmem:[#allocation24_spill] sm:$0xff]  ;;  %v10308_v16 = vld [vmem:[#allocation2 + $0x7c] sm:$0xf] }
 0x383   : > { %7650 = vmatmul.mubr.msk.bf16.gmra.mrb[12].mxu1 %vm342_vm1, %v6831_v24  ;;  %v1900_v21 = vrot.slane %v1899_v30, 4  ;;  %v3774_v54 = vrot.slane %v3772_v51, 4  ;;  %v3791_v47 = vshll.u32 %v10282_v38, 16  ;;  %v6833_v32 = vcombine.low %v1881_v22, %v1891_v58  ;;  %v4309_v24 = vld [vmem:[#allocation2 + $0x18] sm:$0xe] }
 0x384   : > { %7653 = vmatprep.mubr.msk.bf16.mxu1 %vm342_vm1, %v10196_v12  ;;  %v1910_v62 = vrot.slane %v1909_v35, 4  ;;  %v3777_v4 = vrot.slane %v3775_v55, 5  ;;  %v3783_v0 = vrot.slane %v3781_v40, 5  ;;  %v3787_v23 = vrot.slane %v3785_v7, 4  ;;  %v4310_v55 = vld [vmem:[#allocation2 + $0x24] sm:$0xe] }
 0x385   : > { %v1905_v53 = vsel %vm9463_vm10, %v1900_v21, %v1904_v43  ;;  %v3793_v56 = vrot.slane %v3791_v47, 5  ;;  %v4374_v1 = vrot.slane %v10069_v14, 5  ;;  %v7022_v12 = vrot.slane %v4308_v3, 9 }
 0x386   : > { %v1915_v25 = vsel %vm9463_vm10, %v1910_v62, %v1914_v50  ;;  %v3778_v6 = vor.u32 %v3777_v4, %v3774_v54  ;;  %v3788_v61 = vor.u32 %v3787_v23, %v3783_v0  ;;  %v4377_v14 = vrot.slane %v10075_v28, 5  ;;  %v11712_v50 = vld [vmem:[#allocation25_spill] sm:$0xff]  ;;  %v8375_v62 = vld [vmem:[#allocation8 + $0xc8] sm:$0xff]  }
 0x387   : > { %v6834_v41 = vcombine.low %v1905_v53, %v1915_v25  ;;  %v4376_v46 = vrot.slane %v4374_v1, 4  ;;  %v1350_v57 = vrot.slane %v11711_v17, 4  ;;  %v1917_v43 = vshrl.u32 %v10296_v27, 16 }
 0x388   : > { %v3779_v39 = vrot.slane %v3778_v6, 4  ;;  %v3789_v58 = vrot.slane %v3788_v61, 4  ;;  %v1920_v52 = vshll.u32 %v10296_v27, 16  ;;  %v1936_v35 = vshll.u32 %v1690_v19, 16  ;;  %v10340_v61 = vld [vmem:[#allocation2 + $0x84] sm:$0xf] }
 0x389   : > { %v4378_v30 = vsel %vm10302_vm0, %v4376_v46, %v4377_v14  ;;  %v1358_v51 = vsel %vm9813_vm12, %v1350_v57, %v11712_v50  ;;  %v1039_v28 = vsel %vm9078_vm4, 0, %v1038_v48  ;;  %v4375_v21 = vsel %vm10302_vm0, %v7022_v12, %v4374_v1  ;;  %v10334_v1 = vld [vmem:[#allocation2 + $0x88] sm:$0xf]  ;;  %v1692_v46 = vld [vmem:[#allocation2 + $0x8c] sm:$0x1] }
 0x38a   : > { %v3784_v40 = vsel %vm9463_vm10, %v3779_v39, %v3783_v0  ;;  %v3794_v7 = vsel %vm9463_vm10, %v3789_v58, %v3793_v56  ;;  %1588 = vst.msk [vmem:[#allocation2 + $0x70] sm:$0xf] %vm999_vm7, %v1358_v51  ;;  %v1919_v54 = vrot.slane %v1917_v43, 4  ;;  %1040 = vst [vmem:[#allocation2 + $0x78] sm:$0x1] %v1039_v28  ;;  %v7038_v47 = vcombine.low %v4375_v21, %v4378_v30 }
 0x38b   : > { %7654 = vmatmul.mubr.msk.bf16.gmra.mrb[16].mxu1 %vm342_vm1, %v6833_v32  ;;  %v6993_v20 = vcombine.low %v3784_v40, %v3794_v7  ;;  %v1922_v3 = vrot.slane %v1920_v52, 5  ;;  %v1089_v4 = vsel %vm9098_vm6, 0, %v1088_v5  ;;  %v1950_v0 = vshll.u32 %v10308_v16, 16  ;;  %v10367_v30 = vld [vmem:[#allocation2 + $0x94] sm:$0xf] }
 0x38c   : > { %7657 = vmatprep.mubr.msk.bf16.mxu1 %vm342_vm1, %v6834_v41  ;;  %1090 = vst [vmem:[#allocation2 + $0x80] sm:$0x1] %v1089_v4  ;;  %v1954_v23 = vshrl.u32 %v10308_v16, 16  ;;  %v7023_v53 = vrot.slane %v4309_v24, 9  ;;  %v4383_v56 = vrot.slane %v4381_v42, 4  ;;  %v10337_v48 = vrot.slane %v1936_v35, 5 }
 0x38d   : > { %7814 = vmatmul.mubr.msk.bf16.gmra.mrb[16].mxu0 %vm342_vm1, %v6993_v20  ;;  %v1923_v32 = vor.u32 %v1922_v3, %v1919_v54  ;;  %v7024_v25 = vrot.slane %v4310_v55, 9  ;;  %v4388_v6 = vrot.slane %v10096_v34, 5  ;;  %v10343_v12 = vrot.slane %v1950_v0, 5  ;;  %v11714_v35 = vld [vmem:[#allocation26_spill] sm:$0xff]  ;;  %v10376_v40 = vld [vmem:[#allocation2 + $0x90] sm:$0xf] }
 0x38e   : > { %7841 = vmatprep.mubr.msk.bf16.mxu0 %vm342_vm1, %v7038_v47  ;;  %v1956_v19 = vrot.slane %v1954_v23, 4  ;;  %v4382_v5 = vsel %vm10302_vm0, %v7023_v53, %v4381_v42  ;;  %v4385_v41 = vsel %vm10302_vm0, %v4383_v56, %v4384_v36  ;;  %v4391_v57 = vrot.slane %v10102_v29, 5  ;;  %v1693_v3 = vld [vmem:[#allocation2 + $0x98] sm:$0x1] }
 0x38f   : > { %v10353_v14 = vrot.slane %v1923_v32, 4  ;;  %v7039_v34 = vcombine.low %v4382_v5, %v4385_v41  ;;  %v4390_v17 = vrot.slane %v4388_v6, 4  ;;  %v1965_v58 = vshrl.u32 %v10340_v61, 16 }
 0x390   : > { %v1957_v39 = vor.u32 %v1956_v19, %v10343_v12  ;;  %v1968_v18 = vshll.u32 %v10340_v61, 16  ;;  %v1974_v42 = vshll.u32 %v10334_v1, 16  ;;  %v4389_v36 = vsel %vm10302_vm0, %v7024_v25, %v4388_v6  ;;  %v4311_v19 = vld [vmem:[#allocation2 + $0x30] sm:$0xe] }
 0x391   : > { %v10360_v43 = vld [vmem:[#allocation2 + $0x70] sm:$0xf]  ;;  %v1592_v9 = vld [vmem:[#allocation2 + $0x78] sm:$0xf]  ;;  %v4392_v52 = vsel %vm10302_vm0, %v4390_v17, %v4391_v57  ;;  %v1978_v24 = vshrl.u32 %v10334_v1, 16  ;;  %v1984_v29 = vshll.u32 %v1692_v46, 16 }
 0x392   : > { %v1926_v50 = vshll.u32 %v10360_v43, 16  ;;  %v1930_v51 = vshrl.u32 %v10360_v43, 16  ;;  %v1593_v28 = vsel %vm9836_vm13, %v11714_v35, %v1592_v9  ;;  %v10374_v55 = vrot.slane %v1957_v39, 4  ;;  %v8377_v46 = vld [vmem:[#allocation8 + $0xd0] sm:$0xff]  }
 0x393   : > { %1594 = vst [vmem:[#allocation2 + $0x78] sm:$0xf] %v1593_v28  ;;  %v1596_v7 = vld [vmem:[#allocation2 + $0x80] sm:$0x1]  ;;  %v7040_v21 = vcombine.low %v4389_v36, %v4392_v52  ;;  %v1967_v54 = vrot.slane %v1965_v58, 4  ;;  %v1970_v20 = vrot.slane %v1968_v18, 5 }
 0x394   : > { %v1976_v47 = vrot.slane %v1974_v42, 5  ;;  %v1928_v4 = vrot.slane %v1926_v50, 5  ;;  %v1932_v0 = vrot.slane %v1930_v51, 4  ;;  %v11715_v23 = vrot.slane %v9929_v33, 4  ;;  %v8379_v28 = vld [vmem:[#allocation8 + $0xd8] sm:$0xff]  }
 0x395   : > { %v1980_v53 = vrot.slane %v1978_v24, 4  ;;  %7842 = vmatmul.mubr.msk.bf16.vlgmr.msra.gmra.mrb[4].mxu0 %vm342_vm1, %v7039_v34  ;;  %v1971_v56 = vor.u32 %v1970_v20, %v1967_v54  ;;  %v1986_v32 = vrot.slane %v1984_v29, 5  ;;  %v1989_v25 = vshrl.u32 %v10376_v40, 16 }
 0x396   : > { %v1597_v59 = vsel %vm9078_vm4, %v11715_v23, %v1596_v7  ;;  %v1992_v6 = vshll.u32 %v10376_v40, 16  ;;  %v1929_v5 = vsel %vm9463_vm10, %v10353_v14, %v1928_v4  ;;  %v1933_v41 = vor.u32 %v1932_v0, %v1928_v4  ;;  %7874 = vmatpush3.bf16.msra.mxu0 %v10171_v45  ;;  %7845 = vmatprep.mubr.msk.bf16.mxu0 %vm342_vm1, %v7040_v21 }
 0x397   : > { %1598 = vst [vmem:[#allocation2 + $0x80] sm:$0x1] %v1597_v59  ;;  %v1981_v37 = vor.u32 %v1980_v53, %v1976_v47  ;;  %v1998_v33 = vshll.u32 %v10367_v30, 16  ;;  %v1972_v34 = vrot.slane %v1971_v56, 4  ;;  %v1991_v17 = vrot.slane %v1989_v25, 4  ;;  %7875 = vmatprep.subr.bf16.mxu0 %v8375_v62 }
 0x398   : > { %v1994_v57 = vrot.slane %v1992_v6, 5  ;;  %v2002_v39 = vshrl.u32 %v10367_v30, 16  ;;  %v1934_v58 = vrot.slane %v1933_v41, 4  ;;  %v2008_v9 = vshll.u32 %v1693_v3, 16 }
 0x399   : > { %v1982_v18 = vrot.slane %v1981_v37, 4  ;;  %v2000_v42 = vrot.slane %v1998_v33, 5  ;;  %v1977_v14 = vsel %vm9463_vm10, %v1972_v34, %v1976_v47  ;;  %v7025_v52 = vrot.slane %v4311_v19, 9  ;;  %v4312_v47 = vld [vmem:[#allocation2 + $0x3c] sm:$0xe] }
 0x39a   : > { %v1995_v45 = vor.u32 %v1994_v57, %v1991_v17  ;;  %v2004_v36 = vrot.slane %v2002_v39, 4  ;;  %v1939_v24 = vsel %vm9463_vm10, %v1934_v58, %v10337_v48  ;;  %v10397_v29 = vld [vmem:[#allocation2 + $0x78] sm:$0xf]  ;;  %v2010_v51 = vrot.slane %v2008_v9, 5  ;;  %7876 = vmatpush3.bf16.msra.mxu0 %v8375_v62  ;;  %v10416_v19 = vld [vmem:[#allocation2 + $0x9c] sm:$0xf] }
 0x39b   : > { %v1987_v50 = vsel %vm9463_vm10, %v1982_v18, %v1986_v32  ;;  %v4395_v35 = vrot.slane %v10184_v11, 5  ;;  %v6835_v7 = vcombine.low %v1929_v5, %v1939_v24  ;;  %v1941_v21 = vshrl.u32 %v10397_v29, 16  ;;  %7877 = vmatprep.subr.bf16.mxu0 %v8377_v46  ;;  %v10421_v34 = vld [vmem:[#allocation2 + $0xa0] sm:$0xf]  ;;  %v10429_v58 = vld [vmem:[#allocation2 + $0xac] sm:$0xf] }
 0x39c   : > { %v1944_v54 = vshll.u32 %v10397_v29, 16  ;;  %v10404_v20 = vcombine.low %v1977_v14, %v1987_v50  ;;  %v1996_v3 = vrot.slane %v1995_v45, 4  ;;  %v2005_v4 = vor.u32 %v2004_v36, %v2000_v42  ;;  %v10431_v18 = vld [vmem:[#allocation8 + $0xe0] sm:$0xff]   ;;  %v1695_v45 = vld [vmem:[#allocation2 + $0xb0] sm:$0x1] }
 0x39d   : > { %v4396_v0 = vsel %vm10302_vm0, %v7025_v52, %v4395_v35  ;;  %v4397_v23 = vrot.slane %v4395_v35, 4  ;;  %7658 = vmatmul.mubr.msk.bf16.gmra.mrb[20].mxu1 %vm342_vm1, %v6835_v7  ;;  %v1943_v11 = vrot.slane %v1941_v21, 4  ;;  %v4398_v53 = vrot.slane %v10212_v60, 5  ;;  %v1694_v60 = vld [vmem:[#allocation2 + $0xa4] sm:$0x1] }
 0x39e   : > { %v10406_v48 = vld [vmem:[#allocation2 + $0x80] sm:$0x1]  ;;  %v1946_v62 = vrot.slane %v1944_v54, 5  ;;  %v2001_v56 = vsel %vm9463_vm10, %v1996_v3, %v2000_v42  ;;  %v2006_v32 = vrot.slane %v2005_v4, 4  ;;  %v7026_v25 = vrot.slane %v4312_v47, 9  ;;  %7878 = vmatpush3.bf16.msra.mxu0 %v8377_v46 }
 0x39f   : > { %v1960_v59 = vshll.u32 %v10406_v48, 16  ;;  %v4402_v6 = vrot.slane %v10219_v26, 5  ;;  %v4399_v37 = vsel %vm10302_vm0, %v4397_v23, %v4398_v53  ;;  %v4405_v33 = vrot.slane %v10224_v63, 5  ;;  %7879 = vmatprep.subr.bf16.mxu0 %v8379_v28  ;;  %v10427_v46 = vld [vmem:[#allocation2 + $0xa8] sm:$0xf] }
 0x3a0   : > { %v1947_v5 = vor.u32 %v1946_v62, %v1943_v11  ;;  %v2011_v17 = vsel %vm9463_vm10, %v2006_v32, %v2010_v51  ;;  %v7041_v57 = vcombine.low %v4396_v0, %v4399_v37  ;;  %v2013_v14 = vshrl.u32 %v10416_v19, 16  ;;  %v4313_v21 = vld [vmem:[#allocation2 + $0x48] sm:$0xe] }
 0x3a1   : > { %v1962_v41 = vrot.slane %v1960_v59, 5  ;;  %v4403_v26 = vsel %vm10302_vm0, %v7026_v25, %v4402_v6  ;;  %v4404_v39 = vrot.slane %v4402_v6, 4  ;;  %v6838_v9 = vcombine.low %v2001_v56, %v2011_v17  ;;  %v4314_v56 = vld [vmem:[#allocation2 + $0x54] sm:$0xe] }
 0x3a2   : > { %v1948_v42 = vrot.slane %v1947_v5, 4  ;;  %7846 = vmatmul.mubr.msk.bf16.gmra.mrb[8].mxu0 %vm342_vm1, %v7041_v57  ;;  %v2016_v52 = vshll.u32 %v10416_v19, 16  ;;  %v2022_v24 = vshll.u32 %v10421_v34, 16  ;;  %v2026_v50 = vshrl.u32 %v10421_v34, 16  ;;  %v10456_v17 = vld [vmem:[#allocation2 + $0xb4] sm:$0xf] }
 0x3a3   : > { %v1963_v63 = vsel %vm9463_vm10, %v10374_v55, %v1962_v41  ;;  %v4406_v36 = vsel %vm10302_vm0, %v4404_v39, %v4405_v33  ;;  %v2015_v35 = vrot.slane %v2013_v14, 4  ;;  %v2032_v7 = vshll.u32 %v1694_v60, 16  ;;  %7880 = vmatpush3.bf16.msra.mxu0 %v8379_v28 }
 0x3a4   : > { %v1953_v51 = vsel %vm9463_vm10, %v1948_v42, %v10343_v12  ;;  %v7042_v55 = vcombine.low %v4403_v26, %v4406_v36  ;;  %v2018_v47 = vrot.slane %v2016_v52, 5  ;;  %v2024_v3 = vrot.slane %v2022_v24, 5  ;;  %7913 = vmatprep.subr.bf16.mxu0 %v10431_v18  ;;  %v8564_v26 = vld [vmem:[#allocation2 + $0x4c] sm:$0xf]  ;;  %v8565_v42 = vld [vmem:[#allocation2 + $0x50] sm:$0x1] }
 0x3a5   : > { %v6836_v54 = vcombine.low %v1953_v51, %v1963_v63  ;;  %v2028_v4 = vrot.slane %v2026_v50, 4  ;;  %v2034_v0 = vrot.slane %v2032_v7, 5  ;;  %v2037_v23 = vshrl.u32 %v10427_v46, 16 }
 0x3a6   : > { %7849 = vmatprep.mubr.msk.bf16.mxu0 %vm342_vm1, %v7042_v55  ;;  %v2040_v11 = vshll.u32 %v10427_v46, 16  ;;  %v2046_v12 = vshll.u32 %v10429_v58, 16  ;;  %v2019_v62 = vor.u32 %v2018_v47, %v2015_v35  ;;  %v2050_v28 = vshrl.u32 %v10429_v58, 16  ;;  %v1696_v35 = vld [vmem:[#allocation2 + $0xbc] sm:$0x1] }
 0x3a7   : > { %7661 = vmatprep.mubr.msk.bf16.mxu1 %vm342_vm1, %v6836_v54  ;;  %v2029_v59 = vor.u32 %v2028_v4, %v2024_v3  ;;  %v2056_v53 = vshll.u32 %v1695_v45, 16  ;;  %v2039_v32 = vrot.slane %v2037_v23, 4  ;;  %v7027_v5 = vrot.slane %v4313_v21, 9  ;;  %v10458_v45 = vld [vmem:[#allocation2 + $0xb8] sm:$0xf] }
 0x3a8   : > { %7662 = vmatmul.mubr.msk.bf16.gmra.mrb[24].mxu1 %vm342_vm1, %v10404_v20  ;;  %v2042_v25 = vrot.slane %v2040_v11, 5  ;;  %v2048_v6 = vrot.slane %v2046_v12, 5  ;;  %v2020_v41 = vrot.slane %v2019_v62, 4  ;;  %v2052_v33 = vrot.slane %v2050_v28, 4 }
 0x3a9   : > { %7665 = vmatprep.mubr.msk.bf16.mxu1 %vm342_vm1, %v6838_v9  ;;  %v2030_v37 = vrot.slane %v2029_v59, 4  ;;  %v2058_v60 = vrot.slane %v2056_v53, 5  ;;  %v4409_v39 = vrot.slane %v8564_v26, 5  ;;  %v4412_v63 = vrot.slane %v8565_v42, 5  ;;  %v4316_v59 = vld [vmem:[#allocation2 + $0x6c] sm:$0xe] }
 0x3aa   : > { %v2043_v57 = vor.u32 %v2042_v25, %v2039_v32  ;;  %v7028_v14 = vrot.slane %v4314_v56, 9  ;;  %v2025_v20 = vsel %vm9463_vm10, %v2020_v41, %v2024_v3  ;;  %v2053_v36 = vor.u32 %v2052_v33, %v2048_v6  ;;  %v4315_v3 = vld [vmem:[#allocation2 + $0x60] sm:$0xe]  ;;  %v3580_v25 = vld [vmem:[#allocation2 + $0x70] sm:$0xf] }
 0x3ab   : > { %v2035_v9 = vsel %vm9463_vm10, %v2030_v37, %v2034_v0  ;;  %v4416_v52 = vrot.slane %v10125_v49, 5  ;;  %v4410_v51 = vsel %vm10302_vm0, %v7027_v5, %v4409_v39  ;;  %v4411_v55 = vrot.slane %v4409_v39, 4 }
 0x3ac   : > { %v6839_v24 = vcombine.low %v2025_v20, %v2035_v9  ;;  %v2044_v50 = vrot.slane %v2043_v57, 4  ;;  %v2054_v7 = vrot.slane %v2053_v36, 4  ;;  %v4419_v47 = vrot.slane %v10140_v44, 5  ;;  %v3581_v57 = vld [vmem:[#allocation2 + $0x74] sm:$0x1] }
 0x3ad   : > { %v4417_v21 = vsel %vm10302_vm0, %v7028_v14, %v4416_v52  ;;  %v4418_v54 = vrot.slane %v4416_v52, 4  ;;  %v4413_v49 = vsel %vm10302_vm0, %v4411_v55, %v4412_v63  ;;  %v2061_v0 = vshrl.u32 %v10456_v17, 16  ;;  %v10487_v63 = vld [vmem:[#allocation2 + $0x7c] sm:$0xf]  ;;  %v4317_v36 = vld [vmem:[#allocation2 + $0x78] sm:$0xe] }
 0x3ae   : > { %v2049_v4 = vsel %vm9463_vm10, %v2044_v50, %v2048_v6  ;;  %v2064_v23 = vshll.u32 %v10456_v17, 16  ;;  %v2059_v11 = vsel %vm9463_vm10, %v2054_v7, %v2058_v60  ;;  %v7043_v12 = vcombine.low %v4410_v51, %v4413_v49  ;;  %v3586_v51 = vld [vmem:[#allocation2 + $0x88] sm:$0xf] }
 0x3af   : > { %v4420_v62 = vsel %vm10302_vm0, %v4418_v54, %v4419_v47  ;;  %v2070_v44 = vshll.u32 %v10458_v45, 16  ;;  %v6840_v28 = vcombine.low %v2049_v4, %v2059_v11  ;;  %v2063_v56 = vrot.slane %v2061_v0, 4  ;;  %v3587_v4 = vld [vmem:[#allocation2 + $0x8c] sm:$0x1] }
 0x3b0   : > { %7666 = vmatmul.mubr.msk.bf16.gmra.mrb[28].mxu1 %vm342_vm1, %v6839_v24  ;;  %v7044_v53 = vcombine.low %v4417_v21, %v4420_v62  ;;  %v2066_v32 = vrot.slane %v2064_v23, 5  ;;  %7850 = vmatmul.mubr.msk.bf16.gmra.mrb[12].mxu0 %vm342_vm1, %v7043_v12  ;;  %v2074_v5 = vshrl.u32 %v10458_v45, 16  ;;  %v2080_v41 = vshll.u32 %v1696_v35, 16  ;;  %v4318_v23 = vld [vmem:[#allocation2 + $0x84] sm:$0xe] }
 0x3b1   : > { %v2072_v6 = vrot.slane %v2070_v44, 5  ;;  %7669 = vmatprep.mubr.msk.bf16.mxu1 %vm342_vm1, %v6840_v28  ;;  %v7029_v33 = vrot.slane %v4315_v3, 9  ;;  %v4423_v60 = vrot.slane %v10276_v31, 5  ;;  %v7030_v26 = vrot.slane %v4316_v59, 9  ;;  %v10500_v3 = vld [vmem:[#allocation2 + $0x80] sm:$0x1] }
 0x3b2   : > { %7853 = vmatprep.mubr.msk.bf16.mxu0 %vm342_vm1, %v7044_v53  ;;  %v2067_v37 = vor.u32 %v2066_v32, %v2063_v56  ;;  %v2076_v39 = vrot.slane %v2074_v5, 4  ;;  %v4430_v42 = vrot.slane %v3580_v25, 5  ;;  %v4426_v9 = vrot.slane %v10282_v38, 5  ;;  %v8566_v12 = vld [vmem:[#allocation2] sm:$0xf] }
 0x3b3   : > { %v4425_v20 = vrot.slane %v4423_v60, 4  ;;  %v4433_v50 = vrot.slane %v3581_v57, 5  ;;  %v2082_v55 = vrot.slane %v2080_v41, 5  ;;  %v4424_v35 = vsel %vm10302_vm0, %v7029_v33, %v4423_v60  ;;  %v10506_v62 = vld [vmem:[#allocation2 + $0x4] sm:$0xf] }
 0x3b4   : > { %v2068_v14 = vrot.slane %v2067_v37, 4  ;;  %v2077_v52 = vor.u32 %v2076_v39, %v2072_v6  ;;  %v4432_v24 = vrot.slane %v4430_v42, 4  ;;  %v4431_v7 = vsel %vm10302_vm0, %v7030_v26, %v4430_v42  ;;  %v3589_v28 = vld [vmem:[#allocation2 + $0x94] sm:$0xf]  ;;  %v3592_v5 = vld [vmem:[#allocation2 + $0xa0] sm:$0xf] }
 0x3b5   : > { %v4427_v31 = vsel %vm10302_vm0, %v4425_v20, %v4426_v9  ;;  %v4437_v0 = vrot.slane %v10487_v63, 5  ;;  %v6862_v44 = vcombine.low %v8566_v12, %v10506_v62  ;;  %v7031_v59 = vrot.slane %v4317_v36, 9  ;;  %v3590_v20 = vld [vmem:[#allocation2 + $0x98] sm:$0x1]  ;;  %v4319_v9 = vld [vmem:[#allocation2 + $0x90] sm:$0xe] }
 0x3b6   : > { %v2073_v21 = vsel %vm9463_vm10, %v2068_v14, %v2072_v6  ;;  %v2078_v54 = vrot.slane %v2077_v52, 4  ;;  %v7045_v38 = vcombine.low %v4424_v35, %v4427_v31  ;;  %v4434_v47 = vsel %vm10302_vm0, %v4432_v24, %v4433_v50  ;;  %v3593_v24 = vld [vmem:[#allocation2 + $0xa4] sm:$0x1]  ;;  %v4320_v50 = vld [vmem:[#allocation2 + $0x9c] sm:$0xe] }
 0x3b7   : > { %v7046_v49 = vcombine.low %v4431_v7, %v4434_v47  ;;  %v4439_v56 = vrot.slane %v4437_v0, 4  ;;  %v4440_v32 = vrot.slane %v10500_v3, 5  ;;  %v4444_v25 = vrot.slane %v3586_v51, 5  ;;  %v8568_v35 = vld [vmem:[#allocation2 + $0xc] sm:$0xf] }
 0x3b8   : > { %v2083_v11 = vsel %vm9463_vm10, %v2078_v54, %v2082_v55  ;;  %7854 = vmatmul.mubr.msk.bf16.gmra.mrb[16].mxu0 %vm342_vm1, %v7045_v38  ;;  %v7032_v6 = vrot.slane %v4318_v23, 9  ;;  %v4447_v33 = vrot.slane %v3587_v4, 5  ;;  %v4451_v60 = vrot.slane %v3589_v28, 5  ;;  %v3595_v55 = vld [vmem:[#allocation2 + $0xac] sm:$0xf]  ;;  %v8378_v38 = vld [vmem:[#allocation8 + $0x48] sm:$0xff]  }
 0x3b9   : > { %v6841_v53 = vcombine.low %v2073_v21, %v2083_v11  ;;  %7857 = vmatprep.mubr.msk.bf16.mxu0 %vm342_vm1, %v7046_v49  ;;  %v4441_v41 = vsel %vm10302_vm0, %v4439_v56, %v4440_v32  ;;  %v4446_v37 = vrot.slane %v4444_v25, 4  ;;  %v4438_v57 = vsel %vm10302_vm0, %v7031_v59, %v4437_v0  ;;  %v10522_v31 = vld [vmem:[#allocation2 + $0x10] sm:$0xf]  ;;  %v3598_v47 = vld [vmem:[#allocation2 + $0xb8] sm:$0xf]  ;;  %v8381_v32 = vld [vmem:[#allocation8 + $0x50] sm:$0xff]  }
 0x3ba   : > { %v4458_v39 = vrot.slane %v3592_v5, 5  ;;  %v7047_v42 = vcombine.low %v4438_v57, %v4441_v41  ;;  %v4445_v14 = vsel %vm10302_vm0, %v7032_v6, %v4444_v25  ;;  %v4453_v52 = vrot.slane %v4451_v60, 4  ;;  %v8570_v4 = vld [vmem:[#allocation2 + $0x18] sm:$0xf]  ;;  %v10526_v49 = vld [vmem:[#allocation2 + $0x1c] sm:$0xf] }
 0x3bb   : > { %7670 = vmatmul.mubr.msk.bf16.gmra.mrb[32].mxu1 %vm342_vm1, %v6841_v53  ;;  %v4448_v26 = vsel %vm10302_vm0, %v4446_v37, %v4447_v33  ;;  %v6863_v7 = vcombine.low %v8568_v35, %v10522_v31  ;;  %v7033_v21 = vrot.slane %v4319_v9, 9  ;;  %v4454_v54 = vrot.slane %v3590_v20, 5  ;;  %v8572_v59 = vld [vmem:[#allocation8 + $0x40] sm:$0xff]   ;;  %v3596_v5 = vld [vmem:[#allocation2 + $0xb0] sm:$0x1] }
 0x3bc   : > { %7681 = vmatprep.mubr.msk.bf16.mxu1 %vm342_vm1, %v6862_v44  ;;  %v7048_v36 = vcombine.low %v4445_v14, %v4448_v26  ;;  %v4460_v51 = vrot.slane %v4458_v39, 4  ;;  %v6864_v0 = vcombine.low %v8570_v4, %v10526_v49  ;;  %v7034_v23 = vrot.slane %v4320_v50, 9  ;;  %v4321_v41 = vld [vmem:[#allocation2 + $0xa8] sm:$0xe]  ;;  %v3599_v57 = vld [vmem:[#allocation2 + $0xbc] sm:$0x1] }
 0x3bd   : > { %v4461_v11 = vrot.slane %v3593_v24, 5  ;;  %v4455_v12 = vsel %vm10302_vm0, %v4453_v52, %v4454_v54  ;;  %v4465_v44 = vrot.slane %v3595_v55, 5  ;;  %v4472_v53 = vrot.slane %v3598_v47, 5  ;;  %v4322_v26 = vld [vmem:[#allocation2 + $0xb4] sm:$0xe]  ;;  %v10555_v47 = vld [vmem:[#allocation8 + $0x60] sm:$0xff]  }
 0x3be   : > { %v4452_v56 = vsel %vm10302_vm0, %v7033_v21, %v4451_v60  ;;  %v4459_v6 = vsel %vm10302_vm0, %v7034_v23, %v4458_v39  ;;  %v3601_v14 = vld [vmem:[#allocation2 + $0xc4] sm:$0xf]  ;;  %v10540_v9 = vld [vmem:[#allocation2 + $0x28] sm:$0xf]  ;;  %v4468_v39 = vrot.slane %v3596_v5, 5  ;;  %v8391_v52 = vld [vmem:[#allocation8 + $0x58] sm:$0xff]  }
 0x3bf   : > { %v4462_v28 = vsel %vm10302_vm0, %v4460_v51, %v4461_v11  ;;  %v7049_v25 = vcombine.low %v4452_v56, %v4455_v12  ;;  %v4467_v33 = vrot.slane %v4465_v44, 4  ;;  %v8573_v20 = vld [vmem:[#allocation2 + $0x24] sm:$0xf]  ;;  %v8575_v24 = vld [vmem:[#allocation2 + $0x30] sm:$0xf]  ;;  %v7036_v55 = vrot.slane %v4322_v26, 9 }
 0x3c0   : > { %7858 = vmatmul.mubr.msk.bf16.gmra.mrb[20].mxu0 %vm342_vm1, %v7047_v42  ;;  %v7050_v37 = vcombine.low %v4459_v6, %v4462_v28  ;;  %v4474_v42 = vrot.slane %v4472_v53, 4  ;;  %v6865_v60 = vcombine.low %v8573_v20, %v10540_v9  ;;  %v10544_v50 = vld [vmem:[#allocation2 + $0x34] sm:$0xf]  ;;  %v4475_v35 = vrot.slane %v3599_v57, 5  ;;  %v3602_v23 = vld [vmem:[#allocation2 + $0xc8] sm:$0x1] }
 0x3c1   : > { %7861 = vmatprep.mubr.msk.bf16.mxu0 %vm342_vm1, %v7048_v36  ;;  %v7035_v36 = vrot.slane %v4321_v41, 9  ;;  %v6866_v51 = vcombine.low %v8575_v24, %v10544_v50  ;;  %v4479_v21 = vrot.slane %v3601_v14, 5  ;;  %v4323_v11 = vld [vmem:[#allocation2 + $0xc0] sm:$0xe]  ;;  %v6867_v28 = vcombine.low %v10227_v8, %v10232_v13  ;;  %v10575_v57 = vld [vmem:[#allocation2 + $0x58] sm:$0xf] }
 0x3c2   : > { %v4476_v54 = vsel %vm10302_vm0, %v4474_v42, %v4475_v35  ;;  %v4482_v56 = vrot.slane %v3602_v23, 5  ;;  %v3829_v8 = vshll.u32 %v10487_v63, 16  ;;  %v3833_v13 = vshrl.u32 %v10487_v63, 16  ;;  %v2686_v42 = vld [vmem:[#allocation2] sm:$0xe] }
 0x3c3   : > { %7682 = vmatmul.mubr.msk.bf16.vlgmr.msra.gmra.mrb[4].mxu1 %vm342_vm1, %v6863_v7  ;;  %v4469_v7 = vsel %vm10302_vm0, %v4467_v33, %v4468_v39  ;;  %v8579_v33 = vld [vmem:[#allocation2 + $0x54] sm:$0xf]  ;;  %v2739_v14 = vrot.slane %v10506_v62, 5  ;;  %v2746_v20 = vrot.slane %v10522_v31, 5  ;;  %v2753_v39 = vrot.slane %v10526_v49, 5 }
 0x3c4   : > { %7685 = vmatprep.mubr.msk.bf16.mxu1 %vm342_vm1, %v6864_v0  ;;  %7714 = vmatpush3.bf16.msra.mxu1 %v8572_v59  ;;  %v4473_v0 = vsel %vm10302_vm0, %v7036_v55, %v4472_v53  ;;  %v4481_v59 = vrot.slane %v4479_v21, 4  ;;  %v6869_v26 = vcombine.low %v8579_v33, %v10575_v57  ;;  %v3835_v63 = vrot.slane %v3833_v13, 4  ;;  %v8581_v31 = vld [vmem:[#allocation2 + $0x8] sm:$0x1]  ;;  %v5191_v33 = vld [vmem:[#allocation2 + $0x18] sm:$0xf] }
 0x3c5   : > { %7715 = vmatprep.subr.bf16.mxu1 %v8378_v38  ;;  %v7052_v12 = vcombine.low %v4473_v0, %v4476_v54  ;;  %v6898_v24 = vrot.slane %v2686_v42, 9  ;;  %v2741_v62 = vrot.slane %v2739_v14, 4  ;;  %v2742_v55 = vrot.slane %v8581_v31, 5  ;;  %v8384_v0 = vld [vmem:[#allocation2 + $0x24] sm:$0xff]  }
 0x3c6   : > { %v4483_v6 = vsel %vm10302_vm0, %v4481_v59, %v4482_v56  ;;  %v2748_v35 = vrot.slane %v2746_v20, 4  ;;  %v6873_v23 = vcombine.low %v10340_v61, %v10334_v1  ;;  %v6874_v59 = vcombine.low %v10376_v40, %v10367_v30  ;;  %v8583_v56 = vld [vmem:[#allocation2 + $0x20] sm:$0x1]  ;;  %v8394_v40 = vld [vmem:[#allocation2 + $0x54] sm:$0xff]  }
 0x3c7   : > { %v2802_v30 = vrot.slane %v10360_v43, 5 }
 0x3c8   : > { %7862 = vmatmul.mubr.msk.bf16.gmra.mrb[24].mxu0 %vm342_vm1, %v7049_v25  ;;  %7716 = vmatpush3.bf16.msra.mxu1 %v8378_v38  ;;  %v4466_v38 = vsel %vm10302_vm0, %v7035_v36, %v4465_v44  ;;  %v7037_v44 = vrot.slane %v4323_v11, 9  ;;  %v10564_v25 = vld [vmem:[#allocation2 + $0x4c] sm:$0xf]  ;;  %v3839_v36 = vshll.u32 %v10500_v3, 16  ;;  %v2760_v3 = vrot.slane %v10540_v9, 5  ;;  %v8392_v11 = vld [vmem:[#allocation8 + $0xe8] sm:$0xff]  }
 0x3c9   : > { %7865 = vmatprep.mubr.msk.bf16.mxu0 %vm342_vm1, %v7050_v37  ;;  %7717 = vmatprep.subr.bf16.mxu1 %v8381_v32  ;;  %v7051_v4 = vcombine.low %v4466_v38, %v4469_v7  ;;  %v8380_v37 = vld [vmem:[#allocation2 + $0x18] sm:$0xff]   ;;  %v8385_v9 = vld [vmem:[#allocation2 + $0x30] sm:$0xff]  }
 0x3ca   : > { %v4480_v5 = vsel %vm10302_vm0, %v7037_v44, %v4479_v21  ;;  %v2688_v7 = vld [vmem:[#allocation2 + $0x18] sm:$0xe]  ;;  %v8582_v21 = vld [vmem:[#allocation2 + $0x14] sm:$0x1]  ;;  %v10592_v38 = vrot.slane %v3839_v36, 5 }
 0x3cb   : > { %7686 = vmatmul.mubr.msk.bf16.gmra.mrb[8].mxu1 %vm342_vm1, %v6865_v60  ;;  %v7053_v41 = vcombine.low %v4480_v5, %v4483_v6  ;;  %v10581_v60 = vrot.slane %v3829_v8, 5  ;;  %v2749_v54 = vrot.slane %v8582_v21, 5  ;;  %v6900_v44 = vrot.slane %v2688_v7, 9  ;;  %v2690_v6 = vld [vmem:[#allocation2 + $0x30] sm:$0xe] }
 0x3cc   : > { %7689 = vmatprep.mubr.msk.bf16.mxu1 %vm342_vm1, %v6866_v51  ;;  %7718 = vmatpush3.bf16.msra.mxu1 %v8381_v32  ;;  %v8577_v32 = vld [vmem:[#allocation2 + $0x48] sm:$0xf]  ;;  %v2687_v51 = vld [vmem:[#allocation2 + $0xc] sm:$0xe]  ;;  %11717 = vst [vmem:[#allocation19_spill] sm:$0xff] %v10592_v38  ;;  %v2767_v8 = vrot.slane %v10544_v50, 5  ;;  %v6875_v5 = vcombine.low %v10416_v19, %v10421_v34  ;;  %v6877_v50 = vcombine.low %v10456_v17, %v10458_v45 }
 0x3cd   : > { %7719 = vmatprep.subr.bf16.mxu1 %v8391_v52  ;;  %v6868_v53 = vcombine.low %v8577_v32, %v10564_v25  ;;  %11716 = vst [vmem:[#allocation14_spill] sm:$0xff] %v10581_v60  ;;  %v3836_v49 = vor.u32 %v3835_v63, %v10581_v60  ;;  %v2689_v32 = vld [vmem:[#allocation2 + $0x24] sm:$0xe]  ;;  %v2691_v36 = vld [vmem:[#allocation2 + $0x3c] sm:$0xe] }
 0x3ce   : > { %v6901_v42 = vrot.slane %v2689_v32, 9  ;;  %v8585_v7 = vld [vmem:[#allocation2 + $0x40] sm:$0xf]  ;;  %v8389_v32 = vld [vmem:[#allocation2 + $0x48] sm:$0xff]   ;;  %v5199_v19 = vld [vmem:[#allocation2 + $0x38] sm:$0x1] }
 0x3cf   : > { %v10616_v13 = vrot.slane %v3836_v49, 4  ;;  %v2774_v21 = vrot.slane %v8585_v7, 5  ;;  %v6903_v49 = vrot.slane %v2691_v36, 9  ;;  %v8588_v36 = vld [vmem:[#allocation2 + $0x64] sm:$0xf] }
 0x3d0   : > { %7866 = vmatmul.mubr.msk.bf16.gmra.mrb[28].mxu0 %vm342_vm1, %v7051_v4  ;;  %7720 = vmatpush3.bf16.msra.mxu1 %v8391_v52  ;;  %v6870_v52 = vcombine.low %v10250_v2, %v10259_v15  ;;  %v2755_v2 = vrot.slane %v2753_v39, 4  ;;  %v6871_v15 = vcombine.low %v10296_v27, %v10360_v43  ;;  %v6872_v4 = vcombine.low %v10397_v29, %v10308_v16  ;;  %v5194_v7 = vld [vmem:[#allocation2 + $0x24] sm:$0xf]  ;;  %v8598_v60 = vld [vmem:[#allocation2 + $0xac] sm:$0xf] }
 0x3d1   : > { %7869 = vmatprep.mubr.msk.bf16.mxu0 %vm342_vm1, %v7052_v12  ;;  %7753 = vmatprep.subr.bf16.mxu1 %v10555_v47  ;;  %v6899_v12 = vrot.slane %v2687_v51, 9  ;;  %v2756_v27 = vrot.slane %v8583_v56, 5  ;;  %v10609_v16 = vsel %vm10302_vm0, %v2741_v62, %v2742_v55  ;;  %v10613_v29 = vsel %vm10302_vm0, %v2748_v35, %v2749_v54  ;;  %11718 = vst [vmem:[#allocation20_spill] sm:$0xff] %v10616_v13  ;;  %v2692_v54 = vld [vmem:[#allocation2 + $0x48] sm:$0xe] }
 0x3d2   : > { %v10641_v51 = vsel %vm10302_vm0, %v6900_v44, %v2753_v39  ;;  %v6902_v62 = vrot.slane %v2690_v6, 9  ;;  %v2769_v35 = vrot.slane %v2767_v8, 4  ;;  %v2781_v39 = vrot.slane %v10564_v25, 5  ;;  %v8406_v44 = vld [vmem:[#allocation8 + $0xf8] sm:$0xff]  }
 0x3d3   : > { %7690 = vmatmul.mubr.msk.bf16.gmra.mrb[12].mxu1 %vm342_vm1, %v6867_v28  ;;  %v10604_v28 = vsel %vm10302_vm0, %v6898_v24, %v2739_v14  ;;  %v8584_v14 = vld [vmem:[#allocation2 + $0x2c] sm:$0x1] }
 0x3d4   : > { %7693 = vmatprep.mubr.msk.bf16.mxu1 %vm342_vm1, %v6868_v53  ;;  %v2762_v53 = vrot.slane %v2760_v3, 4  ;;  %v2763_v63 = vrot.slane %v8584_v14, 5  ;;  %v10659_v25 = vsel %vm10302_vm0, %v6902_v62, %v2767_v8  ;;  %v2693_v14 = vld [vmem:[#allocation2 + $0x54] sm:$0xe]  ;;  %v10670_v8 = vsel %vm10302_vm0, %v6903_v49, %v2774_v21 }
 0x3d5   : > { %v2783_v62 = vrot.slane %v2781_v39, 4  ;;  %v5264_v49 = vshrl.u32 %v5194_v7, 16 }
 0x3d6   : > { %v10648_v55 = vsel %vm10302_vm0, %v2762_v53, %v2763_v63  ;;  %v8587_v53 = vld [vmem:[#allocation2 + $0x44] sm:$0x1]  ;;  %v2788_v63 = vrot.slane %v10575_v57, 5 }
 0x3d7   : > { %v2777_v6 = vrot.slane %v8587_v53, 5  ;;  %v6905_v53 = vrot.slane %v2693_v14, 9 }
 0x3d8   : > { %7870 = vmatmul.mubr.msk.bf16.gmra.mrb[32].mxu0 %vm342_vm1, %v7053_v41  ;;  %v6876_v41 = vcombine.low %v10427_v46, %v10429_v58  ;;  %v2790_v1 = vrot.slane %v2788_v63, 4 }
 0x3d9   : > { %7881 = vmatprep.mubr.msk.bf16.mxu0 %vm342_vm1, %v8380_v37  ;;  %v10626_v37 = vsel %vm10302_vm0, %v2755_v2, %v2756_v27  ;;  %v5240_v2 = vshrl.u32 %v5191_v33, 16 }
 0x3db   : > { %7694 = vmatmul.mubr.msk.bf16.gmra.mrb[16].mxu1 %vm342_vm1, %v6869_v26  ;;  %v8400_v26 = vld [vmem:[#allocation8 + $0xf0] sm:$0xff]  }
 0x3dc   : > { %7697 = vmatprep.mubr.msk.bf16.mxu1 %vm342_vm1, %v6870_v52  ;;  %v2812_v52 = vrot.slane %v10406_v48, 5 }
 0x3e0   : > { %7882 = vmatmul.mubr.msk.bf16.vlgmr.msra.gmra.mrb[4].mxu0 %vm342_vm1, %v8384_v0  ;;  %v8388_v0 = vld [vmem:[#allocation2 + $0x3c] sm:$0xff]  }
 0x3e1   : > { %7914 = vmatpush3.bf16.msra.mxu0 %v10431_v18  ;;  %7885 = vmatprep.mubr.msk.bf16.mxu0 %vm342_vm1, %v8385_v9  ;;  %v10632_v18 = vsel %vm10302_vm0, %v6899_v12, %v2746_v20  ;;  %v5192_v20 = vld [vmem:[#allocation2 + $0x1c] sm:$0xf]  ;;  %v8586_v12 = vld [vmem:[#allocation2 + $0x38] sm:$0x1] }
 0x3e2   : > { %7915 = vmatprep.subr.bf16.mxu0 %v8392_v11  ;;  %v2770_v9 = vrot.slane %v8586_v12, 5  ;;  %v5249_v56 = vshll.u32 %v5192_v20, 16  ;;  %v5253_v27 = vshrl.u32 %v5192_v20, 16  ;;  %v2795_v20 = vrot.slane %v8588_v36, 5  ;;  %v10674_v36 = vld [vmem:[#allocation8 + $0x100] sm:$0xff]  }
 0x3e3   : > { %7698 = vmatmul.mubr.msk.bf16.gmra.mrb[20].mxu1 %vm342_vm1, %v6871_v15  ;;  %v5243_v15 = vshll.u32 %v5191_v33, 16  ;;  %v6904_v33 = vrot.slane %v2692_v54, 9  ;;  %v2694_v54 = vld [vmem:[#allocation2 + $0x60] sm:$0xe] }
 0x3e4   : > { %7701 = vmatprep.mubr.msk.bf16.mxu1 %vm342_vm1, %v6872_v4  ;;  %v10653_v4 = vsel %vm10302_vm0, %v6901_v42, %v2760_v3  ;;  %v10664_v3 = vsel %vm10302_vm0, %v2769_v35, %v2770_v9  ;;  %v2776_v42 = vrot.slane %v2774_v21, 4  ;;  %v8589_v35 = vld [vmem:[#allocation2 + $0x50] sm:$0x1]  ;;  %v5255_v57 = vrot.slane %v5253_v27, 4 }
 0x3e5   : > { %7916 = vmatpush3.bf16.msra.mxu0 %v8392_v11  ;;  %v5245_v12 = vrot.slane %v5243_v15, 5  ;;  %v2784_v9 = vrot.slane %v8589_v35, 5  ;;  %v10672_v11 = vrot.slane %v5249_v56, 5  ;;  %v10684_v21 = vsel %vm10302_vm0, %v6904_v33, %v2781_v39  ;;  %v5195_v56 = vld [vmem:[#allocation2 + $0x28] sm:$0xf] }
 0x3e6   : > { %7917 = vmatprep.subr.bf16.mxu0 %v8400_v26  ;;  %v10692_v15 = vsel %vm10302_vm0, %v2776_v42, %v2777_v6  ;;  %v6906_v61 = vrot.slane %v2694_v54, 9  ;;  %v8590_v39 = vld [vmem:[#allocation2 + $0x5c] sm:$0x1]  ;;  %v5193_v33 = vld [vmem:[#allocation2 + $0x20] sm:$0x1]  ;;  %v10701_v6 = vsel %vm10302_vm0, %v6905_v53, %v2788_v63 }
 0x3e7   : > { %v10696_v27 = vsel %vm10302_vm0, %v2783_v62, %v2784_v9  ;;  %v8591_v42 = vld [vmem:[#allocation2 + $0x68] sm:$0x1]  ;;  %v5256_v54 = vor.u32 %v5255_v57, %v10672_v11  ;;  %v8592_v62 = vld [vmem:[#allocation2 + $0x7c] sm:$0xf]  ;;  %v5197_v35 = vld [vmem:[#allocation2 + $0x30] sm:$0xf] }
 0x3e8   : > { %7886 = vmatmul.mubr.msk.bf16.gmra.mrb[8].mxu0 %vm342_vm1, %v8388_v0  ;;  %v5242_v0 = vrot.slane %v5240_v2, 4  ;;  %v5267_v2 = vshll.u32 %v5194_v7, 16  ;;  %v2798_v7 = vrot.slane %v8591_v42, 5  ;;  %v5266_v9 = vrot.slane %v5264_v49, 4  ;;  %v2695_v49 = vld [vmem:[#allocation2 + $0x6c] sm:$0xe] }
 0x3e9   : > { %7889 = vmatprep.mubr.msk.bf16.mxu0 %vm342_vm1, %v8389_v32  ;;  %7918 = vmatpush3.bf16.msra.mxu0 %v8400_v26  ;;  %v2791_v32 = vrot.slane %v8590_v39, 5  ;;  %v5198_v26 = vld [vmem:[#allocation2 + $0x34] sm:$0xf]  ;;  %v10712_v53 = vsel %vm10302_vm0, %v6906_v61, %v2795_v20  ;;  %v5259_v42 = vshll.u32 %v5193_v33, 16  ;;  %v5196_v33 = vld [vmem:[#allocation2 + $0x2c] sm:$0x1] }
 0x3ea   : > { %7919 = vmatprep.subr.bf16.mxu0 %v8406_v44  ;;  %v5246_v14 = vor.u32 %v5245_v12, %v5242_v0  ;;  %v5269_v39 = vrot.slane %v5267_v2, 5  ;;  %v5273_v0 = vshll.u32 %v5195_v56, 16  ;;  %v5277_v12 = vshrl.u32 %v5195_v56, 16  ;;  %v8593_v61 = vld [vmem:[#allocation2 + $0x74] sm:$0x1] }
 0x3eb   : > { %7702 = vmatmul.mubr.msk.bf16.gmra.mrb[24].mxu1 %vm342_vm1, %v6873_v23  ;;  %v2797_v23 = vrot.slane %v2795_v20, 4  ;;  %v10708_v63 = vsel %vm10302_vm0, %v2790_v1, %v2791_v32  ;;  %v2804_v56 = vrot.slane %v2802_v30, 4  ;;  %v5291_v1 = vshll.u32 %v5197_v35, 16 }
 0x3ec   : > { %7705 = vmatprep.mubr.msk.bf16.mxu1 %vm342_vm1, %v6874_v59  ;;  %v8395_v59 = vld [vmem:[#allocation2 + $0x60] sm:$0xff]   ;;  %v5247_v2 = vrot.slane %v5246_v14, 4  ;;  %v5257_v32 = vrot.slane %v5256_v54, 4  ;;  %v5297_v24 = vshll.u32 %v5198_v26, 16  ;;  %v5301_v20 = vshrl.u32 %v5198_v26, 16 }
 0x3ed   : > { %7920 = vmatpush3.bf16.msra.mxu0 %v8406_v44  ;;  %v2809_v44 = vrot.slane %v8592_v62, 5  ;;  %v10716_v57 = vsel %vm10302_vm0, %v2797_v23, %v2798_v7  ;;  %v5288_v62 = vshrl.u32 %v5197_v35, 16  ;;  %v2805_v23 = vrot.slane %v8593_v61, 5  ;;  %v8594_v61 = vld [vmem:[#allocation2 + $0x88] sm:$0xf] }
 0x3ee   : > { %7953 = vmatprep.subr.bf16.mxu0 %v10674_v36  ;;  %v10725_v14 = vrot.slane %v5273_v0, 5  ;;  %v5279_v7 = vrot.slane %v5277_v12, 4  ;;  %v5261_v54 = vrot.slane %v5259_v42, 5  ;;  %v6907_v35 = vrot.slane %v2695_v49, 9  ;;  %v8397_v12 = vld [vmem:[#allocation2 + $0x6c] sm:$0xff]   ;;  %v8398_v42 = vld [vmem:[#allocation2 + $0x78] sm:$0xff]  }
 0x3ef   : > { %v2811_v31 = vrot.slane %v2809_v44, 4  ;;  %v5293_v0 = vrot.slane %v5291_v1, 5  ;;  %v10745_v48 = vrot.slane %v5297_v24, 5 }
 0x3f0   : > { %7890 = vmatmul.mubr.msk.bf16.gmra.mrb[12].mxu0 %vm342_vm1, %v8394_v40  ;;  %v2696_v40 = vld [vmem:[#allocation2 + $0x78] sm:$0xe]  ;;  %v5262_v46 = vsel %vm9463_vm10, %v5257_v32, %v5261_v54  ;;  %v10777_v54 = vld [vmem:[#allocation2 + $0x90] sm:$0xe] }
 0x3f1   : > { %7893 = vmatprep.mubr.msk.bf16.mxu0 %vm342_vm1, %v8395_v59  ;;  %v5270_v59 = vor.u32 %v5269_v39, %v5266_v9  ;;  %v6908_v26 = vrot.slane %v2696_v40, 9  ;;  %v10737_v9 = vsel %vm10302_vm0, %v2804_v56, %v2805_v23  ;;  %v5290_v39 = vrot.slane %v5288_v62, 4 }
 0x3f2   : > { %v10743_v58 = vsel %vm10302_vm0, %v2811_v31, %v2812_v52  ;;  %v5307_v56 = vshll.u32 %v5199_v19, 16  ;;  %v10764_v31 = vsel %vm10302_vm0, %v6907_v35, %v2802_v30  ;;  %v2816_v23 = vrot.slane %v8594_v61, 5  ;;  %v5201_v35 = vld [vmem:[#allocation2 + $0x40] sm:$0xf] }
 0x3f3   : > { %7706 = vmatmul.mubr.msk.bf16.gmra.mrb[28].mxu1 %vm342_vm1, %v6875_v5  ;;  %v5252_v5 = vsel %vm9463_vm10, %v5247_v2, %v10672_v11  ;;  %v10747_v49 = vrot.slane %v5270_v59, 4  ;;  %v5280_v11 = vor.u32 %v5279_v7, %v10725_v14  ;;  %v5283_v2 = vshll.u32 %v5196_v33, 16  ;;  %v5200_v33 = vld [vmem:[#allocation2 + $0x3c] sm:$0xf] }
 0x3f4   : > { %7709 = vmatprep.mubr.msk.bf16.mxu1 %vm342_vm1, %v6876_v41  ;;  %v5303_v41 = vrot.slane %v5301_v20, 4  ;;  %v10768_v1 = vsel %vm10302_vm0, %v6908_v26, %v2809_v44  ;;  %v5294_v32 = vor.u32 %v5293_v0, %v5290_v39  ;;  %v2697_v20 = vld [vmem:[#allocation2 + $0x84] sm:$0xe]  ;;  %v10770_v59 = vcombine.low %v5252_v5, %v5262_v46  ;;  %v5203_v39 = vld [vmem:[#allocation2 + $0x48] sm:$0xf] }
 0x3f5   : > { %v5276_v44 = vsel %vm9463_vm10, %v10747_v49, %v10725_v14  ;;  %v5281_v26 = vrot.slane %v5280_v11, 4  ;;  %v5285_v19 = vrot.slane %v5283_v2, 5  ;;  %v10787_v5 = vrot.slane %v5307_v56, 5  ;;  %v8595_v46 = vld [vmem:[#allocation2 + $0x94] sm:$0xf]  ;;  %v8401_v11 = vld [vmem:[#allocation2 + $0x84] sm:$0xff]  }
 0x3f6   : > { %v5304_v30 = vor.u32 %v5303_v41, %v10745_v48  ;;  %v11719_v0 = vcombine.low %v10604_v28, %v10609_v16  ;;  %v2823_v17 = vrot.slane %v8595_v46, 5  ;;  %v5312_v41 = vshrl.u32 %v5200_v33, 16  ;;  %v8596_v56 = vld [vmem:[#allocation2 + $0x8c] sm:$0x1]  ;;  %v8402_v28 = vld [vmem:[#allocation2 + $0x90] sm:$0xff]  }
 0x3f7   : > { %v5295_v61 = vrot.slane %v5294_v32, 4  ;;  %v2818_v43 = vrot.slane %v2816_v23, 4  ;;  %v5321_v14 = vshll.u32 %v5201_v35, 16  ;;  %v5325_v49 = vshrl.u32 %v5201_v35, 16 }
 0x3f8   : > { %7894 = vmatmul.mubr.msk.bf16.gmra.mrb[16].mxu0 %vm342_vm1, %v8397_v12  ;;  %v6909_v12 = vrot.slane %v2697_v20, 9  ;;  %v5305_v2 = vrot.slane %v5304_v30, 4  ;;  %v2819_v7 = vrot.slane %v8596_v56, 5  ;;  %v5336_v24 = vshrl.u32 %v5203_v39, 16  ;;  %v8405_v56 = vld [vmem:[#allocation8 + $0x68] sm:$0xff]  }
 0x3f9   : > { %7897 = vmatprep.mubr.msk.bf16.mxu0 %vm342_vm1, %v8398_v42  ;;  %v10793_v42 = vld [vmem:[#allocation2 + $0x4c] sm:$0xf]  ;;  %v5339_v52 = vshll.u32 %v5203_v39, 16  ;;  %v5286_v16 = vsel %vm9463_vm10, %v5281_v26, %v5285_v19  ;;  %v6910_v20 = vrot.slane %v10777_v54, 9  ;;  %v2825_v30 = vrot.slane %v2823_v17, 4 }
 0x3fa   : > { %v10803_v32 = vsel %vm10302_vm0, %v6909_v12, %v2816_v23  ;;  %v5314_v35 = vrot.slane %v5312_v41, 4  ;;  %v5206_v39 = vld [vmem:[#allocation2 + $0x54] sm:$0xf]  ;;  %v5300_v54 = vsel %vm9463_vm10, %v5295_v61, %v10745_v48  ;;  %v10811_v26 = vsel %vm10302_vm0, %v2818_v43, %v2819_v7  ;;  %v10815_v23 = vld [vmem:[#allocation2 + $0x58] sm:$0xf] }
 0x3fb   : > { %7710 = vmatmul.mubr.msk.bf16.gmra.mrb[32].mxu1 %vm342_vm1, %v6877_v50  ;;  %v5315_v50 = vshll.u32 %v5200_v33, 16  ;;  %v5345_v33 = vshll.u32 %v10793_v42, 16  ;;  %v10813_v19 = vrot.slane %v5321_v14, 5  ;;  %v5310_v12 = vsel %vm9463_vm10, %v5305_v2, %v10787_v5  ;;  %v8597_v41 = vld [vmem:[#allocation2 + $0x98] sm:$0x1]  ;;  %v8410_v2 = vld [vmem:[#allocation8 + $0x70] sm:$0xff]  }
 0x3fc   : > { %7721 = vmatprep.mubr.msk.bf16.mxu1 %vm342_vm1, %v11719_v0  ;;  %v5349_v0 = vshrl.u32 %v10793_v42, 16  ;;  %v5338_v62 = vrot.slane %v5336_v24, 4  ;;  %v5341_v40 = vrot.slane %v5339_v52, 5  ;;  %v11721_v48 = vcombine.low %v10632_v18, %v10613_v29  ;;  %v10826_v7 = vld [vmem:[#allocation2 + $0x50] sm:$0x1] }
 0x3fd   : > { %v5317_v46 = vrot.slane %v5315_v50, 5  ;;  %v2826_v50 = vrot.slane %v8597_v41, 5  ;;  %v10828_v43 = vrot.slane %v5345_v33, 5  ;;  %v5360_v14 = vshrl.u32 %v5206_v39, 16  ;;  %v2699_v41 = vld [vmem:[#allocation2 + $0x9c] sm:$0xe] }
 0x3fe   : > { %v5351_v61 = vrot.slane %v5349_v0, 4  ;;  %v11722_v5 = vcombine.low %v10641_v51, %v10626_v37  ;;  %v10835_v52 = vcombine.low %v5276_v44, %v5286_v16  ;;  %v5369_v29 = vshll.u32 %v10815_v23, 16  ;;  %v8403_v44 = vld [vmem:[#allocation2 + $0x9c] sm:$0xff]  }
 0x3ff   : > { %v5318_v24 = vor.u32 %v5317_v46, %v5314_v35  ;;  %v5373_v18 = vshrl.u32 %v10815_v23, 16  ;;  %v10841_v33 = vsel %vm10302_vm0, %v6910_v20, %v2823_v17  ;;  %v10845_v37 = vsel %vm10302_vm0, %v2825_v30, %v2826_v50  ;;  %v8404_v17 = vld [vmem:[#allocation2 + $0xa8] sm:$0xff]  }
 0x400   : > { %7898 = vmatmul.mubr.msk.bf16.gmra.mrb[20].mxu0 %vm342_vm1, %v8401_v11  ;;  %v5327_v11 = vrot.slane %v5325_v49, 4  ;;  %v5363_v49 = vshll.u32 %v5206_v39, 16  ;;  %v10849_v16 = vcombine.low %v5300_v54, %v5310_v12  ;;  %v5342_v35 = vor.u32 %v5341_v40, %v5338_v62  ;;  %v5209_v39 = vld [vmem:[#allocation2 + $0x60] sm:$0xf]  ;;  %v10861_v62 = vld [vmem:[#allocation2 + $0x64] sm:$0xf] }
 0x401   : > { %7901 = vmatprep.mubr.msk.bf16.mxu0 %vm342_vm1, %v8402_v28  ;;  %v10820_v28 = vld [vmem:[#allocation2 + $0x44] sm:$0x1]  ;;  %v5355_v46 = vshll.u32 %v10826_v7, 16  ;;  %v5352_v20 = vor.u32 %v5351_v61, %v10828_v43  ;;  %v2830_v30 = vrot.slane %v10421_v34, 5  ;;  %v5362_v50 = vrot.slane %v5360_v14, 4  ;;  %11723 = vst [vmem:[#allocation22_spill] sm:$0xff] %v10861_v62 }
 0x402   : > { %11720 = vst [vmem:[#allocation21_spill] sm:$0xff] %v10820_v28  ;;  %v5328_v51 = vor.u32 %v5327_v11, %v10813_v19  ;;  %v5365_v11 = vrot.slane %v5363_v49, 5  ;;  %v5319_v12 = vrot.slane %v5318_v24, 4  ;;  %v5375_v40 = vrot.slane %v5373_v18, 4  ;;  %v8412_v34 = vld [vmem:[#allocation8 + $0x78] sm:$0xff]  }
 0x403   : > { %7722 = vmatmul.mubr.msk.bf16.vlgmr.msra.gmra.mrb[4].mxu1 %vm342_vm1, %v11721_v48  ;;  %v10859_v48 = vrot.slane %v5369_v29, 5  ;;  %v5384_v14 = vshrl.u32 %v5209_v39, 16  ;;  %v5387_v49 = vshll.u32 %v5209_v39, 16  ;;  %v5343_v0 = vrot.slane %v5342_v35, 4 }
 0x404   : > { %7725 = vmatprep.mubr.msk.bf16.mxu1 %vm342_vm1, %v11722_v5  ;;  %7754 = vmatpush3.bf16.msra.mxu1 %v10555_v47  ;;  %v5331_v47 = vshll.u32 %v10820_v28, 16  ;;  %v5329_v61 = vrot.slane %v5328_v51, 4  ;;  %v2700_v28 = vld [vmem:[#allocation2 + $0xa8] sm:$0xe]  ;;  %v2837_v54 = vrot.slane %v8598_v60, 5  ;;  %v11724_v24 = vcombine.low %v10653_v4, %v10648_v55 }
 0x405   : > { %7755 = vmatprep.subr.bf16.mxu1 %v8405_v56  ;;  %v5353_v29 = vrot.slane %v5352_v20, 4  ;;  %v2832_v18 = vrot.slane %v2830_v30, 4  ;;  %v10868_v51 = vld [vmem:[#allocation2 + $0x5c] sm:$0x1]  ;;  %v11726_v35 = vcombine.low %v10659_v25, %v10664_v3  ;;  %v5324_v60 = vsel %vm9463_vm10, %v5319_v12, %v10813_v19  ;;  %v10878_v4 = vld [vmem:[#allocation2 + $0x68] sm:$0x1] }
 0x406   : > { %v5333_v5 = vrot.slane %v5331_v47, 5  ;;  %11725 = vst [vmem:[#allocation23_spill] sm:$0xff] %v10868_v51  ;;  %v5366_v47 = vor.u32 %v5365_v11, %v5362_v50  ;;  %v5376_v55 = vor.u32 %v5375_v40, %v10859_v48  ;;  %11727 = vst [vmem:[#allocation15_spill] sm:$0xff] %v10878_v4  ;;  %v5397_v39 = vshrl.u32 %v10861_v62, 16  ;;  %v8408_v40 = vld [vmem:[#allocation2 + $0xc0] sm:$0xff]  }
 0x407   : > { %v6912_v25 = vrot.slane %v2700_v28, 9  ;;  %v5386_v3 = vrot.slane %v5384_v14, 4  ;;  %v5348_v19 = vsel %vm9463_vm10, %v5343_v0, %v10828_v43  ;;  %v2839_v11 = vrot.slane %v2837_v54, 4  ;;  %v8600_v43 = vld [vmem:[#allocation2 + $0xb0] sm:$0x1] }
 0x408   : > { %7902 = vmatmul.mubr.msk.bf16.gmra.mrb[24].mxu0 %vm342_vm1, %v8403_v44  ;;  %7756 = vmatpush3.bf16.msra.mxu1 %v8405_v56  ;;  %v5357_v44 = vrot.slane %v5355_v46, 5  ;;  %v6911_v56 = vrot.slane %v2699_v41, 9  ;;  %v5393_v46 = vshll.u32 %v10861_v62, 16  ;;  %v5334_v20 = vsel %vm9463_vm10, %v5329_v61, %v5333_v5 }
 0x409   : > { %7905 = vmatprep.mubr.msk.bf16.mxu0 %vm342_vm1, %v8404_v17  ;;  %7757 = vmatprep.subr.bf16.mxu1 %v8410_v2  ;;  %v8599_v17 = vld [vmem:[#allocation2 + $0xa4] sm:$0x1]  ;;  %v5389_v41 = vrot.slane %v5387_v49, 5  ;;  %v5379_v12 = vshll.u32 %v10868_v51, 16  ;;  %v10898_v5 = vrot.slane %v5366_v47, 4  ;;  %v5403_v14 = vshll.u32 %v10878_v4, 16 }
 0x40a   : > { %v2833_v13 = vrot.slane %v8599_v17, 5  ;;  %v10889_v50 = vsel %vm10302_vm0, %v6911_v56, %v2830_v30  ;;  %v5358_v61 = vsel %vm9463_vm10, %v5353_v29, %v5357_v44  ;;  %v2840_v0 = vrot.slane %v8600_v43, 5  ;;  %v10908_v44 = vld [vmem:[#allocation2 + $0xb4] sm:$0xe]  ;;  %v10918_v17 = vld [vmem:[#allocation2 + $0x7c] sm:$0xf] }
 0x40b   : > { %7726 = vmatmul.mubr.msk.bf16.gmra.mrb[8].mxu1 %vm342_vm1, %v11724_v24  ;;  %11728 = vst [vmem:[#allocation16_spill] sm:$0xff] %v10889_v50  ;;  %v10902_v30 = vrot.slane %v5376_v55, 4  ;;  %v10904_v49 = vrot.slane %v5393_v46, 5  ;;  %v10906_v56 = vrot.slane %v5397_v39, 4  ;;  %v10915_v24 = vsel %vm10302_vm0, %v6912_v25, %v2837_v54  ;;  %11730 = vst [vmem:[#allocation17_spill] sm:$0xff] %v10918_v17  ;;  %v10920_v47 = vld [vmem:[#allocation8 + $0x80] sm:$0xff]  }
 0x40c   : > { %7729 = vmatprep.mubr.msk.bf16.mxu1 %vm342_vm1, %v11726_v35  ;;  %7758 = vmatpush3.bf16.msra.mxu1 %v8410_v2  ;;  %v8407_v2 = vld [vmem:[#allocation2 + $0xb4] sm:$0xff]   ;;  %v10896_v28 = vsel %vm10302_vm0, %v2832_v18, %v2833_v13  ;;  %v10911_v13 = vcombine.low %v5324_v60, %v5334_v20  ;;  %v5390_v29 = vor.u32 %v5389_v41, %v5386_v3  ;;  %v11651_v18 = vrot.slane %v10458_v45, 5  ;;  %v10933_v46 = vld [vmem:[#allocation2 + $0x70] sm:$0xf]  ;;  %v5218_v39 = vld [vmem:[#allocation2 + $0x84] sm:$0xf] }
 0x40d   : > { %7759 = vmatprep.subr.bf16.mxu1 %v8412_v34  ;;  %11729 = vst [vmem:[#allocation18_spill] sm:$0xff] %v10896_v28  ;;  %11731 = vst [vmem:[#allocation24_spill] sm:$0xff] %v10920_v47  ;;  %v10923_v35 = vcombine.low %v5348_v19, %v5358_v61  ;;  %v10929_v55 = vsel %vm10302_vm0, %v2839_v11, %v2840_v0  ;;  %v10931_v54 = vrot.slane %v5379_v12, 5  ;;  %v10943_v3 = vrot.slane %v5403_v14, 5  ;;  %v5215_v11 = vld [vmem:[#allocation2 + $0x78] sm:$0xf] }
 0x40e   : > { %11732 = vst [vmem:[#allocation25_spill] sm:$0xff] %v10933_v46  ;;  %v11733_v20 = vcombine.low %v10670_v8, %v10692_v15  ;;  %v6913_v41 = vrot.slane %v10908_v44, 9  ;;  %v11734_v12 = vcombine.low %v10684_v21, %v10696_v27  ;;  %v8409_v8 = vld [vmem:[#allocation2 + $0xcc] sm:$0xff]   ;;  %v10959_v43 = vld [vmem:[#allocation2 + $0x88] sm:$0xf]  ;;  %v10961_v0 = vrot.slane %v5390_v29, 4 }
 0x40f   : > { %11735 = vst [vmem:[#allocation13_spill] sm:$0xff] %v10959_v43  ;;  %v2846_v21 = vrot.slane %v11651_v18, 4  ;;  %v5417_v27 = vshll.u32 %v10933_v46, 16  ;;  %v5421_v44 = vshrl.u32 %v10933_v46, 16  ;;  %v5441_v60 = vshll.u32 %v10918_v17, 16 }
 0x410   : > { %7906 = vmatmul.mubr.msk.bf16.gmra.mrb[28].mxu0 %vm342_vm1, %v8407_v2  ;;  %7760 = vmatpush3.bf16.msra.mxu1 %v8412_v34  ;;  %v5212_v34 = vld [vmem:[#allocation2 + $0x6c] sm:$0xf]  ;;  %v10946_v2 = vld [vmem:[#allocation2 + $0xbc] sm:$0x1]  ;;  %v10969_v25 = vld [vmem:[#allocation2 + $0x94] sm:$0xf] }
 0x411   : > { %7909 = vmatprep.mubr.msk.bf16.mxu0 %vm342_vm1, %v8408_v40  ;;  %8017 = vmatprep.subr.bf16.mxu1 %v10920_v47  ;;  %v2847_v19 = vrot.slane %v10946_v2, 5  ;;  %v5400_v40 = vor.u32 %v10906_v56, %v10904_v49  ;;  %v5408_v61 = vshrl.u32 %v5212_v34, 16  ;;  %v5411_v14 = vshll.u32 %v5212_v34, 16  ;;  %11736 = vst [vmem:[#allocation26_spill] sm:$0xff] %v10969_v25  ;;  %v10980_v4 = vld [vmem:[#allocation2 + $0x74] sm:$0x1] }
 0x412   : > { %v5432_v2 = vshrl.u32 %v5215_v11, 16  ;;  %v5445_v56 = vshrl.u32 %v10918_v17, 16  ;;  %v5456_v34 = vshrl.u32 %v5218_v39, 16  ;;  %v5459_v15 = vshll.u32 %v5218_v39, 16 }
 0x413   : > { %7730 = vmatmul.mubr.msk.bf16.gmra.mrb[12].mxu1 %vm342_vm1, %v11733_v20  ;;  %v5221_v20 = vld [vmem:[#allocation2 + $0x90] sm:$0xf]  ;;  %v5465_v29 = vshll.u32 %v10959_v43, 16  ;;  %v5469_v47 = vshrl.u32 %v10959_v43, 16  ;;  %v5410_v18 = vrot.slane %v5408_v61, 4  ;;  %v5413_v38 = vrot.slane %v5411_v14, 5 }
 0x414   : > { %7733 = vmatprep.mubr.msk.bf16.mxu1 %vm342_vm1, %v11734_v12  ;;  %v5435_v12 = vshll.u32 %v5215_v11, 16  ;;  %v5480_v46 = vshrl.u32 %v5221_v20, 16  ;;  %v5483_v28 = vshll.u32 %v5221_v20, 16  ;;  %v10976_v11 = vrot.slane %v5417_v27, 5 }
 0x415   : > { %v5423_v17 = vrot.slane %v5421_v44, 4  ;;  %v5489_v50 = vshll.u32 %v10969_v25, 16  ;;  %v5493_v39 = vshrl.u32 %v10969_v25, 16  ;;  %v5434_v51 = vrot.slane %v5432_v2, 4 }
 0x416   : > { %v5437_v43 = vrot.slane %v5435_v12, 5  ;;  %v10982_v62 = vrot.slane %v5441_v60, 5  ;;  %v11737_v61 = vcombine.low %v10701_v6, %v10708_v63  ;;  %v5458_v14 = vrot.slane %v5456_v34, 4 }
 0x417   : > { %v5461_v27 = vrot.slane %v5459_v15, 5  ;;  %v10990_v44 = vrot.slane %v5465_v29, 5  ;;  %v5471_v20 = vrot.slane %v5469_v47, 4  ;;  %v11738_v25 = vcombine.low %v10712_v53, %v10716_v57  ;;  %v5224_v29 = vld [vmem:[#allocation2 + $0x9c] sm:$0xf]  ;;  %v8413_v53 = vld [vmem:[#allocation8 + $0x108] sm:$0xff]  }
 0x418   : > { %7910 = vmatmul.mubr.msk.bf16.gmra.mrb[32].mxu0 %vm342_vm1, %v8409_v8  ;;  %v5447_v8 = vrot.slane %v5445_v56, 4  ;;  %v10996_v60 = vrot.slane %v5400_v40, 4  ;;  %v11739_v2 = vrot.slane %v10458_v45, 5  ;;  %v5482_v63 = vrot.slane %v5480_v46, 4 }
 0x419   : > { %7921 = vmatprep.mubr.msk.bf16.mxu0 %vm342_vm1, %v10770_v59  ;;  %v10988_v59 = vld [vmem:[#allocation2 + $0x80] sm:$0x1]  ;;  %v5485_v12 = vrot.slane %v5483_v28, 5  ;;  %v5414_v56 = vor.u32 %v5413_v38, %v5410_v18  ;;  %v5427_v15 = vshll.u32 %v10980_v4, 16  ;;  %v11005_v34 = vrot.slane %v5489_v50, 5 }
 0x41a   : > { %v11002_v6 = vsel %vm10302_vm0, %v6913_v41, %v11739_v2  ;;  %v5495_v47 = vrot.slane %v5493_v39, 4  ;;  %v5424_v57 = vor.u32 %v5423_v17, %v10976_v11  ;;  %v5448_v40 = vor.u32 %v5447_v8, %v10982_v62  ;;  %v11027_v17 = vld [vmem:[#allocation2 + $0x98] sm:$0x1]  ;;  %v11029_v41 = vld [vmem:[#allocation2 + $0xa0] sm:$0xf]  ;;  %v8416_v2 = vld [vmem:[#allocation8 + $0x110] sm:$0xff]  }
 0x41b   : > { %7734 = vmatmul.mubr.msk.bf16.gmra.mrb[16].mxu1 %vm342_vm1, %v11737_v61  ;;  %v5451_v45 = vshll.u32 %v10988_v59, 16  ;;  %v11010_v61 = vld [vmem:[#allocation2 + $0x8c] sm:$0x1]  ;;  %v5396_v38 = vsel %vm9463_vm10, %v10961_v0, %v10904_v49  ;;  %v11018_v50 = vsel %vm10302_vm0, %v2846_v21, %v2847_v19  ;;  %v5462_v28 = vor.u32 %v5461_v27, %v5458_v14  ;;  %v5227_v14 = vld [vmem:[#allocation2 + $0xa8] sm:$0xf] }
 0x41c   : > { %7737 = vmatprep.mubr.msk.bf16.mxu1 %vm342_vm1, %v11738_v25  ;;  %v5438_v25 = vor.u32 %v5437_v43, %v5434_v51  ;;  %v5472_v18 = vor.u32 %v5471_v20, %v10990_v44  ;;  %v5406_v51 = vsel %vm9463_vm10, %v10996_v60, %v10943_v3  ;;  %v5486_v46 = vor.u32 %v5485_v12, %v5482_v63  ;;  %v11112_v49 = vld [vmem:[#allocation2 + $0xb4] sm:$0xf] }
 0x41d   : > { %v5504_v43 = vshrl.u32 %v5224_v29, 16  ;;  %v5507_v39 = vshll.u32 %v5224_v29, 16  ;;  %v5415_v19 = vrot.slane %v5414_v56, 4  ;;  %v5429_v21 = vrot.slane %v5427_v15, 5  ;;  %v11046_v29 = vld [vmem:[#allocation2 + $0xa4] sm:$0x1] }
 0x41e   : > { %v5496_v8 = vor.u32 %v5495_v47, %v11005_v34  ;;  %v5425_v3 = vrot.slane %v5424_v57, 4  ;;  %v5439_v27 = vrot.slane %v5438_v25, 4  ;;  %v5449_v20 = vrot.slane %v5448_v40, 4  ;;  %v5949_v0 = vld [vmem:[#allocation2 + $0x54] sm:$0xe] }
 0x41f   : > { %v5453_v60 = vrot.slane %v5451_v45, 5  ;;  %v11740_v63 = vcombine.low %v10764_v31, %v10737_v9  ;;  %v5499_v12 = vshll.u32 %v11027_v17, 16  ;;  %v5513_v56 = vshll.u32 %v11029_v41, 16 }
 0x420   : > { %7922 = vmatmul.mubr.msk.bf16.vlgmr.msra.gmra.mrb[4].mxu0 %vm342_vm1, %v10835_v52  ;;  %v5475_v52 = vshll.u32 %v11010_v61, 16  ;;  %v11741_v15 = vcombine.low %v10768_v1, %v10743_v58  ;;  %v5487_v47 = vrot.slane %v5486_v46, 4  ;;  %v5506_v57 = vrot.slane %v5504_v43, 4  ;;  %v8421_v43 = vld [vmem:[#allocation8 + $0x118] sm:$0xff]  }
 0x421   : > { %7954 = vmatpush3.bf16.msra.mxu0 %v10674_v36  ;;  %7925 = vmatprep.mubr.msk.bf16.mxu0 %vm342_vm1, %v10849_v16  ;;  %v5463_v36 = vrot.slane %v5462_v28, 4  ;;  %v5473_v16 = vrot.slane %v5472_v18, 4  ;;  %v5509_v25 = vrot.slane %v5507_v39, 5  ;;  %v5517_v9 = vshrl.u32 %v11029_v41, 16 }
 0x422   : > { %7955 = vmatprep.subr.bf16.mxu0 %v8413_v53  ;;  %v5477_v31 = vrot.slane %v5475_v52, 5  ;;  %v5497_v40 = vrot.slane %v5496_v8, 4  ;;  %v5528_v45 = vshrl.u32 %v5227_v14, 16  ;;  %v5531_v28 = vshll.u32 %v5227_v14, 16 }
 0x423   : > { %7738 = vmatmul.mubr.msk.bf16.gmra.mrb[20].mxu1 %vm342_vm1, %v11740_v63  ;;  %v5420_v18 = vsel %vm9463_vm10, %v5415_v19, %v10976_v11  ;;  %v5430_v58 = vsel %vm9463_vm10, %v5425_v3, %v5429_v21  ;;  %v5444_v1 = vsel %vm9463_vm10, %v5439_v27, %v10982_v62  ;;  %v5454_v46 = vsel %vm9463_vm10, %v5449_v20, %v5453_v60 }
 0x424   : > { %7741 = vmatprep.mubr.msk.bf16.mxu1 %vm342_vm1, %v11741_v15  ;;  %v5468_v39 = vsel %vm9463_vm10, %v5463_v36, %v10990_v44  ;;  %v5478_v11 = vsel %vm9463_vm10, %v5473_v16, %v5477_v31  ;;  %v5501_v19 = vrot.slane %v5499_v12, 5  ;;  %v5523_v21 = vshll.u32 %v11046_v29, 16  ;;  %v5950_v12 = vld [vmem:[#allocation2 + $0x60] sm:$0xe] }
 0x425   : > { %7956 = vmatpush3.bf16.msra.mxu0 %v8413_v53  ;;  %v11059_v53 = vld [vmem:[#allocation2 + $0xac] sm:$0xf]  ;;  %v5492_v62 = vsel %vm9463_vm10, %v5487_v47, %v11005_v34  ;;  %v5510_v52 = vor.u32 %v5509_v25, %v5506_v57  ;;  %v11072_v8 = vrot.slane %v5513_v56, 5  ;;  %v5519_v14 = vrot.slane %v5517_v9, 4 }
 0x426   : > { %7957 = vmatprep.subr.bf16.mxu0 %v8416_v2  ;;  %v5502_v44 = vsel %vm9463_vm10, %v5497_v40, %v5501_v19  ;;  %v5530_v3 = vrot.slane %v5528_v45, 4  ;;  %v5533_v27 = vrot.slane %v5531_v28, 5  ;;  %v5537_v20 = vshll.u32 %v11059_v53, 16  ;;  %v11746_v45 = vld [vmem:[#allocation22_spill] sm:$0xff]  ;;  %v11748_v19 = vld [vmem:[#allocation15_spill] sm:$0xff] }
 0x427   : > { %v6928_v60 = vcombine.low %v10915_v24, %v10929_v55  ;;  %v11742_v34 = vsel %vm9463_vm10, %v10902_v30, %v10931_v54  ;;  %v7116_v63 = vcombine.low %v5396_v38, %v5406_v51  ;;  %v6929_v24 = vcombine.low %v11002_v6, %v11018_v50  ;;  %v11098_v55 = vld [vmem:[#allocation2 + $0xb0] sm:$0x1] }
 0x428   : > { %7926 = vmatmul.mubr.msk.bf16.gmra.mrb[8].mxu0 %vm342_vm1, %v10911_v13  ;;  %v5948_v13 = vld [vmem:[#allocation2 + $0x48] sm:$0xe]  ;;  %v11744_v30 = vcombine.low %v10803_v32, %v10811_v26  ;;  %v11104_v54 = vcombine.low %v5420_v18, %v5430_v58  ;;  %v11110_v36 = vrot.slane %v5523_v21, 5  ;;  %v11745_v38 = vcombine.low %v10841_v33, %v10845_v37 }
 0x429   : > { %7929 = vmatprep.mubr.msk.bf16.mxu0 %vm342_vm1, %v10923_v35  ;;  %7958 = vmatpush3.bf16.msra.mxu0 %v8416_v2  ;;  %v11743_v35 = vsel %vm9463_vm10, %v10898_v5, %v10859_v48  ;;  %v11106_v48 = vcombine.low %v5444_v1, %v5454_v46  ;;  %v11108_v5 = vcombine.low %v5468_v39, %v5478_v11  ;;  %v11120_v32 = vrot.slane %v5510_v52, 4  ;;  %v11747_v1 = vld [vmem:[#allocation23_spill] sm:$0xff] }
 0x42a   : > { %v7115_v2 = vcombine.low %v11743_v35, %v11742_v34  ;;  %7959 = vmatprep.subr.bf16.mxu0 %v8421_v43  ;;  %v11118_v51 = vcombine.low %v5492_v62, %v5502_v44  ;;  %v7150_v26 = vrot.slane %v5948_v13, 9  ;;  %v6038_v16 = vrot.slane %v10793_v42, 5  ;;  %v5233_v35 = vld [vmem:[#allocation2 + $0xc0] sm:$0xf] }
 0x42b   : > { %7742 = vmatmul.mubr.msk.bf16.gmra.mrb[24].mxu1 %vm342_vm1, %v11744_v30  ;;  %v5520_v56 = vor.u32 %v5519_v14, %v11072_v8  ;;  %v5534_v15 = vor.u32 %v5533_v27, %v5530_v3  ;;  %v11124_v47 = vrot.slane %v5537_v20, 5  ;;  %v5541_v57 = vshrl.u32 %v11059_v53, 16  ;;  %v5951_v3 = vld [vmem:[#allocation2 + $0x6c] sm:$0xe]  ;;  %v11749_v27 = vld [vmem:[#allocation16_spill] sm:$0xff]  ;;  %v11750_v20 = vld [vmem:[#allocation18_spill] sm:$0xff] }
 0x42c   : > { %7745 = vmatprep.mubr.msk.bf16.mxu1 %vm342_vm1, %v11745_v38  ;;  %v6040_v25 = vrot.slane %v6038_v16, 4  ;;  %v6041_v33 = vrot.slane %v10826_v7, 5  ;;  %v7151_v37 = vrot.slane %v5949_v0, 9  ;;  %v6045_v9 = vrot.slane %v10815_v23, 5  ;;  %v5952_v0 = vld [vmem:[#allocation2 + $0x78] sm:$0xe] }
 0x42d   : > { %7960 = vmatpush3.bf16.msra.mxu0 %v8421_v43  ;;  %v5547_v31 = vshll.u32 %v11098_v55, 16  ;;  %v5552_v40 = vshrl.u32 %v11112_v49, 16  ;;  %v7152_v42 = vrot.slane %v5950_v12, 9  ;;  %v6052_v28 = vrot.slane %v11746_v45, 5  ;;  %v11147_v43 = vld [vmem:[#allocation2 + $0xb8] sm:$0xf] }
 0x42e   : > { %v11135_v18 = vsel %vm10302_vm0, %v7150_v26, %v6038_v16  ;;  %v11139_v58 = vsel %vm10302_vm0, %v6040_v25, %v6041_v33  ;;  %v6047_v7 = vrot.slane %v6045_v9, 4  ;;  %v6048_v23 = vrot.slane %v11747_v1, 5  ;;  %v3582_v12 = vld [vmem:[#allocation2 + $0x78] sm:$0xf]  ;;  %v11188_v25 = vld [vmem:[#allocation2 + $0xc4] sm:$0xf] }
 0x42f   : > { %v5516_v46 = vsel %vm9463_vm10, %v11120_v32, %v11072_v8  ;;  %v7166_v39 = vcombine.low %v11135_v18, %v11139_v58  ;;  %v6054_v11 = vrot.slane %v6052_v28, 4  ;;  %v6055_v21 = vrot.slane %v11748_v19, 5 }
 0x430   : > { %7930 = vmatmul.mubr.msk.bf16.gmra.mrb[12].mxu0 %vm342_vm1, %v7115_v2  ;;  %v11152_v62 = vrot.slane %v5520_v56, 4  ;;  %v5543_v52 = vrot.slane %v5541_v57, 4  ;;  %v11156_v14 = vsel %vm10302_vm0, %v7151_v37, %v6045_v9  ;;  %v11160_v44 = vsel %vm10302_vm0, %v6047_v7, %v6048_v23  ;;  %v11752_v37 = vld [vmem:[#allocation25_spill] sm:$0xff] }
 0x431   : > { %7933 = vmatprep.mubr.msk.bf16.mxu0 %vm342_vm1, %v7116_v63  ;;  %v11751_v13 = vcombine.low %v11749_v27, %v11750_v20  ;;  %v5555_v34 = vshll.u32 %v11112_v49, 16  ;;  %v7167_v2 = vcombine.low %v11156_v14, %v11160_v44  ;;  %v11171_v63 = vsel %vm10302_vm0, %v7152_v42, %v6052_v28  ;;  %v11753_v42 = vld [vmem:[#allocation17_spill] sm:$0xff]  ;;  %v11754_v27 = vld [vmem:[#allocation19_spill] sm:$0xff]  ;;  %v11755_v20 = vld [vmem:[#allocation20_spill] sm:$0xff] }
 0x432   : > { %v11175_v30 = vsel %vm10302_vm0, %v6054_v11, %v6055_v21  ;;  %v11178_v38 = vrot.slane %v5534_v15, 4  ;;  %v11180_v26 = vrot.slane %v5547_v31, 5  ;;  %v5561_v49 = vshll.u32 %v11147_v43, 16 }
 0x433   : > { %7746 = vmatmul.mubr.msk.bf16.gmra.mrb[28].mxu1 %vm342_vm1, %v11751_v13  ;;  %v7168_v16 = vcombine.low %v11171_v63, %v11175_v30  ;;  %v11185_v56 = vrot.slane %v5552_v40, 4  ;;  %v5565_v57 = vshrl.u32 %v11147_v43, 16  ;;  %v7153_v33 = vrot.slane %v5951_v3, 9 }
 0x434   : > { %7749 = vmatprep.mubr.msk.bf16.mxu1 %vm342_vm1, %v6928_v60  ;;  %v6059_v9 = vrot.slane %v11752_v37, 5  ;;  %v5544_v60 = vor.u32 %v5543_v52, %v11124_v47  ;;  %v5576_v15 = vshrl.u32 %v5233_v35, 16  ;;  %v7154_v31 = vrot.slane %v5952_v0, 9  ;;  %v11204_v52 = vld [vmem:[#allocation2 + $0xbc] sm:$0x1] }
 0x435   : > { %v6066_v45 = vrot.slane %v11753_v42, 5  ;;  %v5579_v28 = vshll.u32 %v5233_v35, 16  ;;  %v6062_v1 = vrot.slane %v10980_v4, 5  ;;  %v3820_v23 = vshrl.u32 %v3582_v12, 16  ;;  %v8414_v35 = vld [vmem:[#allocation2 + $0xc] sm:$0xff]  }
 0x436   : > { %v6061_v7 = vrot.slane %v6059_v9, 4  ;;  %v5585_v40 = vshll.u32 %v11188_v25, 16  ;;  %v11199_v11 = vsel %vm10302_vm0, %v7153_v33, %v6059_v9  ;;  %v6069_v21 = vrot.slane %v10988_v59, 5 }
 0x437   : > { %v6068_v19 = vrot.slane %v6066_v45, 4  ;;  %v3822_v3 = vrot.slane %v3820_v23, 4  ;;  %v3842_v13 = vsel %vm9463_vm10, %v11755_v20, %v11754_v27  ;;  %v5589_v0 = vshrl.u32 %v11188_v25, 16  ;;  %v11756_v23 = vld [vmem:[#allocation13_spill] sm:$0xff] }
 0x438   : > { %7934 = vmatmul.mubr.msk.bf16.gmra.mrb[16].mxu0 %vm342_vm1, %v11104_v54  ;;  %v11208_v4 = vsel %vm10302_vm0, %v6061_v7, %v6062_v1  ;;  %v3823_v54 = vshll.u32 %v3582_v12, 16  ;;  %v5953_v12 = vld [vmem:[#allocation2 + $0x84] sm:$0xe]  ;;  %v5526_v37 = vsel %vm9463_vm10, %v11152_v62, %v11110_v36  ;;  %v5557_v9 = vrot.slane %v5555_v34, 5  ;;  %v5236_v7 = vld [vmem:[#allocation2 + $0xcc] sm:$0xf] }
 0x439   : > { %7937 = vmatprep.mubr.msk.bf16.mxu0 %vm342_vm1, %v11106_v48  ;;  %v11219_v48 = vsel %vm10302_vm0, %v7154_v31, %v6066_v45  ;;  %v11223_v33 = vsel %vm10302_vm0, %v6068_v19, %v6069_v21  ;;  %v5540_v45 = vsel %vm9463_vm10, %v11178_v38, %v11124_v47  ;;  %v11240_v6 = vrot.slane %v5561_v49, 5  ;;  %v11243_v36 = vld [vmem:[#allocation2 + $0xd0] sm:$0xf] }
 0x43a   : > { %v3825_v42 = vrot.slane %v3823_v54, 5  ;;  %v5567_v50 = vrot.slane %v5565_v57, 4  ;;  %v5545_v1 = vrot.slane %v5544_v60, 4  ;;  %v7155_v34 = vrot.slane %v5953_v12, 9 }
 0x43b   : > { %7750 = vmatmul.mubr.msk.bf16.gmra.mrb[32].mxu1 %vm342_vm1, %v6929_v24  ;;  %v5571_v24 = vshll.u32 %v11204_v52, 16  ;;  %v6073_v19 = vrot.slane %v11756_v23, 5  ;;  %v5578_v21 = vrot.slane %v5576_v15, 4  ;;  %v5581_v54 = vrot.slane %v5579_v28, 5  ;;  %v8415_v28 = vld [vmem:[#allocation2 + $0x18] sm:$0xff]   ;;  %v8417_v23 = vld [vmem:[#allocation2 + $0x24] sm:$0xff]  }
 0x43c   : > { %7761 = vmatprep.mubr.msk.bf16.mxu1 %vm342_vm1, %v8414_v35  ;;  %v3826_v62 = vor.u32 %v3825_v42, %v3822_v3  ;;  %v11246_v27 = vrot.slane %v5585_v40, 5  ;;  %v5591_v20 = vrot.slane %v5589_v0, 4  ;;  %v5954_v35 = vld [vmem:[#allocation2 + $0x90] sm:$0xe]  ;;  %v5600_v47 = vshrl.u32 %v5236_v7, 16  ;;  %v11757_v42 = vld [vmem:[#allocation26_spill] sm:$0xff] }
 0x43d   : > { %v6075_v49 = vrot.slane %v6073_v19, 4  ;;  %v6076_v57 = vrot.slane %v11010_v61, 5  ;;  %v5603_v60 = vshll.u32 %v5236_v7, 16  ;;  %v5609_v3 = vshll.u32 %v11243_v36, 16  ;;  %v11256_v40 = vld [vmem:[#allocation2 + $0xc8] sm:$0x1] }
 0x43e   : > { %v3827_v38 = vrot.slane %v3826_v62, 4  ;;  %v5613_v12 = vshrl.u32 %v11243_v36, 16  ;;  %v6080_v15 = vrot.slane %v11757_v42, 5  ;;  %v11758_v0 = vld [vmem:[#allocation14_spill] sm:$0xff]  ;;  %v7156_v62 = vrot.slane %v5954_v35, 9  ;;  %v11759_v35 = vld [vmem:[#allocation24_spill] sm:$0xff] }
 0x43f   : > { %v11267_v7 = vsel %vm10302_vm0, %v6075_v49, %v6076_v57  ;;  %v5558_v42 = vor.u32 %v5557_v9, %v11185_v56  ;;  %v6083_v49 = vrot.slane %v11027_v17, 5  ;;  %v5550_v56 = vsel %vm9463_vm10, %v5545_v1, %v11180_v26  ;;  %v8603_v57 = vld [vmem:[#allocation8 + $0x88] sm:$0xff]  }
 0x440   : > { %7938 = vmatmul.mubr.msk.bf16.gmra.mrb[20].mxu0 %vm342_vm1, %v11108_v5  ;;  %v3832_v61 = vsel %vm9463_vm10, %v3827_v38, %v11758_v0  ;;  %v11263_v5 = vsel %vm10302_vm0, %v7155_v34, %v6073_v19  ;;  %v5582_v38 = vor.u32 %v5581_v54, %v5578_v21  ;;  %v5592_v34 = vor.u32 %v5591_v20, %v11246_v27  ;;  %v11284_v21 = vld [vmem:[#allocation2 + $0xd4] sm:$0x1] }
 0x441   : > { %7941 = vmatprep.mubr.msk.bf16.mxu0 %vm342_vm1, %v11118_v51  ;;  %v5568_v51 = vor.u32 %v5567_v50, %v11240_v6  ;;  %v11271_v31 = vcombine.low %v3832_v61, %v3842_v13  ;;  %v7171_v59 = vcombine.low %v11263_v5, %v11267_v7  ;;  %v6082_v19 = vrot.slane %v6080_v15, 4 }
 0x442   : > { %v5595_v13 = vshll.u32 %v11256_v40, 16  ;;  %v5602_v9 = vrot.slane %v5600_v47, 4  ;;  %v5605_v50 = vrot.slane %v5603_v60, 5  ;;  %v11286_v54 = vrot.slane %v5609_v3, 5 }
 0x443   : > { %7762 = vmatmul.mubr.msk.bf16.vlgmr.msra.gmra.mrb[4].mxu1 %vm342_vm1, %v8415_v28  ;;  %v5615_v20 = vrot.slane %v5613_v12, 4  ;;  %v11290_v17 = vsel %vm10302_vm0, %v7156_v62, %v6080_v15  ;;  %v11294_v28 = vsel %vm10302_vm0, %v6082_v19, %v6083_v49  ;;  %v7121_v26 = vcombine.low %v5516_v46, %v5526_v37  ;;  %v5955_v15 = vld [vmem:[#allocation2 + $0x9c] sm:$0xe]  ;;  %v8418_v62 = vld [vmem:[#allocation2 + $0x30] sm:$0xff]  }
 0x444   : > { %7765 = vmatprep.mubr.msk.bf16.mxu1 %vm342_vm1, %v8417_v23  ;;  %8021 = vmatpush3.bf16.msra.mxu1 %v11759_v35  ;;  %v5559_v1 = vrot.slane %v5558_v42, 4  ;;  %v7172_v47 = vcombine.low %v11290_v17, %v11294_v28  ;;  %v7122_v60 = vcombine.low %v5540_v45, %v5550_v56  ;;  %v5569_v3 = vrot.slane %v5568_v51, 4  ;;  %v8604_v45 = vld [vmem:[#allocation8 + $0x90] sm:$0xff]   ;;  %v8419_v23 = vld [vmem:[#allocation2 + $0x3c] sm:$0xff]  }
 0x445   : > { %8018 = vmatprep.subr.bf16.mxu1 %v8603_v57  ;;  %v5583_v12 = vrot.slane %v5582_v38, 4  ;;  %v5593_v0 = vrot.slane %v5592_v34, 4  ;;  %v5619_v61 = vshll.u32 %v11284_v21, 16  ;;  %v5573_v8 = vrot.slane %v5571_v24, 5  ;;  %v5956_v38 = vld [vmem:[#allocation2 + $0xa8] sm:$0xe] }
 0x446   : > { %v5597_v32 = vrot.slane %v5595_v13, 5  ;;  %v5606_v46 = vor.u32 %v5605_v50, %v5602_v9  ;;  %v5616_v37 = vor.u32 %v5615_v20, %v11286_v54  ;;  %v7157_v42 = vrot.slane %v5955_v15, 9  ;;  %v8605_v35 = vld [vmem:[#allocation2 + $0x1c] sm:$0xf] }
 0x447   : > { %v6087_v51 = vrot.slane %v11029_v41, 5  ;;  %v5564_v34 = vsel %vm9463_vm10, %v5559_v1, %v11240_v6  ;;  %v5574_v24 = vsel %vm9463_vm10, %v5569_v3, %v5573_v8  ;;  %v5588_v19 = vsel %vm9463_vm10, %v5583_v12, %v11246_v27  ;;  %v5944_v12 = vld [vmem:[#allocation2 + $0x18] sm:$0xe] }
 0x448   : > { %7942 = vmatmul.mubr.msk.bf16.gmra.mrb[24].mxu0 %vm342_vm1, %v7121_v26  ;;  %8022 = vmatpush3.bf16.msra.mxu1 %v8603_v57  ;;  %v5598_v49 = vsel %vm9463_vm10, %v5593_v0, %v5597_v32  ;;  %v5621_v41 = vrot.slane %v5619_v61, 5  ;;  %v6010_v56 = vrot.slane %v8605_v35, 5  ;;  %v6090_v9 = vrot.slane %v11046_v29, 5  ;;  %v8606_v57 = vld [vmem:[#allocation8 + $0x98] sm:$0xff]   ;;  %v8420_v61 = vld [vmem:[#allocation2 + $0x48] sm:$0xff]  }
 0x449   : > { %7945 = vmatprep.mubr.msk.bf16.mxu0 %vm342_vm1, %v7122_v60  ;;  %8019 = vmatprep.subr.bf16.mxu1 %v8604_v45  ;;  %v6089_v13 = vrot.slane %v6087_v51, 4  ;;  %v5607_v6 = vrot.slane %v5606_v46, 4  ;;  %v5617_v50 = vrot.slane %v5616_v37, 4  ;;  %v7158_v20 = vrot.slane %v5956_v38, 9  ;;  %v8422_v46 = vld [vmem:[#allocation2 + $0x54] sm:$0xff]  }
 0x44a   : > { %v6094_v26 = vrot.slane %v11059_v53, 5  ;;  %v7123_v27 = vcombine.low %v5564_v34, %v5574_v24  ;;  %v11326_v1 = vsel %vm10302_vm0, %v7157_v42, %v6087_v51  ;;  %v7124_v3 = vcombine.low %v5588_v19, %v5598_v49  ;;  %v8608_v42 = vld [vmem:[#allocation2 + $0x28] sm:$0xf]  ;;  %v5957_v38 = vld [vmem:[#allocation2 + $0xb4] sm:$0xe] }
 0x44b   : > { %7766 = vmatmul.mubr.msk.bf16.gmra.mrb[8].mxu1 %vm342_vm1, %v8418_v62  ;;  %v11330_v60 = vsel %vm10302_vm0, %v6089_v13, %v6090_v9  ;;  %v6097_v15 = vrot.slane %v11098_v55, 5  ;;  %v6012_v53 = vrot.slane %v6010_v56, 4  ;;  %v5612_v62 = vsel %vm9463_vm10, %v5607_v6, %v11286_v54  ;;  %v8609_v19 = vld [vmem:[#allocation2 + $0x34] sm:$0xf]  ;;  %v5946_v35 = vld [vmem:[#allocation2 + $0x30] sm:$0xe] }
 0x44c   : > { %7769 = vmatprep.mubr.msk.bf16.mxu1 %vm342_vm1, %v8419_v23  ;;  %8023 = vmatpush3.bf16.msra.mxu1 %v8604_v45  ;;  %v7173_v29 = vcombine.low %v11326_v1, %v11330_v60  ;;  %v6096_v0 = vrot.slane %v6094_v26, 4  ;;  %v5622_v8 = vsel %vm9463_vm10, %v5617_v50, %v5621_v41  ;;  %v11344_v32 = vsel %vm10302_vm0, %v7158_v20, %v6094_v26  ;;  %v8607_v45 = vld [vmem:[#allocation2 + $0x20] sm:$0x1]  ;;  %v5945_v41 = vld [vmem:[#allocation2 + $0x24] sm:$0xe] }
 0x44d   : > { %8020 = vmatprep.subr.bf16.mxu1 %v8606_v57  ;;  %v7146_v37 = vrot.slane %v5944_v12, 9  ;;  %v6013_v23 = vrot.slane %v8607_v45, 5  ;;  %v6017_v51 = vrot.slane %v8608_v42, 5  ;;  %v7125_v34 = vcombine.low %v5612_v62, %v5622_v8  ;;  %v8610_v26 = vld [vmem:[#allocation2 + $0x2c] sm:$0x1] }
 0x44e   : > { %v11348_v55 = vsel %vm10302_vm0, %v6096_v0, %v6097_v15  ;;  %v6024_v49 = vrot.slane %v8609_v19, 5  ;;  %v7159_v6 = vrot.slane %v5957_v38, 9  ;;  %v6101_v50 = vrot.slane %v11147_v43, 5  ;;  %v8424_v8 = vld [vmem:[#allocation2 + $0x6c] sm:$0xff]  }
 0x44f   : > { %v7174_v54 = vcombine.low %v11344_v32, %v11348_v55  ;;  %v6014_v24 = vsel %vm10302_vm0, %v6012_v53, %v6013_v23  ;;  %v6011_v13 = vsel %vm10302_vm0, %v7146_v37, %v6010_v56  ;;  %v6019_v9 = vrot.slane %v6017_v51, 4  ;;  %v8423_v53 = vld [vmem:[#allocation2 + $0x60] sm:$0xff]  }
 0x450   : > { %7946 = vmatmul.mubr.msk.bf16.gmra.mrb[28].mxu0 %vm342_vm1, %v7123_v27  ;;  %8024 = vmatpush3.bf16.msra.mxu1 %v8606_v57  ;;  %v5958_v57 = vld [vmem:[#allocation2 + $0xc0] sm:$0xe]  ;;  %v7162_v20 = vcombine.low %v6011_v13, %v6014_v24  ;;  %v6020_v27 = vrot.slane %v8610_v26, 5  ;;  %v6103_v12 = vrot.slane %v6101_v50, 4  ;;  %v6104_v0 = vrot.slane %v11204_v52, 5 }
 0x451   : > { %7949 = vmatprep.mubr.msk.bf16.mxu0 %vm342_vm1, %v7124_v3  ;;  %v6026_v3 = vrot.slane %v6024_v49, 4  ;;  %v6108_v15 = vrot.slane %v11188_v25, 5  ;;  %v7147_v56 = vrot.slane %v5945_v41, 9  ;;  %v7160_v62 = vrot.slane %v5958_v57, 9  ;;  %v5959_v25 = vld [vmem:[#allocation2 + $0xcc] sm:$0xe] }
 0x452   : > { %v6021_v43 = vsel %vm10302_vm0, %v6019_v9, %v6020_v27  ;;  %v11367_v45 = vsel %vm10302_vm0, %v7159_v6, %v6101_v50  ;;  %v11371_v52 = vsel %vm10302_vm0, %v6103_v12, %v6104_v0  ;;  %v8612_v23 = vld [vmem:[#allocation2 + $0x40] sm:$0xf]  ;;  %v6111_v24 = vrot.slane %v11256_v40, 5  ;;  %v8425_v12 = vld [vmem:[#allocation2 + $0x78] sm:$0xff]  }
 0x453   : > { %7770 = vmatmul.mubr.msk.bf16.gmra.mrb[12].mxu1 %vm342_vm1, %v8420_v61  ;;  %v7148_v61 = vrot.slane %v5946_v35, 9  ;;  %v6031_v42 = vrot.slane %v8612_v23, 5  ;;  %v7175_v38 = vcombine.low %v11367_v45, %v11371_v52  ;;  %v6018_v41 = vsel %vm10302_vm0, %v7147_v56, %v6017_v51  ;;  %v5947_v35 = vld [vmem:[#allocation2 + $0x3c] sm:$0xe]  ;;  %v8426_v56 = vld [vmem:[#allocation2 + $0x84] sm:$0xff]  }
 0x454   : > { %7773 = vmatprep.mubr.msk.bf16.mxu1 %vm342_vm1, %v8422_v46  ;;  %v8611_v46 = vld [vmem:[#allocation2 + $0x38] sm:$0x1]  ;;  %v11384_v13 = vsel %vm10302_vm0, %v7160_v62, %v6108_v15  ;;  %v7161_v6 = vrot.slane %v5959_v25, 9  ;;  %v7163_v50 = vcombine.low %v6018_v41, %v6021_v43  ;;  %v6115_v51 = vrot.slane %v11243_v36, 5 }
 0x455   : > { %v6027_v37 = vrot.slane %v8611_v46, 5  ;;  %v6025_v40 = vsel %vm10302_vm0, %v7148_v61, %v6024_v49  ;;  %v6033_v26 = vrot.slane %v6031_v42, 4  ;;  %v6118_v27 = vrot.slane %v11284_v21, 5  ;;  %v11760_v0 = vld [vmem:[#allocation21_spill] sm:$0xff]  ;;  %v3579_v61 = vld [vmem:[#allocation2 + $0x6c] sm:$0xf] }
 0x456   : > { %v11401_v49 = vsel %vm10302_vm0, %v7161_v6, %v6115_v51  ;;  %v3796_v43 = vshrl.u32 %v3579_v61, 16  ;;  %v3799_v46 = vshll.u32 %v3579_v61, 16  ;;  %v3585_v6 = vld [vmem:[#allocation2 + $0x84] sm:$0xf]  ;;  %v8430_v61 = vld [vmem:[#allocation2 + $0xb4] sm:$0xff]  }
 0x457   : > { %v6028_v19 = vsel %vm10302_vm0, %v6026_v3, %v6027_v37  ;;  %v7149_v3 = vrot.slane %v5947_v35, 9  ;;  %v8613_v37 = vld [vmem:[#allocation2 + $0x70] sm:$0xf]  ;;  %v8428_v35 = vld [vmem:[#allocation2 + $0x9c] sm:$0xff]  }
 0x458   : > { %7950 = vmatmul.mubr.msk.bf16.gmra.mrb[32].mxu0 %vm342_vm1, %v7125_v34  ;;  %v6110_v34 = vrot.slane %v6108_v15, 4  ;;  %v6034_v15 = vrot.slane %v11760_v0, 5  ;;  %v3805_v25 = vshll.u32 %v8613_v37, 16  ;;  %v3809_v23 = vshrl.u32 %v8613_v37, 16 }
 0x459   : > { %7961 = vmatprep.mubr.msk.bf16.mxu0 %vm342_vm1, %v7162_v20  ;;  %v7164_v20 = vcombine.low %v6025_v40, %v6028_v19  ;;  %v6032_v62 = vsel %vm10302_vm0, %v7149_v3, %v6031_v42  ;;  %v3798_v19 = vrot.slane %v3796_v43, 4  ;;  %v3801_v22 = vrot.slane %v3799_v46, 5  ;;  %v8615_v3 = vld [vmem:[#allocation2 + $0x88] sm:$0xf] }
 0x45a   : > { %v11388_v9 = vsel %vm10302_vm0, %v6110_v34, %v6111_v24  ;;  %v6035_v36 = vsel %vm10302_vm0, %v6033_v26, %v6034_v15  ;;  %v8427_v24 = vld [vmem:[#allocation2 + $0x90] sm:$0xff]   ;;  %v3807_v42 = vrot.slane %v3805_v25, 5  ;;  %v3811_v41 = vrot.slane %v3809_v23, 4 }
 0x45b   : > { %7774 = vmatmul.mubr.msk.bf16.gmra.mrb[16].mxu1 %vm342_vm1, %v8423_v53  ;;  %v7176_v57 = vcombine.low %v11384_v13, %v11388_v9  ;;  %v6117_v53 = vrot.slane %v6115_v51, 4  ;;  %v7165_v34 = vcombine.low %v6032_v62, %v6035_v36  ;;  %v3844_v51 = vshrl.u32 %v3585_v6, 16 }
 0x45c   : > { %7777 = vmatprep.mubr.msk.bf16.mxu1 %vm342_vm1, %v8424_v8  ;;  %v3812_v40 = vor.u32 %v3811_v41, %v3807_v42  ;;  %v3853_v18 = vshll.u32 %v8615_v3, 16  ;;  %v3857_v58 = vshrl.u32 %v8615_v3, 16 }
 0x45d   : > { %v11408_v21 = vsel %vm10302_vm0, %v6117_v53, %v6118_v27  ;;  %v3847_v27 = vshll.u32 %v3585_v6, 16  ;;  %v3846_v36 = vrot.slane %v3844_v51, 4  ;;  %v11761_v51 = vcombine.low %v11199_v11, %v11208_v4 }
 0x45e   : > { %v7177_v8 = vcombine.low %v11401_v49, %v11408_v21  ;;  %v3813_v15 = vrot.slane %v3812_v40, 4  ;;  %v11430_v43 = vrot.slane %v3853_v18, 5  ;;  %v3859_v46 = vrot.slane %v3857_v58, 4  ;;  %v8431_v58 = vld [vmem:[#allocation2 + $0xc0] sm:$0xff]  }
 0x45f   : > { %v3849_v62 = vrot.slane %v3847_v27, 5 }
 0x460   : > { %7962 = vmatmul.mubr.msk.bf16.vlgmr.msra.gmra.mrb[4].mxu0 %vm342_vm1, %v7163_v50  ;;  %v3802_v50 = vor.u32 %v3801_v22, %v3798_v19  ;;  %v3860_v41 = vor.u32 %v3859_v46, %v11430_v43 }
 0x461   : > { %7965 = vmatprep.mubr.msk.bf16.mxu0 %vm342_vm1, %v7164_v20  ;;  %v8614_v20 = vld [vmem:[#allocation2 + $0x74] sm:$0x1]  ;;  %v3850_v22 = vor.u32 %v3849_v62, %v3846_v36 }
 0x462   : > { %v3815_v26 = vshll.u32 %v8614_v20, 16  ;;  %v3803_v0 = vrot.slane %v3802_v50, 4  ;;  %v3597_v62 = vld [vmem:[#allocation2 + $0xb4] sm:$0xf] }
 0x463   : > { %7778 = vmatmul.mubr.msk.bf16.gmra.mrb[20].mxu1 %vm342_vm1, %v8425_v12  ;;  %v8429_v12 = vld [vmem:[#allocation2 + $0xa8] sm:$0xff]  }
 0x464   : > { %7781 = vmatprep.mubr.msk.bf16.mxu1 %vm342_vm1, %v8426_v56  ;;  %v3817_v53 = vrot.slane %v3815_v26, 5  ;;  %v3591_v56 = vld [vmem:[#allocation2 + $0x9c] sm:$0xf] }
 0x465   : > { %v3892_v63 = vshrl.u32 %v3591_v56, 16  ;;  %v3895_v30 = vshll.u32 %v3591_v56, 16 }
 0x466   : > { %v3818_v19 = vsel %vm9463_vm10, %v3813_v15, %v3817_v53  ;;  %v3861_v15 = vrot.slane %v3860_v41, 4  ;;  %v3594_v53 = vld [vmem:[#allocation2 + $0xa8] sm:$0xf] }
 0x467   : > { %v3894_v27 = vrot.slane %v3892_v63, 4  ;;  %v3916_v46 = vshrl.u32 %v3594_v53, 16 }
 0x468   : > { %7966 = vmatmul.mubr.msk.bf16.gmra.mrb[8].mxu0 %vm342_vm1, %v7165_v34 }
 0x469   : > { %7969 = vmatprep.mubr.msk.bf16.mxu0 %vm342_vm1, %v7166_v39  ;;  %v3588_v39 = vld [vmem:[#allocation2 + $0x90] sm:$0xf] }
 0x46a   : > { %v3868_v14 = vshrl.u32 %v3588_v39, 16  ;;  %v3871_v44 = vshll.u32 %v3588_v39, 16  ;;  %v11762_v39 = vcombine.low %v11219_v48, %v11223_v33  ;;  %v3919_v48 = vshll.u32 %v3594_v53, 16  ;;  %v8619_v33 = vld [vmem:[#allocation2 + $0xac] sm:$0xf] }
 0x46b   : > { %7782 = vmatmul.mubr.msk.bf16.gmra.mrb[24].mxu1 %vm342_vm1, %v8427_v24  ;;  %v3808_v24 = vsel %vm9463_vm10, %v3803_v0, %v3807_v42  ;;  %v3897_v42 = vrot.slane %v3895_v30, 5  ;;  %v3851_v0 = vrot.slane %v3850_v22, 4  ;;  %v8621_v30 = vld [vmem:[#allocation2 + $0xa4] sm:$0x1] }
 0x46c   : > { %7785 = vmatprep.mubr.msk.bf16.mxu1 %vm342_vm1, %v8428_v35  ;;  %v8618_v35 = vld [vmem:[#allocation2 + $0x8c] sm:$0x1]  ;;  %v3870_v50 = vrot.slane %v3868_v14, 4  ;;  %v3873_v40 = vrot.slane %v3871_v44, 5  ;;  %v3925_v14 = vshll.u32 %v8619_v33, 16  ;;  %v3929_v44 = vshrl.u32 %v8619_v33, 16 }
 0x46d   : > { %v3863_v6 = vshll.u32 %v8618_v35, 16 }
 0x46e   : > { %v3874_v4 = vor.u32 %v3873_v40, %v3870_v50  ;;  %v3918_v50 = vrot.slane %v3916_v46, 4  ;;  %v3921_v40 = vrot.slane %v3919_v48, 5 }
 0x46f   : > { %v3865_v11 = vrot.slane %v3863_v6, 5 }
 0x470   : > { %7970 = vmatmul.mubr.msk.bf16.gmra.mrb[12].mxu0 %vm342_vm1, %v7167_v2  ;;  %v8616_v2 = vld [vmem:[#allocation2 + $0x94] sm:$0xf]  ;;  %v3875_v41 = vrot.slane %v3874_v4, 4 }
 0x471   : > { %7973 = vmatprep.mubr.msk.bf16.mxu0 %vm342_vm1, %v7168_v16  ;;  %v3877_v37 = vshll.u32 %v8616_v2, 16  ;;  %v3881_v25 = vshrl.u32 %v8616_v2, 16  ;;  %v8617_v16 = vld [vmem:[#allocation2 + $0xa0] sm:$0xf]  ;;  %v3856_v2 = vsel %vm9463_vm10, %v3851_v0, %v11430_v43 }
 0x472   : > { %v3901_v23 = vshll.u32 %v8617_v16, 16  ;;  %v3905_v34 = vshrl.u32 %v8617_v16, 16  ;;  %v3911_v16 = vshll.u32 %v8621_v30, 16 }
 0x473   : > { %7786 = vmatmul.mubr.msk.bf16.gmra.mrb[28].mxu1 %vm342_vm1, %v8429_v12  ;;  %v11439_v20 = vrot.slane %v3877_v37, 5  ;;  %v3883_v26 = vrot.slane %v3881_v25, 4  ;;  %v6994_v12 = vcombine.low %v3808_v24, %v3818_v19  ;;  %v3866_v37 = vsel %vm9463_vm10, %v3861_v15, %v3865_v11  ;;  %v8620_v25 = vld [vmem:[#allocation2 + $0x98] sm:$0x1]  ;;  %v8623_v11 = vld [vmem:[#allocation2 + $0xc4] sm:$0xf] }
 0x474   : > { %7789 = vmatprep.mubr.msk.bf16.mxu1 %vm342_vm1, %v8430_v61  ;;  %v11445_v3 = vrot.slane %v3901_v23, 5  ;;  %v3907_v18 = vrot.slane %v3905_v34, 4  ;;  %v3898_v61 = vor.u32 %v3897_v42, %v3894_v27  ;;  %v3887_v63 = vshll.u32 %v8620_v25, 16  ;;  %v8622_v24 = vld [vmem:[#allocation2 + $0xb8] sm:$0xf] }
 0x475   : > { %v3884_v56 = vor.u32 %v3883_v26, %v11439_v20  ;;  %v3940_v23 = vshrl.u32 %v3597_v62, 16  ;;  %v3943_v34 = vshll.u32 %v3597_v62, 16  ;;  %v3949_v19 = vshll.u32 %v8622_v24, 16  ;;  %v8624_v62 = vld [vmem:[#allocation2 + $0xb0] sm:$0x1] }
 0x476   : > { %v3908_v36 = vor.u32 %v3907_v18, %v11445_v3  ;;  %v3953_v22 = vshrl.u32 %v8622_v24, 16  ;;  %v3899_v43 = vrot.slane %v3898_v61, 4  ;;  %v3927_v26 = vrot.slane %v3925_v14, 5  ;;  %v8625_v14 = vld [vmem:[#allocation2 + $0xbc] sm:$0x1] }
 0x477   : > { %v3885_v35 = vrot.slane %v3884_v56, 4  ;;  %v6996_v27 = vcombine.low %v3856_v2, %v3866_v37  ;;  %v3889_v42 = vrot.slane %v3887_v63, 5  ;;  %v3913_v18 = vrot.slane %v3911_v16, 5  ;;  %v8626_v24 = vld [vmem:[#allocation2 + $0xc8] sm:$0x1] }
 0x478   : > { %7974 = vmatmul.mubr.msk.bf16.gmra.mrb[16].mxu0 %vm342_vm1, %v11761_v51  ;;  %v3909_v6 = vrot.slane %v3908_v36, 4  ;;  %v3931_v51 = vrot.slane %v3929_v44, 4  ;;  %v3945_v5 = vrot.slane %v3943_v34, 5  ;;  %v3951_v7 = vrot.slane %v3949_v19, 5 }
 0x479   : > { %7977 = vmatprep.mubr.msk.bf16.mxu0 %vm342_vm1, %v11762_v39  ;;  %v3600_v39 = vld [vmem:[#allocation2 + $0xc0] sm:$0xf]  ;;  %v3880_v17 = vsel %vm9463_vm10, %v3875_v41, %v11439_v20  ;;  %v3890_v28 = vsel %vm9463_vm10, %v3885_v35, %v3889_v42  ;;  %v3973_v4 = vshll.u32 %v8623_v11, 16  ;;  %v3977_v56 = vshrl.u32 %v8623_v11, 16 }
 0x47a   : > { %v3932_v0 = vor.u32 %v3931_v51, %v3927_v26  ;;  %v3964_v15 = vshrl.u32 %v3600_v39, 16  ;;  %v3967_v53 = vshll.u32 %v3600_v39, 16  ;;  %v6997_v20 = vcombine.low %v3880_v17, %v3890_v28  ;;  %v11521_v17 = vld [vmem:[%s11630_s5] ss:$0 sm:$0xff] }
 0x47b   : > { %7790 = vmatmul.mubr.msk.bf16.gmra.mrb[32].mxu1 %vm342_vm1, %v8431_v58  ;;  %v3955_v58 = vrot.slane %v3953_v22, 4  ;;  %v3959_v44 = vshll.u32 %v8625_v14, 16  ;;  %v3975_v25 = vrot.slane %v3973_v4, 5  ;;  %v3979_v63 = vrot.slane %v3977_v56, 4 }
 0x47c   : > { %7817 = vmatprep.mubr.msk.bf16.mxu1 %vm342_vm1, %v6994_v12  ;;  %v3922_v12 = vor.u32 %v3921_v40, %v3918_v50  ;;  %v3933_v33 = vrot.slane %v3932_v0, 4  ;;  %v3966_v2 = vrot.slane %v3964_v15, 4  ;;  %v3969_v37 = vrot.slane %v3967_v53, 5 }
 0x47d   : > { %v3956_v36 = vor.u32 %v3955_v58, %v3951_v7  ;;  %v3961_v30 = vrot.slane %v3959_v44, 5  ;;  %v3980_v16 = vor.u32 %v3979_v63, %v3975_v25  ;;  %v3983_v19 = vshll.u32 %v8626_v24, 16 }
 0x47e   : > { %v3923_v48 = vrot.slane %v3922_v12, 4 }
 0x47f   : > { %v3957_v60 = vrot.slane %v3956_v36, 4 }
 0x480   : > { %7978 = vmatmul.mubr.msk.bf16.gmra.mrb[20].mxu0 %vm342_vm1, %v7171_v59  ;;  %v3942_v59 = vrot.slane %v3940_v23, 4  ;;  %v3928_v32 = vsel %vm9463_vm10, %v3923_v48, %v3927_v26 }
 0x481   : > { %7981 = vmatprep.mubr.msk.bf16.mxu0 %vm342_vm1, %v7172_v47  ;;  %v3904_v47 = vsel %vm9463_vm10, %v3899_v43, %v11445_v3  ;;  %v3935_v3 = vshll.u32 %v8624_v62, 16  ;;  %v3962_v34 = vsel %vm9463_vm10, %v3957_v60, %v3961_v30  ;;  %v3981_v43 = vrot.slane %v3980_v16, 4 }
 0x482   : > { %v3946_v61 = vor.u32 %v3945_v5, %v3942_v59 }
 0x483   : > { %7818 = vmatmul.mubr.msk.bf16.vlgmr.msra.gmra.mrb[20].mxu1 %vm342_vm1, %v11271_v31  ;;  %v3914_v31 = vsel %vm9463_vm10, %v3909_v6, %v3913_v18  ;;  %v3985_v6 = vrot.slane %v3983_v19, 5 }
 0x484   : > { %7821 = vmatprep.mubr.msk.bf16.mxu1 %vm342_vm1, %v6996_v27  ;;  %v6998_v46 = vcombine.low %v3904_v47, %v3914_v31  ;;  %v3947_v1 = vrot.slane %v3946_v61, 4 }
 0x485   : > { %v3986_v52 = vsel %vm9463_vm10, %v3981_v43, %v3985_v6 }
 0x486   : > { %v3952_v23 = vsel %vm9463_vm10, %v3947_v1, %v3951_v7 }
 0x487   : > { %v7000_v41 = vcombine.low %v3952_v23, %v3962_v34 }
 0x488   : > { %7982 = vmatmul.mubr.msk.bf16.gmra.mrb[24].mxu0 %vm342_vm1, %v7173_v29  ;;  %v3937_v29 = vrot.slane %v3935_v3, 5 }
 0x489   : > { %7985 = vmatprep.mubr.msk.bf16.mxu0 %vm342_vm1, %v7174_v54  ;;  %v3970_v54 = vor.u32 %v3969_v37, %v3966_v2 }
 0x48a   : > { %v3938_v55 = vsel %vm9463_vm10, %v3933_v33, %v3937_v29 }
 0x48b   : > { %7822 = vmatmul.mubr.msk.bf16.gmra.mrb[24].mxu1 %vm342_vm1, %v6997_v20  ;;  %v6999_v22 = vcombine.low %v3928_v32, %v3938_v55  ;;  %v3971_v35 = vrot.slane %v3970_v54, 4 }
 0x48c   : > { %7825 = vmatprep.mubr.msk.bf16.mxu1 %vm342_vm1, %v6998_v46 }
 0x48d   : > { %v3976_v45 = vsel %vm9463_vm10, %v3971_v35, %v3975_v25 }
 0x490   : > { %7986 = vmatmul.mubr.msk.bf16.gmra.mrb[28].mxu0 %vm342_vm1, %v7175_v38  ;;  %v7001_v38 = vcombine.low %v3976_v45, %v3986_v52 }
 0x491   : > { %7989 = vmatprep.mubr.msk.bf16.mxu0 %vm342_vm1, %v7176_v57 }
 0x493   : > { %7826 = vmatmul.mubr.msk.bf16.gmra.mrb[28].mxu1 %vm342_vm1, %v6999_v22 }
 0x494   : > { %7829 = vmatprep.mubr.msk.bf16.mxu1 %vm342_vm1, %v7000_v41 }
 0x498   : > { %7990 = vmatmul.mubr.msk.bf16.gmra.mrb[32].mxu0 %vm342_vm1, %v7177_v8 }
 0x49b   : > { %7830 = vmatmul.mubr.msk.bf16.gmra.mrb[32].mxu1 %vm342_vm1, %v7001_v38 }
 0x516   : > { %v7763_v13 = vpop.f32.mrb[4].mxu1 }
 0x517   : > { %v3396_v9 = vpop.f32.mrb[5].mxu1 }
 0x518   : > { %v7764_v57 = vpop.f32.mrb[6].mxu1 }
 0x519   : > { %v3399_v50 = vpop.f32.mrb[7].mxu1 }
 0x51e   : > { %v7767_v40 = vpop.f32.mrb[8].mxu1 }
 0x51f   : > { %v3412_v26 = vpop.f32.mrb[9].mxu1 }
 0x520   : > { %v7768_v51 = vpop.f32.mrb[10].mxu1 }
 0x521   : > { %v3415_v27 = vpop.f32.mrb[11].mxu1 }
 0x526   : > { %v7771_v42 = vpop.f32.mrb[12].mxu1 }
 0x527   : > { %v3428_v10 = vpop.f32.mrb[13].mxu1 }
 0x528   : > { %v7772_v18 = vpop.f32.mrb[14].mxu1 }
 0x529   : > { %v3431_v59 = vpop.f32.mrb[15].mxu1 }
 0x52e   : > { %v7775_v5 = vpop.f32.mrb[16].mxu1 }
 0x52f   : > { %v3444_v49 = vpop.f32.mrb[17].mxu1 }
 0x530   : > { %v7776_v21 = vpop.f32.mrb[18].mxu1 }
 0x531   : > { %v3447_v8 = vpop.f32.mrb[19].mxu1 }
 0x533   : > { %v7963_v7 = vpop.f32.mrb[4].mxu0 }
 0x534   : > { %v8025_v58 = vadd.f32 %v7963_v7, %v7763_v13  ;;  %v6282_v39 = vpop.f32.mrb[5].mxu0 }
 0x535   : > { %v8026_v28 = vadd.f32 %v6282_v39, %v3396_v9  ;;  %v7964_v47 = vpop.f32.mrb[6].mxu0 }
 0x536   : > { %v8027_v31 = vadd.f32 %v7964_v47, %v7764_v57  ;;  %v6285_v12 = vpop.f32.mrb[7].mxu0  ;;  %v6450_v15 = vadd.f32 %v8025_v58, %v11521_v17 }
 0x537   : > { %v8028_v0 = vadd.f32 %v6285_v12, %v3399_v50  ;;  %v6448_v11 = vadd.f32 %v8026_v28, %v11521_v17 }
 0x538   : > { %v6451_v53 = vadd.f32 %v8027_v31, %v11521_v17 }
 0x539   : > { %v6449_v4 = vadd.f32 %v8028_v0, %v11521_v17 }
 0x53a   : > { %v7310_v56 = vpack.c.bf16 %v6451_v53, %v6450_v15 }
 0x53b   : > { %v7305_v61 = vpack.c.bf16 %v6449_v4, %v6448_v11  ;;  %v7967_v36 = vpop.f32.mrb[8].mxu0 }
 0x53c   : > { %7382 = vst [vmem:[%s11528_s11 + $0x8] sm:$0xff] %v7310_v56   ;;  %v8029_v20 = vadd.f32 %v7967_v36, %v7767_v40  ;;  %v6298_v62 = vpop.f32.mrb[9].mxu0 }
 0x53d   : > { %7306 = vst [vmem:[%s11528_s11] sm:$0xff] %v7305_v61   ;;  %v8030_v3 = vadd.f32 %v6298_v62, %v3412_v26  ;;  %v7968_v46 = vpop.f32.mrb[10].mxu0 }
 0x53e   : > { %v8031_v48 = vadd.f32 %v7968_v46, %v7768_v51  ;;  %v6301_v33 = vpop.f32.mrb[11].mxu0  ;;  %v6454_v44 = vadd.f32 %v8029_v20, %v11521_v17 }
 0x53f   : > { %v8032_v14 = vadd.f32 %v6301_v33, %v3415_v27  ;;  %v6452_v37 = vadd.f32 %v8030_v3, %v11521_v17 }
 0x540   : > { %v6455_v2 = vadd.f32 %v8031_v48, %v11521_v17 }
 0x541   : > { %v6453_v25 = vadd.f32 %v8032_v14, %v11521_v17 }
 0x542   : > { %v7320_v63 = vpack.c.bf16 %v6455_v2, %v6454_v44 }
 0x543   : > { %v7315_v1 = vpack.c.bf16 %v6453_v25, %v6452_v37  ;;  %v7971_v60 = vpop.f32.mrb[12].mxu0 }
 0x544   : > { %7384 = vst [vmem:[%s11528_s11 + $0x18] sm:$0xff] %v7320_v63   ;;  %v8033_v29 = vadd.f32 %v7971_v60, %v7771_v42  ;;  %v6314_v30 = vpop.f32.mrb[13].mxu0 }
 0x545   : > { %7383 = vst [vmem:[%s11528_s11 + $0x10] sm:$0xff] %v7315_v1   ;;  %v8034_v32 = vadd.f32 %v6314_v30, %v3428_v10  ;;  %v7972_v55 = vpop.f32.mrb[14].mxu0 }
 0x546   : > { %v8035_v54 = vadd.f32 %v7972_v55, %v7772_v18  ;;  %v6317_v16 = vpop.f32.mrb[15].mxu0  ;;  %v6458_v34 = vadd.f32 %v8033_v29, %v11521_v17 }
 0x547   : > { %v8036_v23 = vadd.f32 %v6317_v16, %v3431_v59  ;;  %v6456_v19 = vadd.f32 %v8034_v32, %v11521_v17 }
 0x548   : > { %v6459_v24 = vadd.f32 %v8035_v54, %v11521_v17 }
 0x549   : > { %v6457_v22 = vadd.f32 %v8036_v23, %v11521_v17 }
 0x54a   : > { %v7330_v41 = vpack.c.bf16 %v6459_v24, %v6458_v34 }
 0x54b   : > { %v7325_v35 = vpack.c.bf16 %v6457_v22, %v6456_v19  ;;  %v7975_v43 = vpop.f32.mrb[16].mxu0 }
 0x54c   : > { %7386 = vst [vmem:[%s11528_s11 + $0x28] sm:$0xff] %v7330_v41   ;;  %v8037_v6 = vadd.f32 %v7975_v43, %v7775_v5  ;;  %v6330_v45 = vpop.f32.mrb[17].mxu0 }
 0x54d   : > { %7385 = vst [vmem:[%s11528_s11 + $0x20] sm:$0xff] %v7325_v35   ;;  %v8038_v52 = vadd.f32 %v6330_v45, %v3444_v49  ;;  %v7976_v38 = vpop.f32.mrb[18].mxu0 }
 0x54e   : > { %v8039_v13 = vadd.f32 %v7976_v38, %v7776_v21  ;;  %v6333_v9 = vpop.f32.mrb[19].mxu0  ;;  %v6462_v50 = vadd.f32 %v8037_v6, %v11521_v17 }
 0x54f   : > { %v8040_v57 = vadd.f32 %v6333_v9, %v3447_v8  ;;  %v6460_v26 = vadd.f32 %v8038_v52, %v11521_v17 }
 0x550   : > { %v6463_v40 = vadd.f32 %v8039_v13, %v11521_v17 }
 0x551   : > { %v6461_v51 = vadd.f32 %v8040_v57, %v11521_v17 }
 0x552   : > { %v7340_v27 = vpack.c.bf16 %v6463_v40, %v6462_v50 }
 0x553   : > { %v7335_v42 = vpack.c.bf16 %v6461_v51, %v6460_v26  ;;  %v7979_v10 = vpop.f32.mrb[20].mxu0 }
 0x554   : > { %7388 = vst [vmem:[%s11528_s11 + $0x38] sm:$0xff] %v7340_v27   ;;  %v6346_v18 = vpop.f32.mrb[21].mxu0 }
 0x555   : > { %7387 = vst [vmem:[%s11528_s11 + $0x30] sm:$0xff] %v7335_v42   ;;  %v7980_v59 = vpop.f32.mrb[22].mxu0 }
 0x556   : > { %v7819_v5 = vpop.f32.mrb[20].mxu1  ;;  %v6349_v49 = vpop.f32.mrb[23].mxu0 }
 0x557   : > { %v4213_v21 = vpop.f32.mrb[21].mxu1  ;;  %v8041_v7 = vadd.f32 %v7979_v10, %v7819_v5 }
 0x558   : > { %v7820_v8 = vpop.f32.mrb[22].mxu1  ;;  %v8042_v58 = vadd.f32 %v6346_v18, %v4213_v21 }
 0x559   : > { %v4216_v39 = vpop.f32.mrb[23].mxu1  ;;  %v8043_v28 = vadd.f32 %v7980_v59, %v7820_v8  ;;  %v6466_v31 = vadd.f32 %v8041_v7, %v11521_v17 }
 0x55a   : > { %v8044_v47 = vadd.f32 %v6349_v49, %v4216_v39  ;;  %v6464_v15 = vadd.f32 %v8042_v58, %v11521_v17 }
 0x55b   : > { %v6467_v12 = vadd.f32 %v8043_v28, %v11521_v17  ;;  %v7983_v0 = vpop.f32.mrb[24].mxu0 }
 0x55c   : > { %v6465_v53 = vadd.f32 %v8044_v47, %v11521_v17  ;;  %v6362_v11 = vpop.f32.mrb[25].mxu0 }
 0x55d   : > { %v7350_v4 = vpack.c.bf16 %v6467_v12, %v6466_v31  ;;  %v7984_v56 = vpop.f32.mrb[26].mxu0 }
 0x55e   : > { %v7345_v61 = vpack.c.bf16 %v6465_v53, %v6464_v15  ;;  %v7823_v36 = vpop.f32.mrb[24].mxu1  ;;  %v6365_v20 = vpop.f32.mrb[27].mxu0 }
 0x55f   : > { %7390 = vst [vmem:[%s11528_s11 + $0x48] sm:$0xff] %v7350_v4   ;;  %v4229_v62 = vpop.f32.mrb[25].mxu1  ;;  %v8045_v3 = vadd.f32 %v7983_v0, %v7823_v36 }
 0x560   : > { %7389 = vst [vmem:[%s11528_s11 + $0x40] sm:$0xff] %v7345_v61   ;;  %v7824_v46 = vpop.f32.mrb[26].mxu1  ;;  %v8046_v48 = vadd.f32 %v6362_v11, %v4229_v62 }
 0x561   : > { %v4232_v33 = vpop.f32.mrb[27].mxu1  ;;  %v8047_v14 = vadd.f32 %v7984_v56, %v7824_v46  ;;  %v6470_v2 = vadd.f32 %v8045_v3, %v11521_v17 }
 0x562   : > { %v8048_v44 = vadd.f32 %v6365_v20, %v4232_v33  ;;  %v6468_v63 = vadd.f32 %v8046_v48, %v11521_v17 }
 0x563   : > { %v6471_v37 = vadd.f32 %v8047_v14, %v11521_v17  ;;  %v7987_v25 = vpop.f32.mrb[28].mxu0 }
 0x564   : > { %v6469_v1 = vadd.f32 %v8048_v44, %v11521_v17  ;;  %v6378_v60 = vpop.f32.mrb[29].mxu0 }
 0x565   : > { %v7360_v29 = vpack.c.bf16 %v6471_v37, %v6470_v2  ;;  %v7988_v30 = vpop.f32.mrb[30].mxu0 }
 0x566   : > { %v7355_v32 = vpack.c.bf16 %v6469_v1, %v6468_v63  ;;  %v7827_v55 = vpop.f32.mrb[28].mxu1  ;;  %v6381_v54 = vpop.f32.mrb[31].mxu0 }
 0x567   : > { %7392 = vst [vmem:[%s11528_s11 + $0x58] sm:$0xff] %v7360_v29   ;;  %v4245_v16 = vpop.f32.mrb[29].mxu1  ;;  %v8049_v23 = vadd.f32 %v7987_v25, %v7827_v55 }
 0x568   : > { %7391 = vst [vmem:[%s11528_s11 + $0x50] sm:$0xff] %v7355_v32   ;;  %v7828_v34 = vpop.f32.mrb[30].mxu1  ;;  %v8050_v24 = vadd.f32 %v6378_v60, %v4245_v16 }
 0x569   : > { %v4248_v19 = vpop.f32.mrb[31].mxu1  ;;  %v8051_v22 = vadd.f32 %v7988_v30, %v7828_v34  ;;  %v6474_v35 = vadd.f32 %v8049_v23, %v11521_v17 }
 0x56a   : > { %v8052_v41 = vadd.f32 %v6381_v54, %v4248_v19  ;;  %v6472_v45 = vadd.f32 %v8050_v24, %v11521_v17 }
 0x56b   : > { %v6475_v43 = vadd.f32 %v8051_v22, %v11521_v17  ;;  %v7991_v6 = vpop.f32.mrb[32].mxu0 }
 0x56c   : > { %v6473_v52 = vadd.f32 %v8052_v41, %v11521_v17  ;;  %v6394_v38 = vpop.f32.mrb[33].mxu0 }
 0x56d   : > { %v7370_v13 = vpack.c.bf16 %v6475_v43, %v6474_v35  ;;  %v7992_v9 = vpop.f32.mrb[34].mxu0 }
 0x56e   : > { %v7365_v57 = vpack.c.bf16 %v6473_v52, %v6472_v45  ;;  %v7831_v50 = vpop.f32.mrb[32].mxu1  ;;  %v6397_v40 = vpop.f32.mrb[35].mxu0 }
 0x56f   : > { %7394 = vst [vmem:[%s11528_s11 + $0x68] sm:$0xff] %v7370_v13   ;;  %v4261_v26 = vpop.f32.mrb[33].mxu1  ;;  %v8053_v51 = vadd.f32 %v7991_v6, %v7831_v50 }
 0x570   : > { %7393 = vst [vmem:[%s11528_s11 + $0x60] sm:$0xff] %v7365_v57   ;;  %v7832_v27 = vpop.f32.mrb[34].mxu1  ;;  %v8054_v42 = vadd.f32 %v6394_v38, %v4261_v26 }
 0x571   : > { %v4264_v10 = vpop.f32.mrb[35].mxu1  ;;  %v8055_v18 = vadd.f32 %v7992_v9, %v7832_v27  ;;  %v6478_v5 = vadd.f32 %v8053_v51, %v11521_v17 }
 0x572   : > { %v8056_v59 = vadd.f32 %v6397_v40, %v4264_v10  ;;  %v6476_v21 = vadd.f32 %v8054_v42, %v11521_v17 }
 0x573   : > { %v6479_v49 = vadd.f32 %v8055_v18, %v11521_v17 }
 0x574   : > { %v6477_v7 = vadd.f32 %v8056_v59, %v11521_v17 }
 0x575   : > { %v7380_v8 = vpack.c.bf16 %v6479_v49, %v6478_v5 }
 0x576   : > { %v7375_v58 = vpack.c.bf16 %v6477_v7, %v6476_v21 }
 0x577   : > { %7396 = vst [vmem:[%s11528_s11 + $0x78] sm:$0xff] %v7380_v8  }
 0x578   : > { %7395 = vst [vmem:[%s11528_s11 + $0x70] sm:$0xff] %v7375_v58  }
 0x579   : > { %8726 = shalt.err (!%p8723_p1)
}
 0x57a   : > { %s8727_s20 = scalar_lea.hbm %s11577_s18, 2048  ;;  %s8731_s30 = scalar_lea.hbm %s11631_s6, 4096 }
 0x57b   : > { %p8728_p13 = scmp.ne.s32.totalorder %s11577_s18, %s8727_s20  ;;  %p8732_p4 = scmp.lt.u32.totalorder %s11577_s18, %s11631_s6 }
 0x57c   : > { %p8733_p7 = scmp.lt.u32.totalorder %s8731_s30, %s8727_s20  ;;  %p8735_p11 = scmp.lt.u32.totalorder %s8727_s20, %s11577_s18 }
 0x57d   : > { %p8729_p6 = pnand %p8728_p13, %p11763_p0 }
 0x57e   : > { %p8734_p8 = por %p8733_p7, %p8732_p4 }
 0x57f   : > { %p8730_p10 = pneg %p8729_p6 }
 0x580   : > { %p8736_p2 = por %p8735_p11, %p8734_p8 }
 0x582   : > { %p8737_p3 = pnand %p8736_p2, %p8730_p10 }
 0x584   : > { %8740 = shalt.err (!%p8737_p3)
}
 0x585   : > { %s8797_s7 = smov 64   ;;  %s8798_s16 = smov 4  }
 0x586   : > { %8291 = dma.vmem_to_hbm [thread:$0]  (%p11763_p0), %s11579_s10, 2048, %s11577_s18, %s6641_s25, %s8797_s7, %s8797_s7, %s8798_s16  }
 0x587 PF: > { %s6669_s8 = sand.u32 1, %s8771_s21   ;;  %p11764_p5 = scmp.ne.s32.totalorder %s11662_s28, 0 }
 0x588   : > { %p11765_p9 = scmp.ge.s32.totalorder %s8783_s24, 2  ;;  %s6670_s27 = scalar_lea.sflag [#allocation5], %s6669_s8 }
 0x58a   : > { %p8305_p12 = pnand %p11765_p9, %p11764_p5 }
 0x58c   : > { %8766 = dma.done.wait (!%p8305_p12), %s6670_s27, 2048  }
 0x58d   : > { %8768 = vsyncadd (!%p8305_p12), %s6670_s27, 4294965248  ;;  %p20_p1 = scmp.ge.s32.totalorder %s8947_s9, 4   ;;  %s11766_s21 = smov %s8775_s22 }
 0x58e   : > { %s11767_s22 = smov %s8779_s23  ;;  %s11768_s23 = smov %s8956_s13 }
 0x58f   : > { %s11769_s24 = smov %s8947_s9  ;;  %22 = sbr.rel (!%p20_p1) target bundleno = 6 (0x6), region = 100 }
 0x596   :  { %6675 = vsyncpa [#allocation4], 1 }
 0x597   :  { %6677 = vsyncpa [#allocation4 + $0x1], 1 }
 0x598   :  { %6678 = vsyncpa [#allocation7], 1 }
 0x599   :  { %6679 = vsyncpa [#allocation5], 1 }
 0x59a   :  { %6681 = vsyncpa [#allocation5 + $0x1], 1 }

</bundles_post_ra>
